<compile_context>
chip_gen: v7x
topology: tpu7x:2x2x1
jax: 0.10.0
libtpu: 0.0.40
codegen_flags: <defaults>
</compile_context>

<pallas_src>
import functools
import math

import jax
import jax.numpy as jnp
from jax.experimental import pallas as pl
from jax.experimental.pallas import tpu as pltpu


# ------------------------------------------------------------------ fused kernel (one batch element per grid step)
def _gtrxl_dqn_kernel(
        x_ref, emb_w_ref, emb_b_ref, u_ref, v_ref,
        ln1_g_ref, ln1_b_ref, ln2_g_ref, ln2_b_ref,
        kv_w_ref, kv_b_ref, kv_mem_ref, q_w_ref, q_b_ref, r_shift_ref,
        proj_w_ref, proj_b_ref, mlp1_w_ref, mlp1_b_ref, mlp2_w_ref, mlp2_b_ref,
        gate_w_ref, gate_u_ref, gate_b_ref,
        head1_w_ref, head1_b_ref, head2_w_ref, head2_b_ref,
        out_ref,
        *, seq, act, D, H, d, L, mem, out_pad):
    f32 = jnp.float32
    Hd = H * d
    scale = 1.0 / math.sqrt(d)

    def mm(a, b):
        return jnp.dot(a, b, preferred_element_type=f32)

    def mm_t(a, b):
        # a (m,k) x b (n,k)^T -> (m,n) without an explicit transpose op
        return jax.lax.dot_general(a, b, (((1,), (1,)), ((), ())),
                                   preferred_element_type=f32)

    def layer_norm(xx, g, b):
        mu = jnp.mean(xx, axis=-1, keepdims=True)
        xc = xx - mu
        var = jnp.mean(xc * xc, axis=-1, keepdims=True)
        return xc * jax.lax.rsqrt(var + 1e-5) * g + b

    def gru_gate(xx, yy, gi):
        # fused: z = [yy|xx] @ [[Wr|Wz|Wg],[Ur|Uz|0]]  -> 2 matmuls per gate instead of 6
        w_stack = gate_w_ref[gi]                  # (2D, 3D)
        ug = gate_u_ref[gi]                       # (D, D)
        bg = gate_b_ref[gi:gi + 1, :]             # (1, D)
        z = mm(jnp.concatenate([yy, xx], axis=1), w_stack)   # (seq, 3D)
        rg = jax.nn.sigmoid(z[:, :D])
        zg = jax.nn.sigmoid(z[:, D:2 * D] - bg)
        hc = jnp.tanh(z[:, 2 * D:] + mm(rg * xx, ug))
        return (1.0 - zg) * xx + zg * hc

    # ---- embedding fc + ReLU (dropout p=0 is identity)
    out = jnp.maximum(mm(x_ref[...], emb_w_ref[...]) + emb_b_ref[...], 0.0)   # (seq, D)

    u_row = u_ref[...]                            # (1, Hd)
    v_row = v_ref[...]                            # (1, Hd)

    # causal additive bias for the current-key block; memory keys are always visible.
    qi = jax.lax.broadcasted_iota(jnp.int32, (seq, seq), 0)
    kj = jax.lax.broadcasted_iota(jnp.int32, (seq, seq), 1)
    causal_bias = jnp.where(kj > qi, -1e30, 0.0).astype(f32)  # (seq, seq)

    # TODO(synk): at production D/L make this layer loop a grid axis with streamed (bf16)
    # per-layer weight blocks; fully unrolled static loop is fine at these toy sizes.
    for l in range(L):
        x1 = layer_norm(out, ln1_g_ref[l:l + 1, :], ln1_b_ref[l:l + 1, :])   # (seq, D)
        kv_cur = mm(x1, kv_w_ref[l]) + kv_b_ref[l:l + 1, :]                  # (seq, 2*Hd)
        q = mm(out, q_w_ref[l]) + q_b_ref[l:l + 1, :]                        # (seq, Hd) from raw input
        qu = (q + u_row) * scale                    # attention scale folded into q
        qv = (q + v_row) * scale
        r_shift = r_shift_ref[l]                    # (seq, full, Hd)  host-precomputed, pre-shifted
        kv_mem = kv_mem_ref[l:l + 1, :]             # (1, 2*Hd)        host-precomputed (zero memory)

        head_outs = []
        for h in range(H):                          # tiny static unroll; plain 2-D math per head
            c0 = h * d
            qu_h = qu[:, c0:c0 + d]                 # (seq, d)
            qv_h = qv[:, c0:c0 + d]
            k_h = kv_cur[:, c0:c0 + d]              # (seq, d)
            v_h = kv_cur[:, Hd + c0:Hd + c0 + d]    # (seq, d)
            kmem_h = kv_mem[:, c0:c0 + d]           # (1, d)
            vmem_h = kv_mem[:, Hd + c0:Hd + c0 + d]  # (1, d)

            # positional term with the per-row pre-shifted r (covers memory + current columns)
            pos_h = jnp.sum(qv_h[:, None, :] * r_shift[:, :, c0:c0 + d], axis=-1)  # (seq, full)
            # content term: memory keys collapse to one constant row -> rank-1, no matmul columns
            cont_mem = jnp.sum(qu_h * kmem_h, axis=-1, keepdims=True)               # (seq, 1)
            cont_cur = mm_t(qu_h, k_h)                                              # (seq, seq)

            s_mem = cont_mem + pos_h[:, :mem]                       # (seq, mem)
            s_cur = cont_cur + pos_h[:, mem:] + causal_bias         # (seq, seq)

            m = jnp.maximum(jnp.max(s_mem, axis=-1, keepdims=True),
                            jnp.max(s_cur, axis=-1, keepdims=True))
            e_mem = jnp.exp(s_mem - m)
            e_cur = jnp.exp(s_cur - m)
            denom = (jnp.sum(e_mem, axis=-1, keepdims=True)
                     + jnp.sum(e_cur, axis=-1, keepdims=True))
            inv = pl.reciprocal(denom, approx=True)                 # EUP slot
            # AV: memory value is one constant row -> contribution = (mass on memory) * v_mem
            av_h = (mm(e_cur, v_h) * inv
                    + (jnp.sum(e_mem, axis=-1, keepdims=True) * inv) * vmem_h)     # (seq, d)
            head_outs.append(av_h)

        attn_vec = jnp.concatenate(head_outs, axis=1)               # (seq, Hd)
        a1 = jnp.maximum(mm(attn_vec, proj_w_ref[l]) + proj_b_ref[l:l + 1, :], 0.0)
        o1 = gru_gate(out, a1, 2 * l)
        x2 = layer_norm(o1, ln2_g_ref[l:l + 1, :], ln2_b_ref[l:l + 1, :])
        m1 = jnp.maximum(mm(x2, mlp1_w_ref[l]) + mlp1_b_ref[l:l + 1, :], 0.0)
        m2 = jnp.maximum(mm(m1, mlp2_w_ref[l]) + mlp2_b_ref[l:l + 1, :], 0.0)
        out = gru_gate(o1, m2, 2 * l + 1)

    # ---- DuelingHead: A/V hidden layers packed side-by-side, A2/V2 block-diagonal.
    hid = jnp.maximum(mm(out, head1_w_ref[...]) + head1_b_ref[...], 0.0)    # (seq, 2D)
    av_head = mm(hid, head2_w_ref[...]) + head2_b_ref[...]                  # (seq, act+1)
    adv = av_head[:, :act]
    val = av_head[:, act:act + 1]
    q_logit = adv - jnp.mean(adv, axis=-1, keepdims=True) + val
    # lane-dense store: [transformer_out | q_logit | 0-pad] -> width multiple of 128
    pad = jnp.zeros((seq, out_pad - D - act), f32)
    out_ref[...] = jnp.concatenate([out, q_logit, pad], axis=1)


# ------------------------------------------------------------------ parameters
def init_params(key, obs_dim, action_dim, D, H, d, L, gru_bias=2.0):
    keys = jax.random.split(key, 256)
    it = iter(keys)

    def nrm(shape, s=0.1):
        return (s * jax.random.normal(next(it), shape)).astype(jnp.float32)

    def gate():
        return {'wr': nrm((D, D)), 'ur': nrm((D, D)),
                'wz': nrm((D, D)), 'uz': nrm((D, D)),
                'wg': nrm((D, D)), 'ug': nrm((D, D)),
                'bg': jnp.full((D,), gru_bias, jnp.float32)}

    params = {
        'emb_w': nrm((obs_dim, D)), 'emb_b': nrm((D,)),
        'u': nrm((H, d)), 'v': nrm((H, d)),
        'layers': [],
        'head_a1_w': nrm((D, D)), 'head_a1_b': nrm((D,)),
        'head_a2_w': nrm((D, action_dim)), 'head_a2_b': nrm((action_dim,)),
        'head_v1_w': nrm((D, D)), 'head_v1_b': nrm((D,)),
        'head_v2_w': nrm((D, 1)), 'head_v2_b': nrm((1,)),
    }
    for _ in range(L):
        params['layers'].append({
            'ln1_g': jnp.ones((D,), jnp.float32), 'ln1_b': nrm((D,), 0.05),
            'ln2_g': jnp.ones((D,), jnp.float32), 'ln2_b': nrm((D,), 0.05),
            'kv_w': nrm((D, 2 * H * d)), 'kv_b': nrm((2 * H * d,)),
            'q_w': nrm((D, H * d)), 'q_b': nrm((H * d,)),
            'pos_w': nrm((D, H * d)), 'pos_b': nrm((H * d,)),
            'proj_w': nrm((H * d, D)), 'proj_b': nrm((D,)),
            'mlp1_w': nrm((D, D)), 'mlp1_b': nrm((D,)),
            'mlp2_w': nrm((D, D)), 'mlp2_b': nrm((D,)),
            'gate1': gate(), 'gate2': gate(),
        })
    return params


def _pack_params(params, *, D, H, d, L, act, seq, mem):
    """Host-side packing: stacked per-layer weights, hoisted weight-only matmuls
    (kv_mem, pre-shifted positional projection), fused GRU / head matrices."""
    Hd = H * d
    full = seq + mem
    ly = params['layers']
    f32 = jnp.float32

    # constant positional embedding (pure function of indices)
    pos_ips = jnp.arange(full - 1, -1, -1.0, dtype=f32)
    inv_freq = 1.0 / (10000.0 ** (jnp.arange(0.0, D, 2.0, dtype=f32) / D))
    sinusoid = jnp.outer(pos_ips, inv_freq)
    pos_emb = jnp.concatenate([jnp.sin(sinusoid), jnp.cos(sinusoid)], axis=-1)   # (full, D)

    # Transformer-XL relative shift, folded into the constant r:
    #   shifted[i, j] = r[j + seq - 1 - i]   on the visible band (rest is masked -> clamp)
    shift_idx = jnp.clip(
        jnp.arange(full)[None, :] + (seq - 1) - jnp.arange(seq)[:, None], 0, full - 1)

    def stk(name):
        return jnp.stack([ly[l][name] for l in range(L)], axis=0)

    def stkb(name):
        return jnp.stack([ly[l][name].reshape(-1) for l in range(L)], axis=0)

    r_shift, kv_mem = [], []
    for l in range(L):
        rmat = pos_emb @ ly[l]['pos_w'] + ly[l]['pos_b']          # (full, Hd)
        r_shift.append(rmat[shift_idx])                           # (seq, full, Hd)
        # zero (freshly reset) memory: LayerNorm(0) == LN bias -> one constant kv row per layer
        kv_mem.append(ly[l]['ln1_b'] @ ly[l]['kv_w'] + ly[l]['kv_b'])   # (2*Hd,)

    gate_w, gate_u, gate_b = [], [], []
    for l in range(L):
        for gname in ('gate1', 'gate2'):
            g = ly[l][gname]
            w_top = jnp.concatenate([g['wr'], g['wz'], g['wg']], axis=1)          # rows for y
            w_bot = jnp.concatenate([g['ur'], g['uz'], jnp.zeros((D, D), f32)], axis=1)  # rows for x
            gate_w.append(jnp.concatenate([w_top, w_bot], axis=0))                # (2D, 3D)
            gate_u.append(g['ug'])
            gate_b.append(g['bg'])

    head2_w = jnp.zeros((2 * D, act + 1), f32)
    head2_w = head2_w.at[:D, :act].set(params['head_a2_w'])
    head2_w = head2_w.at[D:, act:].set(params['head_v2_w'])

    # TODO(synk): at production sizes cast the stacked weights to bfloat16 (f32 accumulation);
    # kept f32 here at toy sizes.
    return {
        'emb_w': params['emb_w'], 'emb_b': params['emb_b'].reshape(1, D),
        'u': params['u'].reshape(1, Hd), 'v': params['v'].reshape(1, Hd),
        'ln1_g': stkb('ln1_g'), 'ln1_b': stkb('ln1_b'),
        'ln2_g': stkb('ln2_g'), 'ln2_b': stkb('ln2_b'),
        'kv_w': stk('kv_w'), 'kv_b': stkb('kv_b'),
        'kv_mem': jnp.stack(kv_mem, axis=0),                      # (L, 2*Hd)
        'q_w': stk('q_w'), 'q_b': stkb('q_b'),
        'r_shift': jnp.stack(r_shift, axis=0),                    # (L, seq, full, Hd)
        'proj_w': stk('proj_w'), 'proj_b': stkb('proj_b'),
        'mlp1_w': stk('mlp1_w'), 'mlp1_b': stkb('mlp1_b'),
        'mlp2_w': stk('mlp2_w'), 'mlp2_b': stkb('mlp2_b'),
        'gate_w': jnp.stack(gate_w, axis=0),                      # (2L, 2D, 3D)
        'gate_u': jnp.stack(gate_u, axis=0),                      # (2L, D, D)
        'gate_b': jnp.stack(gate_b, axis=0),                      # (2L, D)
        'head1_w': jnp.concatenate([params['head_a1_w'], params['head_v1_w']], axis=1),
        'head1_b': jnp.concatenate([params['head_a1_b'], params['head_v1_b']]).reshape(1, 2 * D),
        'head2_w': head2_w,
        'head2_b': jnp.concatenate([params['head_a2_b'], params['head_v2_b']]).reshape(1, act + 1),
    }


# ------------------------------------------------------------------ forward (wrapper)
def gtrxl_dqn_forward(params, x, *, hidden, head_num, head_dim, layer_num,
                      memory_len, action_dim):
    seq, bs, obs = x.shape
    D, H, d, L, mem = hidden, head_num, head_dim, layer_num, memory_len
    act = action_dim
    N = bs * seq
    out_pad = ((D + act + 127) // 128) * 128          # lane-dense output width

    pk = _pack_params(params, D=D, H=H, d=d, L=L, act=act, seq=seq, mem=mem)
    x2d = jnp.transpose(x, (1, 0, 2)).reshape(N, obs)  # rows ordered (batch, seq)

    inputs = (x2d, pk['emb_w'], pk['emb_b'], pk['u'], pk['v'],
              pk['ln1_g'], pk['ln1_b'], pk['ln2_g'], pk['ln2_b'],
              pk['kv_w'], pk['kv_b'], pk['kv_mem'], pk['q_w'], pk['q_b'], pk['r_shift'],
              pk['proj_w'], pk['proj_b'], pk['mlp1_w'], pk['mlp1_b'],
              pk['mlp2_w'], pk['mlp2_b'],
              pk['gate_w'], pk['gate_u'], pk['gate_b'],
              pk['head1_w'], pk['head1_b'], pk['head2_w'], pk['head2_b'])

    def full_spec(a):
        nd = a.ndim

        def imap(b):
            return (0,) * nd
        return pl.BlockSpec(a.shape, imap)

    in_specs = ([pl.BlockSpec((seq, obs), lambda b: (b, 0))]
                + [full_spec(a) for a in inputs[1:]])
    out_specs = pl.BlockSpec((seq, out_pad), lambda b: (b, 0))

    kernel = functools.partial(_gtrxl_dqn_kernel, seq=seq, act=act, D=D, H=H, d=d,
                               L=L, mem=mem, out_pad=out_pad)
    combined = pl.pallas_call(
        kernel,
        grid=(bs,),
        out_shape=jax.ShapeDtypeStruct((N, out_pad), jnp.float32),
        in_specs=in_specs,
        out_specs=out_specs,
        compiler_params=pltpu.CompilerParams(dimension_semantics=("parallel",)),
    )(*inputs)

    tout = combined[:, :D].reshape(bs, seq, D).transpose(1, 0, 2)            # (seq, bs, D)
    logit = combined[:, D:D + act].reshape(bs, seq, act).transpose(1, 0, 2)  # (seq, bs, act)
    # TODO(synk): stateful memory update/reset (reset_memory/get_memory) is host-side module
    # state; only the first-call (freshly reset, zero-memory) forward is reproduced, so the
    # returned memory equals the pre-update zero memory, exactly as torch returns on that call.
    memory = jnp.zeros((bs, L + 1, mem, D), jnp.float32)
    return {'logit': logit, 'memory': memory, 'transformer_out': tout}


# ------------------------------------------------------------------ pure-JAX reference
def gtrxl_dqn_reference(params, x, *, hidden, head_num, head_dim, layer_num,
                        memory_len, action_dim):
    seq, bs, obs = x.shape
    D, H, d, L, mem = hidden, head_num, head_dim, layer_num, memory_len
    full = seq + mem
    scale = 1.0 / math.sqrt(d)

    def ln(xx, g, b):
        mu = xx.mean(-1, keepdims=True)
        var = ((xx - mu) ** 2).mean(-1, keepdims=True)
        return (xx - mu) * jax.lax.rsqrt(var + 1e-5) * g + b

    h = jax.nn.relu(x @ params['emb_w'] + params['emb_b'])             # (seq, bs, D)

    pos_ips = jnp.arange(full - 1, -1, -1.0, dtype=jnp.float32)
    inv_freq = 1.0 / (10000.0 ** (jnp.arange(0.0, D, 2.0, dtype=jnp.float32) / D))
    sinusoid = jnp.outer(pos_ips, inv_freq)
    pos_emb = jnp.concatenate([jnp.sin(sinusoid), jnp.cos(sinusoid)], axis=-1)

    mask = (jnp.arange(full)[None, :] > jnp.arange(seq)[:, None] + mem)

    memory = jnp.zeros((L + 1, mem, bs, D), jnp.float32)
    u, v = params['u'], params['v']
    out = h
    for l in range(L):
        p = params['layers'][l]
        full_input = jnp.concatenate([memory[l], out], axis=0)
        x1 = ln(full_input, p['ln1_g'], p['ln1_b'])
        kv = x1 @ p['kv_w'] + p['kv_b']
        key, value = jnp.split(kv, 2, axis=-1)
        q = out @ p['q_w'] + p['q_b']
        r = pos_emb @ p['pos_w'] + p['pos_b']

        key = key.reshape(full, bs, H, d)
        value = value.reshape(full, bs, H, d)
        q = q.reshape(seq, bs, H, d)
        rr = r.reshape(full, H, d)

        content = jnp.einsum('ibhd,jbhd->bhij', q + u[None, None], key)
        pos_attn = jnp.einsum('ibhd,jhd->bhij', q + v[None, None], rr)
        pos_pad = jnp.pad(pos_attn, ((0, 0), (0, 0), (0, 0), (1, 0)))
        pos_shift = pos_pad.reshape(bs, H, full + 1, seq)[:, :, 1:, :].reshape(bs, H, seq, full)
        attn = (content + pos_shift) * scale
        attn = jnp.where(mask[None, None], -jnp.inf, attn)
        attn = jax.nn.softmax(attn, axis=-1)
        av = jnp.einsum('bhij,jbhd->ibhd', attn, value).reshape(seq, bs, H * d)
        a1 = jax.nn.relu(av @ p['proj_w'] + p['proj_b'])

        def gate(gp, xx, yy):
            rg = jax.nn.sigmoid(yy @ gp['wr'] + xx @ gp['ur'])
            zg = jax.nn.sigmoid(yy @ gp['wz'] + xx @ gp['uz'] - gp['bg'])
            hc = jnp.tanh(yy @ gp['wg'] + (rg * xx) @ gp['ug'])
            return (1.0 - zg) * xx + zg * hc

        o1 = gate(p['gate1'], out, a1)
        x2 = ln(o1, p['ln2_g'], p['ln2_b'])
        m1 = jax.nn.relu(x2 @ p['mlp1_w'] + p['mlp1_b'])
        m2 = jax.nn.relu(m1 @ p['mlp2_w'] + p['mlp2_b'])
        out = gate(p['gate2'], o1, m2)

    tout = out
    a_hid = jax.nn.relu(tout @ params['head_a1_w'] + params['head_a1_b'])
    a = a_hid @ params['head_a2_w'] + params['head_a2_b']
    v_hid = jax.nn.relu(tout @ params['head_v1_w'] + params['head_v1_b'])
    vv = v_hid @ params['head_v2_w'] + params['head_v2_b']
    q_value = a - a.mean(-1, keepdims=True) + vv
    return {'logit': q_value, 'transformer_out': tout}


# ------------------------------------------------------------------ main
if __name__ == "__main__":
    SEQ, BS, OBS, ACT = 8, 4, 32, 4
    D, H, DH, L, MEM = 16, 2, 8, 3, 16

    key = jax.random.PRNGKey(0)
    pkey, xkey = jax.random.split(key)
    params = init_params(pkey, OBS, ACT, D, H, DH, L)
    x = jax.random.normal(xkey, (SEQ, BS, OBS), dtype=jnp.float32)

    fwd = jax.jit(functools.partial(gtrxl_dqn_forward, hidden=D, head_num=H, head_dim=DH,
                                    layer_num=L, memory_len=MEM, action_dim=ACT))
    out = fwd(params, x)
    jax.block_until_ready(out)

    ref = gtrxl_dqn_reference(params, x, hidden=D, head_num=H, head_dim=DH,
                              layer_num=L, memory_len=MEM, action_dim=ACT)

    assert out['logit'].shape == (SEQ, BS, ACT)
    assert out['transformer_out'].shape == (SEQ, BS, D)
    assert out['memory'].shape == (BS, L + 1, MEM, D)
    assert bool(jnp.all(jnp.isfinite(out['logit'])))
    assert bool(jnp.all(jnp.isfinite(out['transformer_out'])))

    err_logit = float(jnp.max(jnp.abs(out['logit'] - ref['logit'])))
    err_tout = float(jnp.max(jnp.abs(out['transformer_out'] - ref['transformer_out'])))
    assert err_logit < 5e-2 and err_tout < 5e-2, (err_logit, err_tout)

    print("KERNEL_OK")
</pallas_src>

<mosaic_0001>
module attributes {stable_mosaic.version = 11 : i64} {
  func.func @_gtrxl_dqn_kernel(%arg0: i32, %arg1: memref<8x32xf32, #tpu.memory_space<vmem>>, %arg2: memref<32x16xf32, #tpu.memory_space<vmem>>, %arg3: memref<1x16xf32, #tpu.memory_space<vmem>>, %arg4: memref<1x16xf32, #tpu.memory_space<vmem>>, %arg5: memref<1x16xf32, #tpu.memory_space<vmem>>, %arg6: memref<3x16xf32, #tpu.memory_space<vmem>>, %arg7: memref<3x16xf32, #tpu.memory_space<vmem>>, %arg8: memref<3x16xf32, #tpu.memory_space<vmem>>, %arg9: memref<3x16xf32, #tpu.memory_space<vmem>>, %arg10: memref<3x16x32xf32, #tpu.memory_space<vmem>>, %arg11: memref<3x32xf32, #tpu.memory_space<vmem>>, %arg12: memref<3x32xf32, #tpu.memory_space<vmem>>, %arg13: memref<3x16x16xf32, #tpu.memory_space<vmem>>, %arg14: memref<3x16xf32, #tpu.memory_space<vmem>>, %arg15: memref<3x8x24x16xf32, #tpu.memory_space<vmem>>, %arg16: memref<3x16x16xf32, #tpu.memory_space<vmem>>, %arg17: memref<3x16xf32, #tpu.memory_space<vmem>>, %arg18: memref<3x16x16xf32, #tpu.memory_space<vmem>>, %arg19: memref<3x16xf32, #tpu.memory_space<vmem>>, %arg20: memref<3x16x16xf32, #tpu.memory_space<vmem>>, %arg21: memref<3x16xf32, #tpu.memory_space<vmem>>, %arg22: memref<6x32x48xf32, #tpu.memory_space<vmem>>, %arg23: memref<6x16x16xf32, #tpu.memory_space<vmem>>, %arg24: memref<6x16xf32, #tpu.memory_space<vmem>>, %arg25: memref<16x32xf32, #tpu.memory_space<vmem>>, %arg26: memref<1x32xf32, #tpu.memory_space<vmem>>, %arg27: memref<32x5xf32, #tpu.memory_space<vmem>>, %arg28: memref<1x5xf32, #tpu.memory_space<vmem>>, %arg29: memref<8x128xf32, #tpu.memory_space<vmem>>) attributes {dimension_semantics = [#tpu.dimension_semantics<parallel>], iteration_bounds = array<i64: 4>, scalar_prefetch = 0 : i64, scratch_operands = 0 : i64, tpu.core_type = #tpu.core_type<tc>, window_params = [{transform_indices = @transform_0, window_bounds = array<i64: 8, 32>}, {pipeline_mode = #tpu.pipeline_mode<synchronous>, transform_indices = @transform_1, window_bounds = array<i64: 32, 16>}, {pipeline_mode = #tpu.pipeline_mode<synchronous>, transform_indices = @transform_2, window_bounds = array<i64: 1, 16>}, {pipeline_mode = #tpu.pipeline_mode<synchronous>, transform_indices = @transform_3, window_bounds = array<i64: 1, 16>}, {pipeline_mode = #tpu.pipeline_mode<synchronous>, transform_indices = @transform_4, window_bounds = array<i64: 1, 16>}, {pipeline_mode = #tpu.pipeline_mode<synchronous>, transform_indices = @transform_5, window_bounds = array<i64: 3, 16>}, {pipeline_mode = #tpu.pipeline_mode<synchronous>, transform_indices = @transform_6, window_bounds = array<i64: 3, 16>}, {pipeline_mode = #tpu.pipeline_mode<synchronous>, transform_indices = @transform_7, window_bounds = array<i64: 3, 16>}, {pipeline_mode = #tpu.pipeline_mode<synchronous>, transform_indices = @transform_8, window_bounds = array<i64: 3, 16>}, {pipeline_mode = #tpu.pipeline_mode<synchronous>, transform_indices = @transform_9, window_bounds = array<i64: 3, 16, 32>}, {pipeline_mode = #tpu.pipeline_mode<synchronous>, transform_indices = @transform_10, window_bounds = array<i64: 3, 32>}, {pipeline_mode = #tpu.pipeline_mode<synchronous>, transform_indices = @transform_11, window_bounds = array<i64: 3, 32>}, {pipeline_mode = #tpu.pipeline_mode<synchronous>, transform_indices = @transform_12, window_bounds = array<i64: 3, 16, 16>}, {pipeline_mode = #tpu.pipeline_mode<synchronous>, transform_indices = @transform_13, window_bounds = array<i64: 3, 16>}, {pipeline_mode = #tpu.pipeline_mode<synchronous>, transform_indices = @transform_14, window_bounds = array<i64: 3, 8, 24, 16>}, {pipeline_mode = #tpu.pipeline_mode<synchronous>, transform_indices = @transform_15, window_bounds = array<i64: 3, 16, 16>}, {pipeline_mode = #tpu.pipeline_mode<synchronous>, transform_indices = @transform_16, window_bounds = array<i64: 3, 16>}, {pipeline_mode = #tpu.pipeline_mode<synchronous>, transform_indices = @transform_17, window_bounds = array<i64: 3, 16, 16>}, {pipeline_mode = #tpu.pipeline_mode<synchronous>, transform_indices = @transform_18, window_bounds = array<i64: 3, 16>}, {pipeline_mode = #tpu.pipeline_mode<synchronous>, transform_indices = @transform_19, window_bounds = array<i64: 3, 16, 16>}, {pipeline_mode = #tpu.pipeline_mode<synchronous>, transform_indices = @transform_20, window_bounds = array<i64: 3, 16>}, {pipeline_mode = #tpu.pipeline_mode<synchronous>, transform_indices = @transform_21, window_bounds = array<i64: 6, 32, 48>}, {pipeline_mode = #tpu.pipeline_mode<synchronous>, transform_indices = @transform_22, window_bounds = array<i64: 6, 16, 16>}, {pipeline_mode = #tpu.pipeline_mode<synchronous>, transform_indices = @transform_23, window_bounds = array<i64: 6, 16>}, {pipeline_mode = #tpu.pipeline_mode<synchronous>, transform_indices = @transform_24, window_bounds = array<i64: 16, 32>}, {pipeline_mode = #tpu.pipeline_mode<synchronous>, transform_indices = @transform_25, window_bounds = array<i64: 1, 32>}, {pipeline_mode = #tpu.pipeline_mode<synchronous>, transform_indices = @transform_26, window_bounds = array<i64: 32, 5>}, {pipeline_mode = #tpu.pipeline_mode<synchronous>, transform_indices = @transform_27, window_bounds = array<i64: 1, 5>}, {transform_indices = @transform_28, window_bounds = array<i64: 8, 128>}]} {
    %c0 = arith.constant 0 : index
    %c0_0 = arith.constant 0 : index
    %0 = vector.load %arg1[%c0, %c0_0] : memref<8x32xf32, #tpu.memory_space<vmem>>, vector<8x32xf32>
    %c0_1 = arith.constant 0 : index
    %c0_2 = arith.constant 0 : index
    %1 = vector.load %arg2[%c0_1, %c0_2] : memref<32x16xf32, #tpu.memory_space<vmem>>, vector<32x16xf32>
    %cst = arith.constant dense<0.000000e+00> : vector<8x16xf32>
    %2 = tpu.matmul %0, %1, %cst {dimension_numbers = #tpu.dot_dimension_numbers<[1], [0], [0], [1], [0, 0, 1, 1], [], []>} : vector<8x32xf32>, vector<32x16xf32>, vector<8x16xf32> -> vector<8x16xf32>
    %c0_3 = arith.constant 0 : index
    %c0_4 = arith.constant 0 : index
    %3 = vector.load %arg3[%c0_3, %c0_4] : memref<1x16xf32, #tpu.memory_space<vmem>>, vector<1x16xf32>
    %4 = vector.broadcast %3 : vector<1x16xf32> to vector<8x16xf32>
    %5 = arith.addf %2, %4 : vector<8x16xf32>
    %cst_5 = arith.constant 0.000000e+00 : f32
    %6 = vector.broadcast %cst_5 : f32 to vector<8x16xf32>
    %7 = arith.maximumf %5, %6 : vector<8x16xf32>
    %c0_6 = arith.constant 0 : index
    %c0_7 = arith.constant 0 : index
    %8 = vector.load %arg4[%c0_6, %c0_7] : memref<1x16xf32, #tpu.memory_space<vmem>>, vector<1x16xf32>
    %c0_8 = arith.constant 0 : index
    %c0_9 = arith.constant 0 : index
    %9 = vector.load %arg5[%c0_8, %c0_9] : memref<1x16xf32, #tpu.memory_space<vmem>>, vector<1x16xf32>
    %10 = tpu.iota {dimensions = array<i32: 0>} : vector<8x8xi32>
    %11 = tpu.iota {dimensions = array<i32: 1>} : vector<8x8xi32>
    %12 = arith.cmpi sgt, %11, %10 : vector<8x8xi32>
    %cst_10 = arith.constant -1.000000e+30 : f32
    %cst_11 = arith.constant 0.000000e+00 : f32
    %13 = vector.broadcast %cst_10 : f32 to vector<8x8xf32>
    %14 = vector.broadcast %cst_11 : f32 to vector<8x8xf32>
    %15 = arith.select %12, %13, %14 : vector<8x8xi1>, vector<8x8xf32>
    %c0_12 = arith.constant 0 : index
    %c0_13 = arith.constant 0 : index
    %16 = vector.load %arg6[%c0_12, %c0_13] : memref<3x16xf32, #tpu.memory_space<vmem>>, vector<1x16xf32>
    %c0_14 = arith.constant 0 : index
    %c0_15 = arith.constant 0 : index
    %17 = vector.load %arg7[%c0_14, %c0_15] : memref<3x16xf32, #tpu.memory_space<vmem>>, vector<1x16xf32>
    %cst_16 = arith.constant dense<0.000000e+00> : vector<8xf32>
    %18 = vector.multi_reduction <add>, %7, %cst_16 [1] : vector<8x16xf32> to vector<8xf32>
    %19 = vector.shape_cast %18 : vector<8xf32> to vector<8x1xf32>
    %cst_17 = arith.constant 1.600000e+01 : f32
    %20 = vector.broadcast %cst_17 : f32 to vector<8x1xf32>
    %21 = arith.divf %19, %20 : vector<8x1xf32>
    %22 = vector.broadcast %21 : vector<8x1xf32> to vector<8x16xf32>
    %23 = arith.subf %7, %22 : vector<8x16xf32>
    %24 = arith.mulf %23, %23 : vector<8x16xf32>
    %cst_18 = arith.constant dense<0.000000e+00> : vector<8xf32>
    %25 = vector.multi_reduction <add>, %24, %cst_18 [1] : vector<8x16xf32> to vector<8xf32>
    %26 = vector.shape_cast %25 : vector<8xf32> to vector<8x1xf32>
    %cst_19 = arith.constant 1.600000e+01 : f32
    %27 = vector.broadcast %cst_19 : f32 to vector<8x1xf32>
    %28 = arith.divf %26, %27 : vector<8x1xf32>
    %cst_20 = arith.constant 9.99999974E-6 : f32
    %29 = vector.broadcast %cst_20 : f32 to vector<8x1xf32>
    %30 = arith.addf %28, %29 : vector<8x1xf32>
    %31 = math.rsqrt %30 : vector<8x1xf32>
    %32 = vector.broadcast %31 : vector<8x1xf32> to vector<8x16xf32>
    %33 = arith.mulf %23, %32 : vector<8x16xf32>
    %34 = vector.broadcast %16 : vector<1x16xf32> to vector<8x16xf32>
    %35 = arith.mulf %33, %34 : vector<8x16xf32>
    %36 = vector.broadcast %17 : vector<1x16xf32> to vector<8x16xf32>
    %37 = arith.addf %35, %36 : vector<8x16xf32>
    %c0_21 = arith.constant 0 : index
    %c0_22 = arith.constant 0 : index
    %c0_23 = arith.constant 0 : index
    %38 = vector.load %arg10[%c0_21, %c0_22, %c0_23] : memref<3x16x32xf32, #tpu.memory_space<vmem>>, vector<1x16x32xf32>
    %39 = vector.shape_cast %38 : vector<1x16x32xf32> to vector<16x32xf32>
    %cst_24 = arith.constant dense<0.000000e+00> : vector<8x32xf32>
    %40 = tpu.matmul %37, %39, %cst_24 {dimension_numbers = #tpu.dot_dimension_numbers<[1], [0], [0], [1], [0, 0, 1, 1], [], []>} : vector<8x16xf32>, vector<16x32xf32>, vector<8x32xf32> -> vector<8x32xf32>
    %c0_25 = arith.constant 0 : index
    %c0_26 = arith.constant 0 : index
    %41 = vector.load %arg11[%c0_25, %c0_26] : memref<3x32xf32, #tpu.memory_space<vmem>>, vector<1x32xf32>
    %42 = vector.broadcast %41 : vector<1x32xf32> to vector<8x32xf32>
    %43 = arith.addf %40, %42 : vector<8x32xf32>
    %c0_27 = arith.constant 0 : index
    %c0_28 = arith.constant 0 : index
    %c0_29 = arith.constant 0 : index
    %44 = vector.load %arg13[%c0_27, %c0_28, %c0_29] : memref<3x16x16xf32, #tpu.memory_space<vmem>>, vector<1x16x16xf32>
    %45 = vector.shape_cast %44 : vector<1x16x16xf32> to vector<16x16xf32>
    %cst_30 = arith.constant dense<0.000000e+00> : vector<8x16xf32>
    %46 = tpu.matmul %7, %45, %cst_30 {dimension_numbers = #tpu.dot_dimension_numbers<[1], [0], [0], [1], [0, 0, 1, 1], [], []>} : vector<8x16xf32>, vector<16x16xf32>, vector<8x16xf32> -> vector<8x16xf32>
    %c0_31 = arith.constant 0 : index
    %c0_32 = arith.constant 0 : index
    %47 = vector.load %arg14[%c0_31, %c0_32] : memref<3x16xf32, #tpu.memory_space<vmem>>, vector<1x16xf32>
    %48 = vector.broadcast %47 : vector<1x16xf32> to vector<8x16xf32>
    %49 = arith.addf %46, %48 : vector<8x16xf32>
    %50 = vector.broadcast %8 : vector<1x16xf32> to vector<8x16xf32>
    %51 = arith.addf %49, %50 : vector<8x16xf32>
    %cst_33 = arith.constant 0.353553385 : f32
    %52 = vector.broadcast %cst_33 : f32 to vector<8x16xf32>
    %53 = arith.mulf %51, %52 : vector<8x16xf32>
    %54 = vector.broadcast %9 : vector<1x16xf32> to vector<8x16xf32>
    %55 = arith.addf %49, %54 : vector<8x16xf32>
    %cst_34 = arith.constant 0.353553385 : f32
    %56 = vector.broadcast %cst_34 : f32 to vector<8x16xf32>
    %57 = arith.mulf %55, %56 : vector<8x16xf32>
    %c0_35 = arith.constant 0 : index
    %c0_36 = arith.constant 0 : index
    %c0_37 = arith.constant 0 : index
    %c0_38 = arith.constant 0 : index
    %58 = vector.load %arg15[%c0_35, %c0_36, %c0_37, %c0_38] : memref<3x8x24x16xf32, #tpu.memory_space<vmem>>, vector<1x8x24x16xf32>
    %59 = vector.shape_cast %58 : vector<1x8x24x16xf32> to vector<8x24x16xf32>
    %c0_39 = arith.constant 0 : index
    %c0_40 = arith.constant 0 : index
    %60 = vector.load %arg12[%c0_39, %c0_40] : memref<3x32xf32, #tpu.memory_space<vmem>>, vector<1x32xf32>
    %61 = vector.extract_strided_slice %53 {offsets = [0, 0], sizes = [8, 8], strides = [1, 1]} : vector<8x16xf32> to vector<8x8xf32>
    %62 = vector.extract_strided_slice %57 {offsets = [0, 0], sizes = [8, 8], strides = [1, 1]} : vector<8x16xf32> to vector<8x8xf32>
    %63 = vector.extract_strided_slice %43 {offsets = [0, 0], sizes = [8, 8], strides = [1, 1]} : vector<8x32xf32> to vector<8x8xf32>
    %64 = vector.extract_strided_slice %43 {offsets = [0, 16], sizes = [8, 8], strides = [1, 1]} : vector<8x32xf32> to vector<8x8xf32>
    %65 = vector.extract_strided_slice %60 {offsets = [0, 0], sizes = [1, 8], strides = [1, 1]} : vector<1x32xf32> to vector<1x8xf32>
    %66 = vector.extract_strided_slice %60 {offsets = [0, 16], sizes = [1, 8], strides = [1, 1]} : vector<1x32xf32> to vector<1x8xf32>
    %67 = vector.shape_cast %62 : vector<8x8xf32> to vector<8x1x8xf32>
    %68 = vector.extract_strided_slice %59 {offsets = [0, 0, 0], sizes = [8, 24, 8], strides = [1, 1, 1]} : vector<8x24x16xf32> to vector<8x24x8xf32>
    %69 = vector.broadcast %67 : vector<8x1x8xf32> to vector<8x24x8xf32>
    %70 = arith.mulf %69, %68 : vector<8x24x8xf32>
    %cst_41 = arith.constant dense<0.000000e+00> : vector<8x24xf32>
    %71 = vector.multi_reduction <add>, %70, %cst_41 [2] : vector<8x24x8xf32> to vector<8x24xf32>
    %72 = vector.broadcast %65 : vector<1x8xf32> to vector<8x8xf32>
    %73 = arith.mulf %61, %72 : vector<8x8xf32>
    %cst_42 = arith.constant dense<0.000000e+00> : vector<8xf32>
    %74 = vector.multi_reduction <add>, %73, %cst_42 [1] : vector<8x8xf32> to vector<8xf32>
    %75 = vector.shape_cast %74 : vector<8xf32> to vector<8x1xf32>
    %cst_43 = arith.constant dense<0.000000e+00> : vector<8x8xf32>
    %76 = tpu.matmul %61, %63, %cst_43 {dimension_numbers = #tpu.dot_dimension_numbers<[1], [1], [0], [0], [0, 0, 1, 0], [], []>} : vector<8x8xf32>, vector<8x8xf32>, vector<8x8xf32> -> vector<8x8xf32>
    %77 = vector.extract_strided_slice %71 {offsets = [0, 0], sizes = [8, 16], strides = [1, 1]} : vector<8x24xf32> to vector<8x16xf32>
    %78 = vector.broadcast %75 : vector<8x1xf32> to vector<8x16xf32>
    %79 = arith.addf %78, %77 : vector<8x16xf32>
    %80 = vector.extract_strided_slice %71 {offsets = [0, 16], sizes = [8, 8], strides = [1, 1]} : vector<8x24xf32> to vector<8x8xf32>
    %81 = arith.addf %76, %80 : vector<8x8xf32>
    %82 = arith.addf %81, %15 : vector<8x8xf32>
    %cst_44 = arith.constant dense<0xFF800000> : vector<8xf32>
    %83 = vector.multi_reduction <maximumf>, %79, %cst_44 [1] : vector<8x16xf32> to vector<8xf32>
    %84 = vector.shape_cast %83 : vector<8xf32> to vector<8x1xf32>
    %cst_45 = arith.constant dense<0xFF800000> : vector<8xf32>
    %85 = vector.multi_reduction <maximumf>, %82, %cst_45 [1] : vector<8x8xf32> to vector<8xf32>
    %86 = vector.shape_cast %85 : vector<8xf32> to vector<8x1xf32>
    %87 = arith.maximumf %84, %86 : vector<8x1xf32>
    %88 = vector.broadcast %87 : vector<8x1xf32> to vector<8x16xf32>
    %89 = arith.subf %79, %88 : vector<8x16xf32>
    %90 = math.exp %89 : vector<8x16xf32>
    %91 = vector.broadcast %87 : vector<8x1xf32> to vector<8x8xf32>
    %92 = arith.subf %82, %91 : vector<8x8xf32>
    %93 = math.exp %92 : vector<8x8xf32>
    %cst_46 = arith.constant dense<0.000000e+00> : vector<8xf32>
    %94 = vector.multi_reduction <add>, %90, %cst_46 [1] : vector<8x16xf32> to vector<8xf32>
    %95 = vector.shape_cast %94 : vector<8xf32> to vector<8x1xf32>
    %cst_47 = arith.constant dense<0.000000e+00> : vector<8xf32>
    %96 = vector.multi_reduction <add>, %93, %cst_47 [1] : vector<8x8xf32> to vector<8xf32>
    %97 = vector.shape_cast %96 : vector<8xf32> to vector<8x1xf32>
    %98 = arith.addf %95, %97 : vector<8x1xf32>
    %99 = tpu.reciprocal %98 {approx = true} : vector<8x1xf32> -> vector<8x1xf32>
    %cst_48 = arith.constant dense<0.000000e+00> : vector<8x8xf32>
    %100 = tpu.matmul %93, %64, %cst_48 {dimension_numbers = #tpu.dot_dimension_numbers<[1], [0], [0], [1], [0, 0, 1, 1], [], []>} : vector<8x8xf32>, vector<8x8xf32>, vector<8x8xf32> -> vector<8x8xf32>
    %101 = vector.broadcast %99 : vector<8x1xf32> to vector<8x8xf32>
    %102 = arith.mulf %100, %101 : vector<8x8xf32>
    %cst_49 = arith.constant dense<0.000000e+00> : vector<8xf32>
    %103 = vector.multi_reduction <add>, %90, %cst_49 [1] : vector<8x16xf32> to vector<8xf32>
    %104 = vector.shape_cast %103 : vector<8xf32> to vector<8x1xf32>
    %105 = arith.mulf %104, %99 : vector<8x1xf32>
    %106 = vector.broadcast %105 : vector<8x1xf32> to vector<8x8xf32>
    %107 = vector.broadcast %66 : vector<1x8xf32> to vector<8x8xf32>
    %108 = arith.mulf %106, %107 : vector<8x8xf32>
    %109 = arith.addf %102, %108 : vector<8x8xf32>
    %110 = vector.extract_strided_slice %53 {offsets = [0, 8], sizes = [8, 8], strides = [1, 1]} : vector<8x16xf32> to vector<8x8xf32>
    %111 = vector.extract_strided_slice %57 {offsets = [0, 8], sizes = [8, 8], strides = [1, 1]} : vector<8x16xf32> to vector<8x8xf32>
    %112 = vector.extract_strided_slice %43 {offsets = [0, 8], sizes = [8, 8], strides = [1, 1]} : vector<8x32xf32> to vector<8x8xf32>
    %113 = vector.extract_strided_slice %43 {offsets = [0, 24], sizes = [8, 8], strides = [1, 1]} : vector<8x32xf32> to vector<8x8xf32>
    %114 = vector.extract_strided_slice %60 {offsets = [0, 8], sizes = [1, 8], strides = [1, 1]} : vector<1x32xf32> to vector<1x8xf32>
    %115 = vector.extract_strided_slice %60 {offsets = [0, 24], sizes = [1, 8], strides = [1, 1]} : vector<1x32xf32> to vector<1x8xf32>
    %116 = vector.shape_cast %111 : vector<8x8xf32> to vector<8x1x8xf32>
    %117 = vector.extract_strided_slice %59 {offsets = [0, 0, 8], sizes = [8, 24, 8], strides = [1, 1, 1]} : vector<8x24x16xf32> to vector<8x24x8xf32>
    %118 = vector.broadcast %116 : vector<8x1x8xf32> to vector<8x24x8xf32>
    %119 = arith.mulf %118, %117 : vector<8x24x8xf32>
    %cst_50 = arith.constant dense<0.000000e+00> : vector<8x24xf32>
    %120 = vector.multi_reduction <add>, %119, %cst_50 [2] : vector<8x24x8xf32> to vector<8x24xf32>
    %121 = vector.broadcast %114 : vector<1x8xf32> to vector<8x8xf32>
    %122 = arith.mulf %110, %121 : vector<8x8xf32>
    %cst_51 = arith.constant dense<0.000000e+00> : vector<8xf32>
    %123 = vector.multi_reduction <add>, %122, %cst_51 [1] : vector<8x8xf32> to vector<8xf32>
    %124 = vector.shape_cast %123 : vector<8xf32> to vector<8x1xf32>
    %cst_52 = arith.constant dense<0.000000e+00> : vector<8x8xf32>
    %125 = tpu.matmul %110, %112, %cst_52 {dimension_numbers = #tpu.dot_dimension_numbers<[1], [1], [0], [0], [0, 0, 1, 0], [], []>} : vector<8x8xf32>, vector<8x8xf32>, vector<8x8xf32> -> vector<8x8xf32>
    %126 = vector.extract_strided_slice %120 {offsets = [0, 0], sizes = [8, 16], strides = [1, 1]} : vector<8x24xf32> to vector<8x16xf32>
    %127 = vector.broadcast %124 : vector<8x1xf32> to vector<8x16xf32>
    %128 = arith.addf %127, %126 : vector<8x16xf32>
    %129 = vector.extract_strided_slice %120 {offsets = [0, 16], sizes = [8, 8], strides = [1, 1]} : vector<8x24xf32> to vector<8x8xf32>
    %130 = arith.addf %125, %129 : vector<8x8xf32>
    %131 = arith.addf %130, %15 : vector<8x8xf32>
    %cst_53 = arith.constant dense<0xFF800000> : vector<8xf32>
    %132 = vector.multi_reduction <maximumf>, %128, %cst_53 [1] : vector<8x16xf32> to vector<8xf32>
    %133 = vector.shape_cast %132 : vector<8xf32> to vector<8x1xf32>
    %cst_54 = arith.constant dense<0xFF800000> : vector<8xf32>
    %134 = vector.multi_reduction <maximumf>, %131, %cst_54 [1] : vector<8x8xf32> to vector<8xf32>
    %135 = vector.shape_cast %134 : vector<8xf32> to vector<8x1xf32>
    %136 = arith.maximumf %133, %135 : vector<8x1xf32>
    %137 = vector.broadcast %136 : vector<8x1xf32> to vector<8x16xf32>
    %138 = arith.subf %128, %137 : vector<8x16xf32>
    %139 = math.exp %138 : vector<8x16xf32>
    %140 = vector.broadcast %136 : vector<8x1xf32> to vector<8x8xf32>
    %141 = arith.subf %131, %140 : vector<8x8xf32>
    %142 = math.exp %141 : vector<8x8xf32>
    %cst_55 = arith.constant dense<0.000000e+00> : vector<8xf32>
    %143 = vector.multi_reduction <add>, %139, %cst_55 [1] : vector<8x16xf32> to vector<8xf32>
    %144 = vector.shape_cast %143 : vector<8xf32> to vector<8x1xf32>
    %cst_56 = arith.constant dense<0.000000e+00> : vector<8xf32>
    %145 = vector.multi_reduction <add>, %142, %cst_56 [1] : vector<8x8xf32> to vector<8xf32>
    %146 = vector.shape_cast %145 : vector<8xf32> to vector<8x1xf32>
    %147 = arith.addf %144, %146 : vector<8x1xf32>
    %148 = tpu.reciprocal %147 {approx = true} : vector<8x1xf32> -> vector<8x1xf32>
    %cst_57 = arith.constant dense<0.000000e+00> : vector<8x8xf32>
    %149 = tpu.matmul %142, %113, %cst_57 {dimension_numbers = #tpu.dot_dimension_numbers<[1], [0], [0], [1], [0, 0, 1, 1], [], []>} : vector<8x8xf32>, vector<8x8xf32>, vector<8x8xf32> -> vector<8x8xf32>
    %150 = vector.broadcast %148 : vector<8x1xf32> to vector<8x8xf32>
    %151 = arith.mulf %149, %150 : vector<8x8xf32>
    %cst_58 = arith.constant dense<0.000000e+00> : vector<8xf32>
    %152 = vector.multi_reduction <add>, %139, %cst_58 [1] : vector<8x16xf32> to vector<8xf32>
    %153 = vector.shape_cast %152 : vector<8xf32> to vector<8x1xf32>
    %154 = arith.mulf %153, %148 : vector<8x1xf32>
    %155 = vector.broadcast %154 : vector<8x1xf32> to vector<8x8xf32>
    %156 = vector.broadcast %115 : vector<1x8xf32> to vector<8x8xf32>
    %157 = arith.mulf %155, %156 : vector<8x8xf32>
    %158 = arith.addf %151, %157 : vector<8x8xf32>
    %159 = tpu.concatenate %109, %158 in 1 : vector<8x8xf32>, vector<8x8xf32> -> vector<8x16xf32>
    %c0_59 = arith.constant 0 : index
    %c0_60 = arith.constant 0 : index
    %c0_61 = arith.constant 0 : index
    %160 = vector.load %arg16[%c0_59, %c0_60, %c0_61] : memref<3x16x16xf32, #tpu.memory_space<vmem>>, vector<1x16x16xf32>
    %161 = vector.shape_cast %160 : vector<1x16x16xf32> to vector<16x16xf32>
    %cst_62 = arith.constant dense<0.000000e+00> : vector<8x16xf32>
    %162 = tpu.matmul %159, %161, %cst_62 {dimension_numbers = #tpu.dot_dimension_numbers<[1], [0], [0], [1], [0, 0, 1, 1], [], []>} : vector<8x16xf32>, vector<16x16xf32>, vector<8x16xf32> -> vector<8x16xf32>
    %c0_63 = arith.constant 0 : index
    %c0_64 = arith.constant 0 : index
    %163 = vector.load %arg17[%c0_63, %c0_64] : memref<3x16xf32, #tpu.memory_space<vmem>>, vector<1x16xf32>
    %164 = vector.broadcast %163 : vector<1x16xf32> to vector<8x16xf32>
    %165 = arith.addf %162, %164 : vector<8x16xf32>
    %cst_65 = arith.constant 0.000000e+00 : f32
    %166 = vector.broadcast %cst_65 : f32 to vector<8x16xf32>
    %167 = arith.maximumf %165, %166 : vector<8x16xf32>
    %c0_66 = arith.constant 0 : index
    %c0_67 = arith.constant 0 : index
    %c0_68 = arith.constant 0 : index
    %168 = vector.load %arg22[%c0_66, %c0_67, %c0_68] : memref<6x32x48xf32, #tpu.memory_space<vmem>>, vector<1x32x48xf32>
    %169 = vector.shape_cast %168 : vector<1x32x48xf32> to vector<32x48xf32>
    %c0_69 = arith.constant 0 : index
    %c0_70 = arith.constant 0 : index
    %c0_71 = arith.constant 0 : index
    %170 = vector.load %arg23[%c0_69, %c0_70, %c0_71] : memref<6x16x16xf32, #tpu.memory_space<vmem>>, vector<1x16x16xf32>
    %171 = vector.shape_cast %170 : vector<1x16x16xf32> to vector<16x16xf32>
    %c0_72 = arith.constant 0 : index
    %c0_73 = arith.constant 0 : index
    %172 = vector.load %arg24[%c0_72, %c0_73] : memref<6x16xf32, #tpu.memory_space<vmem>>, vector<1x16xf32>
    %173 = tpu.concatenate %167, %7 in 1 : vector<8x16xf32>, vector<8x16xf32> -> vector<8x32xf32>
    %cst_74 = arith.constant dense<0.000000e+00> : vector<8x48xf32>
    %174 = tpu.matmul %173, %169, %cst_74 {dimension_numbers = #tpu.dot_dimension_numbers<[1], [0], [0], [1], [0, 0, 1, 1], [], []>} : vector<8x32xf32>, vector<32x48xf32>, vector<8x48xf32> -> vector<8x48xf32>
    %175 = vector.extract_strided_slice %174 {offsets = [0, 0], sizes = [8, 16], strides = [1, 1]} : vector<8x48xf32> to vector<8x16xf32>
    %176 = arith.negf %175 : vector<8x16xf32>
    %177 = math.exp %176 : vector<8x16xf32>
    %cst_75 = arith.constant 1.000000e+00 : f32
    %178 = vector.broadcast %cst_75 : f32 to vector<8x16xf32>
    %179 = arith.addf %178, %177 : vector<8x16xf32>
    %180 = arith.divf %178, %179 : vector<8x16xf32>
    %181 = vector.extract_strided_slice %174 {offsets = [0, 16], sizes = [8, 16], strides = [1, 1]} : vector<8x48xf32> to vector<8x16xf32>
    %182 = vector.broadcast %172 : vector<1x16xf32> to vector<8x16xf32>
    %183 = arith.subf %181, %182 : vector<8x16xf32>
    %184 = arith.negf %183 : vector<8x16xf32>
    %185 = math.exp %184 : vector<8x16xf32>
    %cst_76 = arith.constant 1.000000e+00 : f32
    %186 = vector.broadcast %cst_76 : f32 to vector<8x16xf32>
    %187 = arith.addf %186, %185 : vector<8x16xf32>
    %188 = arith.divf %186, %187 : vector<8x16xf32>
    %189 = vector.extract_strided_slice %174 {offsets = [0, 32], sizes = [8, 16], strides = [1, 1]} : vector<8x48xf32> to vector<8x16xf32>
    %190 = arith.mulf %180, %7 : vector<8x16xf32>
    %cst_77 = arith.constant dense<0.000000e+00> : vector<8x16xf32>
    %191 = tpu.matmul %190, %171, %cst_77 {dimension_numbers = #tpu.dot_dimension_numbers<[1], [0], [0], [1], [0, 0, 1, 1], [], []>} : vector<8x16xf32>, vector<16x16xf32>, vector<8x16xf32> -> vector<8x16xf32>
    %192 = arith.addf %189, %191 : vector<8x16xf32>
    %193 = math.tanh %192 : vector<8x16xf32>
    %cst_78 = arith.constant 1.000000e+00 : f32
    %194 = vector.broadcast %cst_78 : f32 to vector<8x16xf32>
    %195 = arith.subf %194, %188 : vector<8x16xf32>
    %196 = arith.mulf %195, %7 : vector<8x16xf32>
    %197 = arith.mulf %188, %193 : vector<8x16xf32>
    %198 = arith.addf %196, %197 : vector<8x16xf32>
    %c0_79 = arith.constant 0 : index
    %c0_80 = arith.constant 0 : index
    %199 = vector.load %arg8[%c0_79, %c0_80] : memref<3x16xf32, #tpu.memory_space<vmem>>, vector<1x16xf32>
    %c0_81 = arith.constant 0 : index
    %c0_82 = arith.constant 0 : index
    %200 = vector.load %arg9[%c0_81, %c0_82] : memref<3x16xf32, #tpu.memory_space<vmem>>, vector<1x16xf32>
    %cst_83 = arith.constant dense<0.000000e+00> : vector<8xf32>
    %201 = vector.multi_reduction <add>, %198, %cst_83 [1] : vector<8x16xf32> to vector<8xf32>
    %202 = vector.shape_cast %201 : vector<8xf32> to vector<8x1xf32>
    %cst_84 = arith.constant 1.600000e+01 : f32
    %203 = vector.broadcast %cst_84 : f32 to vector<8x1xf32>
    %204 = arith.divf %202, %203 : vector<8x1xf32>
    %205 = vector.broadcast %204 : vector<8x1xf32> to vector<8x16xf32>
    %206 = arith.subf %198, %205 : vector<8x16xf32>
    %207 = arith.mulf %206, %206 : vector<8x16xf32>
    %cst_85 = arith.constant dense<0.000000e+00> : vector<8xf32>
    %208 = vector.multi_reduction <add>, %207, %cst_85 [1] : vector<8x16xf32> to vector<8xf32>
    %209 = vector.shape_cast %208 : vector<8xf32> to vector<8x1xf32>
    %cst_86 = arith.constant 1.600000e+01 : f32
    %210 = vector.broadcast %cst_86 : f32 to vector<8x1xf32>
    %211 = arith.divf %209, %210 : vector<8x1xf32>
    %cst_87 = arith.constant 9.99999974E-6 : f32
    %212 = vector.broadcast %cst_87 : f32 to vector<8x1xf32>
    %213 = arith.addf %211, %212 : vector<8x1xf32>
    %214 = math.rsqrt %213 : vector<8x1xf32>
    %215 = vector.broadcast %214 : vector<8x1xf32> to vector<8x16xf32>
    %216 = arith.mulf %206, %215 : vector<8x16xf32>
    %217 = vector.broadcast %199 : vector<1x16xf32> to vector<8x16xf32>
    %218 = arith.mulf %216, %217 : vector<8x16xf32>
    %219 = vector.broadcast %200 : vector<1x16xf32> to vector<8x16xf32>
    %220 = arith.addf %218, %219 : vector<8x16xf32>
    %c0_88 = arith.constant 0 : index
    %c0_89 = arith.constant 0 : index
    %c0_90 = arith.constant 0 : index
    %221 = vector.load %arg18[%c0_88, %c0_89, %c0_90] : memref<3x16x16xf32, #tpu.memory_space<vmem>>, vector<1x16x16xf32>
    %222 = vector.shape_cast %221 : vector<1x16x16xf32> to vector<16x16xf32>
    %cst_91 = arith.constant dense<0.000000e+00> : vector<8x16xf32>
    %223 = tpu.matmul %220, %222, %cst_91 {dimension_numbers = #tpu.dot_dimension_numbers<[1], [0], [0], [1], [0, 0, 1, 1], [], []>} : vector<8x16xf32>, vector<16x16xf32>, vector<8x16xf32> -> vector<8x16xf32>
    %c0_92 = arith.constant 0 : index
    %c0_93 = arith.constant 0 : index
    %224 = vector.load %arg19[%c0_92, %c0_93] : memref<3x16xf32, #tpu.memory_space<vmem>>, vector<1x16xf32>
    %225 = vector.broadcast %224 : vector<1x16xf32> to vector<8x16xf32>
    %226 = arith.addf %223, %225 : vector<8x16xf32>
    %cst_94 = arith.constant 0.000000e+00 : f32
    %227 = vector.broadcast %cst_94 : f32 to vector<8x16xf32>
    %228 = arith.maximumf %226, %227 : vector<8x16xf32>
    %c0_95 = arith.constant 0 : index
    %c0_96 = arith.constant 0 : index
    %c0_97 = arith.constant 0 : index
    %229 = vector.load %arg20[%c0_95, %c0_96, %c0_97] : memref<3x16x16xf32, #tpu.memory_space<vmem>>, vector<1x16x16xf32>
    %230 = vector.shape_cast %229 : vector<1x16x16xf32> to vector<16x16xf32>
    %cst_98 = arith.constant dense<0.000000e+00> : vector<8x16xf32>
    %231 = tpu.matmul %228, %230, %cst_98 {dimension_numbers = #tpu.dot_dimension_numbers<[1], [0], [0], [1], [0, 0, 1, 1], [], []>} : vector<8x16xf32>, vector<16x16xf32>, vector<8x16xf32> -> vector<8x16xf32>
    %c0_99 = arith.constant 0 : index
    %c0_100 = arith.constant 0 : index
    %232 = vector.load %arg21[%c0_99, %c0_100] : memref<3x16xf32, #tpu.memory_space<vmem>>, vector<1x16xf32>
    %233 = vector.broadcast %232 : vector<1x16xf32> to vector<8x16xf32>
    %234 = arith.addf %231, %233 : vector<8x16xf32>
    %cst_101 = arith.constant 0.000000e+00 : f32
    %235 = vector.broadcast %cst_101 : f32 to vector<8x16xf32>
    %236 = arith.maximumf %234, %235 : vector<8x16xf32>
    %c1 = arith.constant 1 : index
    %c0_102 = arith.constant 0 : index
    %c0_103 = arith.constant 0 : index
    %237 = vector.load %arg22[%c1, %c0_102, %c0_103] : memref<6x32x48xf32, #tpu.memory_space<vmem>>, vector<1x32x48xf32>
    %238 = vector.shape_cast %237 : vector<1x32x48xf32> to vector<32x48xf32>
    %c1_104 = arith.constant 1 : index
    %c0_105 = arith.constant 0 : index
    %c0_106 = arith.constant 0 : index
    %239 = vector.load %arg23[%c1_104, %c0_105, %c0_106] : memref<6x16x16xf32, #tpu.memory_space<vmem>>, vector<1x16x16xf32>
    %240 = vector.shape_cast %239 : vector<1x16x16xf32> to vector<16x16xf32>
    %c1_107 = arith.constant 1 : index
    %c0_108 = arith.constant 0 : index
    %241 = vector.load %arg24[%c1_107, %c0_108] : memref<6x16xf32, #tpu.memory_space<vmem>>, vector<1x16xf32>
    %242 = tpu.concatenate %236, %198 in 1 : vector<8x16xf32>, vector<8x16xf32> -> vector<8x32xf32>
    %cst_109 = arith.constant dense<0.000000e+00> : vector<8x48xf32>
    %243 = tpu.matmul %242, %238, %cst_109 {dimension_numbers = #tpu.dot_dimension_numbers<[1], [0], [0], [1], [0, 0, 1, 1], [], []>} : vector<8x32xf32>, vector<32x48xf32>, vector<8x48xf32> -> vector<8x48xf32>
    %244 = vector.extract_strided_slice %243 {offsets = [0, 0], sizes = [8, 16], strides = [1, 1]} : vector<8x48xf32> to vector<8x16xf32>
    %245 = arith.negf %244 : vector<8x16xf32>
    %246 = math.exp %245 : vector<8x16xf32>
    %cst_110 = arith.constant 1.000000e+00 : f32
    %247 = vector.broadcast %cst_110 : f32 to vector<8x16xf32>
    %248 = arith.addf %247, %246 : vector<8x16xf32>
    %249 = arith.divf %247, %248 : vector<8x16xf32>
    %250 = vector.extract_strided_slice %243 {offsets = [0, 16], sizes = [8, 16], strides = [1, 1]} : vector<8x48xf32> to vector<8x16xf32>
    %251 = vector.broadcast %241 : vector<1x16xf32> to vector<8x16xf32>
    %252 = arith.subf %250, %251 : vector<8x16xf32>
    %253 = arith.negf %252 : vector<8x16xf32>
    %254 = math.exp %253 : vector<8x16xf32>
    %cst_111 = arith.constant 1.000000e+00 : f32
    %255 = vector.broadcast %cst_111 : f32 to vector<8x16xf32>
    %256 = arith.addf %255, %254 : vector<8x16xf32>
    %257 = arith.divf %255, %256 : vector<8x16xf32>
    %258 = vector.extract_strided_slice %243 {offsets = [0, 32], sizes = [8, 16], strides = [1, 1]} : vector<8x48xf32> to vector<8x16xf32>
    %259 = arith.mulf %249, %198 : vector<8x16xf32>
    %cst_112 = arith.constant dense<0.000000e+00> : vector<8x16xf32>
    %260 = tpu.matmul %259, %240, %cst_112 {dimension_numbers = #tpu.dot_dimension_numbers<[1], [0], [0], [1], [0, 0, 1, 1], [], []>} : vector<8x16xf32>, vector<16x16xf32>, vector<8x16xf32> -> vector<8x16xf32>
    %261 = arith.addf %258, %260 : vector<8x16xf32>
    %262 = math.tanh %261 : vector<8x16xf32>
    %cst_113 = arith.constant 1.000000e+00 : f32
    %263 = vector.broadcast %cst_113 : f32 to vector<8x16xf32>
    %264 = arith.subf %263, %257 : vector<8x16xf32>
    %265 = arith.mulf %264, %198 : vector<8x16xf32>
    %266 = arith.mulf %257, %262 : vector<8x16xf32>
    %267 = arith.addf %265, %266 : vector<8x16xf32>
    %c1_114 = arith.constant 1 : index
    %c0_115 = arith.constant 0 : index
    %268 = vector.load %arg6[%c1_114, %c0_115] : memref<3x16xf32, #tpu.memory_space<vmem>>, vector<1x16xf32>
    %c1_116 = arith.constant 1 : index
    %c0_117 = arith.constant 0 : index
    %269 = vector.load %arg7[%c1_116, %c0_117] : memref<3x16xf32, #tpu.memory_space<vmem>>, vector<1x16xf32>
    %cst_118 = arith.constant dense<0.000000e+00> : vector<8xf32>
    %270 = vector.multi_reduction <add>, %267, %cst_118 [1] : vector<8x16xf32> to vector<8xf32>
    %271 = vector.shape_cast %270 : vector<8xf32> to vector<8x1xf32>
    %cst_119 = arith.constant 1.600000e+01 : f32
    %272 = vector.broadcast %cst_119 : f32 to vector<8x1xf32>
    %273 = arith.divf %271, %272 : vector<8x1xf32>
    %274 = vector.broadcast %273 : vector<8x1xf32> to vector<8x16xf32>
    %275 = arith.subf %267, %274 : vector<8x16xf32>
    %276 = arith.mulf %275, %275 : vector<8x16xf32>
    %cst_120 = arith.constant dense<0.000000e+00> : vector<8xf32>
    %277 = vector.multi_reduction <add>, %276, %cst_120 [1] : vector<8x16xf32> to vector<8xf32>
    %278 = vector.shape_cast %277 : vector<8xf32> to vector<8x1xf32>
    %cst_121 = arith.constant 1.600000e+01 : f32
    %279 = vector.broadcast %cst_121 : f32 to vector<8x1xf32>
    %280 = arith.divf %278, %279 : vector<8x1xf32>
    %cst_122 = arith.constant 9.99999974E-6 : f32
    %281 = vector.broadcast %cst_122 : f32 to vector<8x1xf32>
    %282 = arith.addf %280, %281 : vector<8x1xf32>
    %283 = math.rsqrt %282 : vector<8x1xf32>
    %284 = vector.broadcast %283 : vector<8x1xf32> to vector<8x16xf32>
    %285 = arith.mulf %275, %284 : vector<8x16xf32>
    %286 = vector.broadcast %268 : vector<1x16xf32> to vector<8x16xf32>
    %287 = arith.mulf %285, %286 : vector<8x16xf32>
    %288 = vector.broadcast %269 : vector<1x16xf32> to vector<8x16xf32>
    %289 = arith.addf %287, %288 : vector<8x16xf32>
    %c1_123 = arith.constant 1 : index
    %c0_124 = arith.constant 0 : index
    %c0_125 = arith.constant 0 : index
    %290 = vector.load %arg10[%c1_123, %c0_124, %c0_125] : memref<3x16x32xf32, #tpu.memory_space<vmem>>, vector<1x16x32xf32>
    %291 = vector.shape_cast %290 : vector<1x16x32xf32> to vector<16x32xf32>
    %cst_126 = arith.constant dense<0.000000e+00> : vector<8x32xf32>
    %292 = tpu.matmul %289, %291, %cst_126 {dimension_numbers = #tpu.dot_dimension_numbers<[1], [0], [0], [1], [0, 0, 1, 1], [], []>} : vector<8x16xf32>, vector<16x32xf32>, vector<8x32xf32> -> vector<8x32xf32>
    %c1_127 = arith.constant 1 : index
    %c0_128 = arith.constant 0 : index
    %293 = vector.load %arg11[%c1_127, %c0_128] : memref<3x32xf32, #tpu.memory_space<vmem>>, vector<1x32xf32>
    %294 = vector.broadcast %293 : vector<1x32xf32> to vector<8x32xf32>
    %295 = arith.addf %292, %294 : vector<8x32xf32>
    %c1_129 = arith.constant 1 : index
    %c0_130 = arith.constant 0 : index
    %c0_131 = arith.constant 0 : index
    %296 = vector.load %arg13[%c1_129, %c0_130, %c0_131] : memref<3x16x16xf32, #tpu.memory_space<vmem>>, vector<1x16x16xf32>
    %297 = vector.shape_cast %296 : vector<1x16x16xf32> to vector<16x16xf32>
    %cst_132 = arith.constant dense<0.000000e+00> : vector<8x16xf32>
    %298 = tpu.matmul %267, %297, %cst_132 {dimension_numbers = #tpu.dot_dimension_numbers<[1], [0], [0], [1], [0, 0, 1, 1], [], []>} : vector<8x16xf32>, vector<16x16xf32>, vector<8x16xf32> -> vector<8x16xf32>
    %c1_133 = arith.constant 1 : index
    %c0_134 = arith.constant 0 : index
    %299 = vector.load %arg14[%c1_133, %c0_134] : memref<3x16xf32, #tpu.memory_space<vmem>>, vector<1x16xf32>
    %300 = vector.broadcast %299 : vector<1x16xf32> to vector<8x16xf32>
    %301 = arith.addf %298, %300 : vector<8x16xf32>
    %302 = vector.broadcast %8 : vector<1x16xf32> to vector<8x16xf32>
    %303 = arith.addf %301, %302 : vector<8x16xf32>
    %cst_135 = arith.constant 0.353553385 : f32
    %304 = vector.broadcast %cst_135 : f32 to vector<8x16xf32>
    %305 = arith.mulf %303, %304 : vector<8x16xf32>
    %306 = vector.broadcast %9 : vector<1x16xf32> to vector<8x16xf32>
    %307 = arith.addf %301, %306 : vector<8x16xf32>
    %cst_136 = arith.constant 0.353553385 : f32
    %308 = vector.broadcast %cst_136 : f32 to vector<8x16xf32>
    %309 = arith.mulf %307, %308 : vector<8x16xf32>
    %c1_137 = arith.constant 1 : index
    %c0_138 = arith.constant 0 : index
    %c0_139 = arith.constant 0 : index
    %c0_140 = arith.constant 0 : index
    %310 = vector.load %arg15[%c1_137, %c0_138, %c0_139, %c0_140] : memref<3x8x24x16xf32, #tpu.memory_space<vmem>>, vector<1x8x24x16xf32>
    %311 = vector.shape_cast %310 : vector<1x8x24x16xf32> to vector<8x24x16xf32>
    %c1_141 = arith.constant 1 : index
    %c0_142 = arith.constant 0 : index
    %312 = vector.load %arg12[%c1_141, %c0_142] : memref<3x32xf32, #tpu.memory_space<vmem>>, vector<1x32xf32>
    %313 = vector.extract_strided_slice %305 {offsets = [0, 0], sizes = [8, 8], strides = [1, 1]} : vector<8x16xf32> to vector<8x8xf32>
    %314 = vector.extract_strided_slice %309 {offsets = [0, 0], sizes = [8, 8], strides = [1, 1]} : vector<8x16xf32> to vector<8x8xf32>
    %315 = vector.extract_strided_slice %295 {offsets = [0, 0], sizes = [8, 8], strides = [1, 1]} : vector<8x32xf32> to vector<8x8xf32>
    %316 = vector.extract_strided_slice %295 {offsets = [0, 16], sizes = [8, 8], strides = [1, 1]} : vector<8x32xf32> to vector<8x8xf32>
    %317 = vector.extract_strided_slice %312 {offsets = [0, 0], sizes = [1, 8], strides = [1, 1]} : vector<1x32xf32> to vector<1x8xf32>
    %318 = vector.extract_strided_slice %312 {offsets = [0, 16], sizes = [1, 8], strides = [1, 1]} : vector<1x32xf32> to vector<1x8xf32>
    %319 = vector.shape_cast %314 : vector<8x8xf32> to vector<8x1x8xf32>
    %320 = vector.extract_strided_slice %311 {offsets = [0, 0, 0], sizes = [8, 24, 8], strides = [1, 1, 1]} : vector<8x24x16xf32> to vector<8x24x8xf32>
    %321 = vector.broadcast %319 : vector<8x1x8xf32> to vector<8x24x8xf32>
    %322 = arith.mulf %321, %320 : vector<8x24x8xf32>
    %cst_143 = arith.constant dense<0.000000e+00> : vector<8x24xf32>
    %323 = vector.multi_reduction <add>, %322, %cst_143 [2] : vector<8x24x8xf32> to vector<8x24xf32>
    %324 = vector.broadcast %317 : vector<1x8xf32> to vector<8x8xf32>
    %325 = arith.mulf %313, %324 : vector<8x8xf32>
    %cst_144 = arith.constant dense<0.000000e+00> : vector<8xf32>
    %326 = vector.multi_reduction <add>, %325, %cst_144 [1] : vector<8x8xf32> to vector<8xf32>
    %327 = vector.shape_cast %326 : vector<8xf32> to vector<8x1xf32>
    %cst_145 = arith.constant dense<0.000000e+00> : vector<8x8xf32>
    %328 = tpu.matmul %313, %315, %cst_145 {dimension_numbers = #tpu.dot_dimension_numbers<[1], [1], [0], [0], [0, 0, 1, 0], [], []>} : vector<8x8xf32>, vector<8x8xf32>, vector<8x8xf32> -> vector<8x8xf32>
    %329 = vector.extract_strided_slice %323 {offsets = [0, 0], sizes = [8, 16], strides = [1, 1]} : vector<8x24xf32> to vector<8x16xf32>
    %330 = vector.broadcast %327 : vector<8x1xf32> to vector<8x16xf32>
    %331 = arith.addf %330, %329 : vector<8x16xf32>
    %332 = vector.extract_strided_slice %323 {offsets = [0, 16], sizes = [8, 8], strides = [1, 1]} : vector<8x24xf32> to vector<8x8xf32>
    %333 = arith.addf %328, %332 : vector<8x8xf32>
    %334 = arith.addf %333, %15 : vector<8x8xf32>
    %cst_146 = arith.constant dense<0xFF800000> : vector<8xf32>
    %335 = vector.multi_reduction <maximumf>, %331, %cst_146 [1] : vector<8x16xf32> to vector<8xf32>
    %336 = vector.shape_cast %335 : vector<8xf32> to vector<8x1xf32>
    %cst_147 = arith.constant dense<0xFF800000> : vector<8xf32>
    %337 = vector.multi_reduction <maximumf>, %334, %cst_147 [1] : vector<8x8xf32> to vector<8xf32>
    %338 = vector.shape_cast %337 : vector<8xf32> to vector<8x1xf32>
    %339 = arith.maximumf %336, %338 : vector<8x1xf32>
    %340 = vector.broadcast %339 : vector<8x1xf32> to vector<8x16xf32>
    %341 = arith.subf %331, %340 : vector<8x16xf32>
    %342 = math.exp %341 : vector<8x16xf32>
    %343 = vector.broadcast %339 : vector<8x1xf32> to vector<8x8xf32>
    %344 = arith.subf %334, %343 : vector<8x8xf32>
    %345 = math.exp %344 : vector<8x8xf32>
    %cst_148 = arith.constant dense<0.000000e+00> : vector<8xf32>
    %346 = vector.multi_reduction <add>, %342, %cst_148 [1] : vector<8x16xf32> to vector<8xf32>
    %347 = vector.shape_cast %346 : vector<8xf32> to vector<8x1xf32>
    %cst_149 = arith.constant dense<0.000000e+00> : vector<8xf32>
    %348 = vector.multi_reduction <add>, %345, %cst_149 [1] : vector<8x8xf32> to vector<8xf32>
    %349 = vector.shape_cast %348 : vector<8xf32> to vector<8x1xf32>
    %350 = arith.addf %347, %349 : vector<8x1xf32>
    %351 = tpu.reciprocal %350 {approx = true} : vector<8x1xf32> -> vector<8x1xf32>
    %cst_150 = arith.constant dense<0.000000e+00> : vector<8x8xf32>
    %352 = tpu.matmul %345, %316, %cst_150 {dimension_numbers = #tpu.dot_dimension_numbers<[1], [0], [0], [1], [0, 0, 1, 1], [], []>} : vector<8x8xf32>, vector<8x8xf32>, vector<8x8xf32> -> vector<8x8xf32>
    %353 = vector.broadcast %351 : vector<8x1xf32> to vector<8x8xf32>
    %354 = arith.mulf %352, %353 : vector<8x8xf32>
    %cst_151 = arith.constant dense<0.000000e+00> : vector<8xf32>
    %355 = vector.multi_reduction <add>, %342, %cst_151 [1] : vector<8x16xf32> to vector<8xf32>
    %356 = vector.shape_cast %355 : vector<8xf32> to vector<8x1xf32>
    %357 = arith.mulf %356, %351 : vector<8x1xf32>
    %358 = vector.broadcast %357 : vector<8x1xf32> to vector<8x8xf32>
    %359 = vector.broadcast %318 : vector<1x8xf32> to vector<8x8xf32>
    %360 = arith.mulf %358, %359 : vector<8x8xf32>
    %361 = arith.addf %354, %360 : vector<8x8xf32>
    %362 = vector.extract_strided_slice %305 {offsets = [0, 8], sizes = [8, 8], strides = [1, 1]} : vector<8x16xf32> to vector<8x8xf32>
    %363 = vector.extract_strided_slice %309 {offsets = [0, 8], sizes = [8, 8], strides = [1, 1]} : vector<8x16xf32> to vector<8x8xf32>
    %364 = vector.extract_strided_slice %295 {offsets = [0, 8], sizes = [8, 8], strides = [1, 1]} : vector<8x32xf32> to vector<8x8xf32>
    %365 = vector.extract_strided_slice %295 {offsets = [0, 24], sizes = [8, 8], strides = [1, 1]} : vector<8x32xf32> to vector<8x8xf32>
    %366 = vector.extract_strided_slice %312 {offsets = [0, 8], sizes = [1, 8], strides = [1, 1]} : vector<1x32xf32> to vector<1x8xf32>
    %367 = vector.extract_strided_slice %312 {offsets = [0, 24], sizes = [1, 8], strides = [1, 1]} : vector<1x32xf32> to vector<1x8xf32>
    %368 = vector.shape_cast %363 : vector<8x8xf32> to vector<8x1x8xf32>
    %369 = vector.extract_strided_slice %311 {offsets = [0, 0, 8], sizes = [8, 24, 8], strides = [1, 1, 1]} : vector<8x24x16xf32> to vector<8x24x8xf32>
    %370 = vector.broadcast %368 : vector<8x1x8xf32> to vector<8x24x8xf32>
    %371 = arith.mulf %370, %369 : vector<8x24x8xf32>
    %cst_152 = arith.constant dense<0.000000e+00> : vector<8x24xf32>
    %372 = vector.multi_reduction <add>, %371, %cst_152 [2] : vector<8x24x8xf32> to vector<8x24xf32>
    %373 = vector.broadcast %366 : vector<1x8xf32> to vector<8x8xf32>
    %374 = arith.mulf %362, %373 : vector<8x8xf32>
    %cst_153 = arith.constant dense<0.000000e+00> : vector<8xf32>
    %375 = vector.multi_reduction <add>, %374, %cst_153 [1] : vector<8x8xf32> to vector<8xf32>
    %376 = vector.shape_cast %375 : vector<8xf32> to vector<8x1xf32>
    %cst_154 = arith.constant dense<0.000000e+00> : vector<8x8xf32>
    %377 = tpu.matmul %362, %364, %cst_154 {dimension_numbers = #tpu.dot_dimension_numbers<[1], [1], [0], [0], [0, 0, 1, 0], [], []>} : vector<8x8xf32>, vector<8x8xf32>, vector<8x8xf32> -> vector<8x8xf32>
    %378 = vector.extract_strided_slice %372 {offsets = [0, 0], sizes = [8, 16], strides = [1, 1]} : vector<8x24xf32> to vector<8x16xf32>
    %379 = vector.broadcast %376 : vector<8x1xf32> to vector<8x16xf32>
    %380 = arith.addf %379, %378 : vector<8x16xf32>
    %381 = vector.extract_strided_slice %372 {offsets = [0, 16], sizes = [8, 8], strides = [1, 1]} : vector<8x24xf32> to vector<8x8xf32>
    %382 = arith.addf %377, %381 : vector<8x8xf32>
    %383 = arith.addf %382, %15 : vector<8x8xf32>
    %cst_155 = arith.constant dense<0xFF800000> : vector<8xf32>
    %384 = vector.multi_reduction <maximumf>, %380, %cst_155 [1] : vector<8x16xf32> to vector<8xf32>
    %385 = vector.shape_cast %384 : vector<8xf32> to vector<8x1xf32>
    %cst_156 = arith.constant dense<0xFF800000> : vector<8xf32>
    %386 = vector.multi_reduction <maximumf>, %383, %cst_156 [1] : vector<8x8xf32> to vector<8xf32>
    %387 = vector.shape_cast %386 : vector<8xf32> to vector<8x1xf32>
    %388 = arith.maximumf %385, %387 : vector<8x1xf32>
    %389 = vector.broadcast %388 : vector<8x1xf32> to vector<8x16xf32>
    %390 = arith.subf %380, %389 : vector<8x16xf32>
    %391 = math.exp %390 : vector<8x16xf32>
    %392 = vector.broadcast %388 : vector<8x1xf32> to vector<8x8xf32>
    %393 = arith.subf %383, %392 : vector<8x8xf32>
    %394 = math.exp %393 : vector<8x8xf32>
    %cst_157 = arith.constant dense<0.000000e+00> : vector<8xf32>
    %395 = vector.multi_reduction <add>, %391, %cst_157 [1] : vector<8x16xf32> to vector<8xf32>
    %396 = vector.shape_cast %395 : vector<8xf32> to vector<8x1xf32>
    %cst_158 = arith.constant dense<0.000000e+00> : vector<8xf32>
    %397 = vector.multi_reduction <add>, %394, %cst_158 [1] : vector<8x8xf32> to vector<8xf32>
    %398 = vector.shape_cast %397 : vector<8xf32> to vector<8x1xf32>
    %399 = arith.addf %396, %398 : vector<8x1xf32>
    %400 = tpu.reciprocal %399 {approx = true} : vector<8x1xf32> -> vector<8x1xf32>
    %cst_159 = arith.constant dense<0.000000e+00> : vector<8x8xf32>
    %401 = tpu.matmul %394, %365, %cst_159 {dimension_numbers = #tpu.dot_dimension_numbers<[1], [0], [0], [1], [0, 0, 1, 1], [], []>} : vector<8x8xf32>, vector<8x8xf32>, vector<8x8xf32> -> vector<8x8xf32>
    %402 = vector.broadcast %400 : vector<8x1xf32> to vector<8x8xf32>
    %403 = arith.mulf %401, %402 : vector<8x8xf32>
    %cst_160 = arith.constant dense<0.000000e+00> : vector<8xf32>
    %404 = vector.multi_reduction <add>, %391, %cst_160 [1] : vector<8x16xf32> to vector<8xf32>
    %405 = vector.shape_cast %404 : vector<8xf32> to vector<8x1xf32>
    %406 = arith.mulf %405, %400 : vector<8x1xf32>
    %407 = vector.broadcast %406 : vector<8x1xf32> to vector<8x8xf32>
    %408 = vector.broadcast %367 : vector<1x8xf32> to vector<8x8xf32>
    %409 = arith.mulf %407, %408 : vector<8x8xf32>
    %410 = arith.addf %403, %409 : vector<8x8xf32>
    %411 = tpu.concatenate %361, %410 in 1 : vector<8x8xf32>, vector<8x8xf32> -> vector<8x16xf32>
    %c1_161 = arith.constant 1 : index
    %c0_162 = arith.constant 0 : index
    %c0_163 = arith.constant 0 : index
    %412 = vector.load %arg16[%c1_161, %c0_162, %c0_163] : memref<3x16x16xf32, #tpu.memory_space<vmem>>, vector<1x16x16xf32>
    %413 = vector.shape_cast %412 : vector<1x16x16xf32> to vector<16x16xf32>
    %cst_164 = arith.constant dense<0.000000e+00> : vector<8x16xf32>
    %414 = tpu.matmul %411, %413, %cst_164 {dimension_numbers = #tpu.dot_dimension_numbers<[1], [0], [0], [1], [0, 0, 1, 1], [], []>} : vector<8x16xf32>, vector<16x16xf32>, vector<8x16xf32> -> vector<8x16xf32>
    %c1_165 = arith.constant 1 : index
    %c0_166 = arith.constant 0 : index
    %415 = vector.load %arg17[%c1_165, %c0_166] : memref<3x16xf32, #tpu.memory_space<vmem>>, vector<1x16xf32>
    %416 = vector.broadcast %415 : vector<1x16xf32> to vector<8x16xf32>
    %417 = arith.addf %414, %416 : vector<8x16xf32>
    %cst_167 = arith.constant 0.000000e+00 : f32
    %418 = vector.broadcast %cst_167 : f32 to vector<8x16xf32>
    %419 = arith.maximumf %417, %418 : vector<8x16xf32>
    %c2 = arith.constant 2 : index
    %c0_168 = arith.constant 0 : index
    %c0_169 = arith.constant 0 : index
    %420 = vector.load %arg22[%c2, %c0_168, %c0_169] : memref<6x32x48xf32, #tpu.memory_space<vmem>>, vector<1x32x48xf32>
    %421 = vector.shape_cast %420 : vector<1x32x48xf32> to vector<32x48xf32>
    %c2_170 = arith.constant 2 : index
    %c0_171 = arith.constant 0 : index
    %c0_172 = arith.constant 0 : index
    %422 = vector.load %arg23[%c2_170, %c0_171, %c0_172] : memref<6x16x16xf32, #tpu.memory_space<vmem>>, vector<1x16x16xf32>
    %423 = vector.shape_cast %422 : vector<1x16x16xf32> to vector<16x16xf32>
    %c2_173 = arith.constant 2 : index
    %c0_174 = arith.constant 0 : index
    %424 = vector.load %arg24[%c2_173, %c0_174] : memref<6x16xf32, #tpu.memory_space<vmem>>, vector<1x16xf32>
    %425 = tpu.concatenate %419, %267 in 1 : vector<8x16xf32>, vector<8x16xf32> -> vector<8x32xf32>
    %cst_175 = arith.constant dense<0.000000e+00> : vector<8x48xf32>
    %426 = tpu.matmul %425, %421, %cst_175 {dimension_numbers = #tpu.dot_dimension_numbers<[1], [0], [0], [1], [0, 0, 1, 1], [], []>} : vector<8x32xf32>, vector<32x48xf32>, vector<8x48xf32> -> vector<8x48xf32>
    %427 = vector.extract_strided_slice %426 {offsets = [0, 0], sizes = [8, 16], strides = [1, 1]} : vector<8x48xf32> to vector<8x16xf32>
    %428 = arith.negf %427 : vector<8x16xf32>
    %429 = math.exp %428 : vector<8x16xf32>
    %cst_176 = arith.constant 1.000000e+00 : f32
    %430 = vector.broadcast %cst_176 : f32 to vector<8x16xf32>
    %431 = arith.addf %430, %429 : vector<8x16xf32>
    %432 = arith.divf %430, %431 : vector<8x16xf32>
    %433 = vector.extract_strided_slice %426 {offsets = [0, 16], sizes = [8, 16], strides = [1, 1]} : vector<8x48xf32> to vector<8x16xf32>
    %434 = vector.broadcast %424 : vector<1x16xf32> to vector<8x16xf32>
    %435 = arith.subf %433, %434 : vector<8x16xf32>
    %436 = arith.negf %435 : vector<8x16xf32>
    %437 = math.exp %436 : vector<8x16xf32>
    %cst_177 = arith.constant 1.000000e+00 : f32
    %438 = vector.broadcast %cst_177 : f32 to vector<8x16xf32>
    %439 = arith.addf %438, %437 : vector<8x16xf32>
    %440 = arith.divf %438, %439 : vector<8x16xf32>
    %441 = vector.extract_strided_slice %426 {offsets = [0, 32], sizes = [8, 16], strides = [1, 1]} : vector<8x48xf32> to vector<8x16xf32>
    %442 = arith.mulf %432, %267 : vector<8x16xf32>
    %cst_178 = arith.constant dense<0.000000e+00> : vector<8x16xf32>
    %443 = tpu.matmul %442, %423, %cst_178 {dimension_numbers = #tpu.dot_dimension_numbers<[1], [0], [0], [1], [0, 0, 1, 1], [], []>} : vector<8x16xf32>, vector<16x16xf32>, vector<8x16xf32> -> vector<8x16xf32>
    %444 = arith.addf %441, %443 : vector<8x16xf32>
    %445 = math.tanh %444 : vector<8x16xf32>
    %cst_179 = arith.constant 1.000000e+00 : f32
    %446 = vector.broadcast %cst_179 : f32 to vector<8x16xf32>
    %447 = arith.subf %446, %440 : vector<8x16xf32>
    %448 = arith.mulf %447, %267 : vector<8x16xf32>
    %449 = arith.mulf %440, %445 : vector<8x16xf32>
    %450 = arith.addf %448, %449 : vector<8x16xf32>
    %c1_180 = arith.constant 1 : index
    %c0_181 = arith.constant 0 : index
    %451 = vector.load %arg8[%c1_180, %c0_181] : memref<3x16xf32, #tpu.memory_space<vmem>>, vector<1x16xf32>
    %c1_182 = arith.constant 1 : index
    %c0_183 = arith.constant 0 : index
    %452 = vector.load %arg9[%c1_182, %c0_183] : memref<3x16xf32, #tpu.memory_space<vmem>>, vector<1x16xf32>
    %cst_184 = arith.constant dense<0.000000e+00> : vector<8xf32>
    %453 = vector.multi_reduction <add>, %450, %cst_184 [1] : vector<8x16xf32> to vector<8xf32>
    %454 = vector.shape_cast %453 : vector<8xf32> to vector<8x1xf32>
    %cst_185 = arith.constant 1.600000e+01 : f32
    %455 = vector.broadcast %cst_185 : f32 to vector<8x1xf32>
    %456 = arith.divf %454, %455 : vector<8x1xf32>
    %457 = vector.broadcast %456 : vector<8x1xf32> to vector<8x16xf32>
    %458 = arith.subf %450, %457 : vector<8x16xf32>
    %459 = arith.mulf %458, %458 : vector<8x16xf32>
    %cst_186 = arith.constant dense<0.000000e+00> : vector<8xf32>
    %460 = vector.multi_reduction <add>, %459, %cst_186 [1] : vector<8x16xf32> to vector<8xf32>
    %461 = vector.shape_cast %460 : vector<8xf32> to vector<8x1xf32>
    %cst_187 = arith.constant 1.600000e+01 : f32
    %462 = vector.broadcast %cst_187 : f32 to vector<8x1xf32>
    %463 = arith.divf %461, %462 : vector<8x1xf32>
    %cst_188 = arith.constant 9.99999974E-6 : f32
    %464 = vector.broadcast %cst_188 : f32 to vector<8x1xf32>
    %465 = arith.addf %463, %464 : vector<8x1xf32>
    %466 = math.rsqrt %465 : vector<8x1xf32>
    %467 = vector.broadcast %466 : vector<8x1xf32> to vector<8x16xf32>
    %468 = arith.mulf %458, %467 : vector<8x16xf32>
    %469 = vector.broadcast %451 : vector<1x16xf32> to vector<8x16xf32>
    %470 = arith.mulf %468, %469 : vector<8x16xf32>
    %471 = vector.broadcast %452 : vector<1x16xf32> to vector<8x16xf32>
    %472 = arith.addf %470, %471 : vector<8x16xf32>
    %c1_189 = arith.constant 1 : index
    %c0_190 = arith.constant 0 : index
    %c0_191 = arith.constant 0 : index
    %473 = vector.load %arg18[%c1_189, %c0_190, %c0_191] : memref<3x16x16xf32, #tpu.memory_space<vmem>>, vector<1x16x16xf32>
    %474 = vector.shape_cast %473 : vector<1x16x16xf32> to vector<16x16xf32>
    %cst_192 = arith.constant dense<0.000000e+00> : vector<8x16xf32>
    %475 = tpu.matmul %472, %474, %cst_192 {dimension_numbers = #tpu.dot_dimension_numbers<[1], [0], [0], [1], [0, 0, 1, 1], [], []>} : vector<8x16xf32>, vector<16x16xf32>, vector<8x16xf32> -> vector<8x16xf32>
    %c1_193 = arith.constant 1 : index
    %c0_194 = arith.constant 0 : index
    %476 = vector.load %arg19[%c1_193, %c0_194] : memref<3x16xf32, #tpu.memory_space<vmem>>, vector<1x16xf32>
    %477 = vector.broadcast %476 : vector<1x16xf32> to vector<8x16xf32>
    %478 = arith.addf %475, %477 : vector<8x16xf32>
    %cst_195 = arith.constant 0.000000e+00 : f32
    %479 = vector.broadcast %cst_195 : f32 to vector<8x16xf32>
    %480 = arith.maximumf %478, %479 : vector<8x16xf32>
    %c1_196 = arith.constant 1 : index
    %c0_197 = arith.constant 0 : index
    %c0_198 = arith.constant 0 : index
    %481 = vector.load %arg20[%c1_196, %c0_197, %c0_198] : memref<3x16x16xf32, #tpu.memory_space<vmem>>, vector<1x16x16xf32>
    %482 = vector.shape_cast %481 : vector<1x16x16xf32> to vector<16x16xf32>
    %cst_199 = arith.constant dense<0.000000e+00> : vector<8x16xf32>
    %483 = tpu.matmul %480, %482, %cst_199 {dimension_numbers = #tpu.dot_dimension_numbers<[1], [0], [0], [1], [0, 0, 1, 1], [], []>} : vector<8x16xf32>, vector<16x16xf32>, vector<8x16xf32> -> vector<8x16xf32>
    %c1_200 = arith.constant 1 : index
    %c0_201 = arith.constant 0 : index
    %484 = vector.load %arg21[%c1_200, %c0_201] : memref<3x16xf32, #tpu.memory_space<vmem>>, vector<1x16xf32>
    %485 = vector.broadcast %484 : vector<1x16xf32> to vector<8x16xf32>
    %486 = arith.addf %483, %485 : vector<8x16xf32>
    %cst_202 = arith.constant 0.000000e+00 : f32
    %487 = vector.broadcast %cst_202 : f32 to vector<8x16xf32>
    %488 = arith.maximumf %486, %487 : vector<8x16xf32>
    %c3 = arith.constant 3 : index
    %c0_203 = arith.constant 0 : index
    %c0_204 = arith.constant 0 : index
    %489 = vector.load %arg22[%c3, %c0_203, %c0_204] : memref<6x32x48xf32, #tpu.memory_space<vmem>>, vector<1x32x48xf32>
    %490 = vector.shape_cast %489 : vector<1x32x48xf32> to vector<32x48xf32>
    %c3_205 = arith.constant 3 : index
    %c0_206 = arith.constant 0 : index
    %c0_207 = arith.constant 0 : index
    %491 = vector.load %arg23[%c3_205, %c0_206, %c0_207] : memref<6x16x16xf32, #tpu.memory_space<vmem>>, vector<1x16x16xf32>
    %492 = vector.shape_cast %491 : vector<1x16x16xf32> to vector<16x16xf32>
    %c3_208 = arith.constant 3 : index
    %c0_209 = arith.constant 0 : index
    %493 = vector.load %arg24[%c3_208, %c0_209] : memref<6x16xf32, #tpu.memory_space<vmem>>, vector<1x16xf32>
    %494 = tpu.concatenate %488, %450 in 1 : vector<8x16xf32>, vector<8x16xf32> -> vector<8x32xf32>
    %cst_210 = arith.constant dense<0.000000e+00> : vector<8x48xf32>
    %495 = tpu.matmul %494, %490, %cst_210 {dimension_numbers = #tpu.dot_dimension_numbers<[1], [0], [0], [1], [0, 0, 1, 1], [], []>} : vector<8x32xf32>, vector<32x48xf32>, vector<8x48xf32> -> vector<8x48xf32>
    %496 = vector.extract_strided_slice %495 {offsets = [0, 0], sizes = [8, 16], strides = [1, 1]} : vector<8x48xf32> to vector<8x16xf32>
    %497 = arith.negf %496 : vector<8x16xf32>
    %498 = math.exp %497 : vector<8x16xf32>
    %cst_211 = arith.constant 1.000000e+00 : f32
    %499 = vector.broadcast %cst_211 : f32 to vector<8x16xf32>
    %500 = arith.addf %499, %498 : vector<8x16xf32>
    %501 = arith.divf %499, %500 : vector<8x16xf32>
    %502 = vector.extract_strided_slice %495 {offsets = [0, 16], sizes = [8, 16], strides = [1, 1]} : vector<8x48xf32> to vector<8x16xf32>
    %503 = vector.broadcast %493 : vector<1x16xf32> to vector<8x16xf32>
    %504 = arith.subf %502, %503 : vector<8x16xf32>
    %505 = arith.negf %504 : vector<8x16xf32>
    %506 = math.exp %505 : vector<8x16xf32>
    %cst_212 = arith.constant 1.000000e+00 : f32
    %507 = vector.broadcast %cst_212 : f32 to vector<8x16xf32>
    %508 = arith.addf %507, %506 : vector<8x16xf32>
    %509 = arith.divf %507, %508 : vector<8x16xf32>
    %510 = vector.extract_strided_slice %495 {offsets = [0, 32], sizes = [8, 16], strides = [1, 1]} : vector<8x48xf32> to vector<8x16xf32>
    %511 = arith.mulf %501, %450 : vector<8x16xf32>
    %cst_213 = arith.constant dense<0.000000e+00> : vector<8x16xf32>
    %512 = tpu.matmul %511, %492, %cst_213 {dimension_numbers = #tpu.dot_dimension_numbers<[1], [0], [0], [1], [0, 0, 1, 1], [], []>} : vector<8x16xf32>, vector<16x16xf32>, vector<8x16xf32> -> vector<8x16xf32>
    %513 = arith.addf %510, %512 : vector<8x16xf32>
    %514 = math.tanh %513 : vector<8x16xf32>
    %cst_214 = arith.constant 1.000000e+00 : f32
    %515 = vector.broadcast %cst_214 : f32 to vector<8x16xf32>
    %516 = arith.subf %515, %509 : vector<8x16xf32>
    %517 = arith.mulf %516, %450 : vector<8x16xf32>
    %518 = arith.mulf %509, %514 : vector<8x16xf32>
    %519 = arith.addf %517, %518 : vector<8x16xf32>
    %c2_215 = arith.constant 2 : index
    %c0_216 = arith.constant 0 : index
    %520 = vector.load %arg6[%c2_215, %c0_216] : memref<3x16xf32, #tpu.memory_space<vmem>>, vector<1x16xf32>
    %c2_217 = arith.constant 2 : index
    %c0_218 = arith.constant 0 : index
    %521 = vector.load %arg7[%c2_217, %c0_218] : memref<3x16xf32, #tpu.memory_space<vmem>>, vector<1x16xf32>
    %cst_219 = arith.constant dense<0.000000e+00> : vector<8xf32>
    %522 = vector.multi_reduction <add>, %519, %cst_219 [1] : vector<8x16xf32> to vector<8xf32>
    %523 = vector.shape_cast %522 : vector<8xf32> to vector<8x1xf32>
    %cst_220 = arith.constant 1.600000e+01 : f32
    %524 = vector.broadcast %cst_220 : f32 to vector<8x1xf32>
    %525 = arith.divf %523, %524 : vector<8x1xf32>
    %526 = vector.broadcast %525 : vector<8x1xf32> to vector<8x16xf32>
    %527 = arith.subf %519, %526 : vector<8x16xf32>
    %528 = arith.mulf %527, %527 : vector<8x16xf32>
    %cst_221 = arith.constant dense<0.000000e+00> : vector<8xf32>
    %529 = vector.multi_reduction <add>, %528, %cst_221 [1] : vector<8x16xf32> to vector<8xf32>
    %530 = vector.shape_cast %529 : vector<8xf32> to vector<8x1xf32>
    %cst_222 = arith.constant 1.600000e+01 : f32
    %531 = vector.broadcast %cst_222 : f32 to vector<8x1xf32>
    %532 = arith.divf %530, %531 : vector<8x1xf32>
    %cst_223 = arith.constant 9.99999974E-6 : f32
    %533 = vector.broadcast %cst_223 : f32 to vector<8x1xf32>
    %534 = arith.addf %532, %533 : vector<8x1xf32>
    %535 = math.rsqrt %534 : vector<8x1xf32>
    %536 = vector.broadcast %535 : vector<8x1xf32> to vector<8x16xf32>
    %537 = arith.mulf %527, %536 : vector<8x16xf32>
    %538 = vector.broadcast %520 : vector<1x16xf32> to vector<8x16xf32>
    %539 = arith.mulf %537, %538 : vector<8x16xf32>
    %540 = vector.broadcast %521 : vector<1x16xf32> to vector<8x16xf32>
    %541 = arith.addf %539, %540 : vector<8x16xf32>
    %c2_224 = arith.constant 2 : index
    %c0_225 = arith.constant 0 : index
    %c0_226 = arith.constant 0 : index
    %542 = vector.load %arg10[%c2_224, %c0_225, %c0_226] : memref<3x16x32xf32, #tpu.memory_space<vmem>>, vector<1x16x32xf32>
    %543 = vector.shape_cast %542 : vector<1x16x32xf32> to vector<16x32xf32>
    %cst_227 = arith.constant dense<0.000000e+00> : vector<8x32xf32>
    %544 = tpu.matmul %541, %543, %cst_227 {dimension_numbers = #tpu.dot_dimension_numbers<[1], [0], [0], [1], [0, 0, 1, 1], [], []>} : vector<8x16xf32>, vector<16x32xf32>, vector<8x32xf32> -> vector<8x32xf32>
    %c2_228 = arith.constant 2 : index
    %c0_229 = arith.constant 0 : index
    %545 = vector.load %arg11[%c2_228, %c0_229] : memref<3x32xf32, #tpu.memory_space<vmem>>, vector<1x32xf32>
    %546 = vector.broadcast %545 : vector<1x32xf32> to vector<8x32xf32>
    %547 = arith.addf %544, %546 : vector<8x32xf32>
    %c2_230 = arith.constant 2 : index
    %c0_231 = arith.constant 0 : index
    %c0_232 = arith.constant 0 : index
    %548 = vector.load %arg13[%c2_230, %c0_231, %c0_232] : memref<3x16x16xf32, #tpu.memory_space<vmem>>, vector<1x16x16xf32>
    %549 = vector.shape_cast %548 : vector<1x16x16xf32> to vector<16x16xf32>
    %cst_233 = arith.constant dense<0.000000e+00> : vector<8x16xf32>
    %550 = tpu.matmul %519, %549, %cst_233 {dimension_numbers = #tpu.dot_dimension_numbers<[1], [0], [0], [1], [0, 0, 1, 1], [], []>} : vector<8x16xf32>, vector<16x16xf32>, vector<8x16xf32> -> vector<8x16xf32>
    %c2_234 = arith.constant 2 : index
    %c0_235 = arith.constant 0 : index
    %551 = vector.load %arg14[%c2_234, %c0_235] : memref<3x16xf32, #tpu.memory_space<vmem>>, vector<1x16xf32>
    %552 = vector.broadcast %551 : vector<1x16xf32> to vector<8x16xf32>
    %553 = arith.addf %550, %552 : vector<8x16xf32>
    %554 = vector.broadcast %8 : vector<1x16xf32> to vector<8x16xf32>
    %555 = arith.addf %553, %554 : vector<8x16xf32>
    %cst_236 = arith.constant 0.353553385 : f32
    %556 = vector.broadcast %cst_236 : f32 to vector<8x16xf32>
    %557 = arith.mulf %555, %556 : vector<8x16xf32>
    %558 = vector.broadcast %9 : vector<1x16xf32> to vector<8x16xf32>
    %559 = arith.addf %553, %558 : vector<8x16xf32>
    %cst_237 = arith.constant 0.353553385 : f32
    %560 = vector.broadcast %cst_237 : f32 to vector<8x16xf32>
    %561 = arith.mulf %559, %560 : vector<8x16xf32>
    %c2_238 = arith.constant 2 : index
    %c0_239 = arith.constant 0 : index
    %c0_240 = arith.constant 0 : index
    %c0_241 = arith.constant 0 : index
    %562 = vector.load %arg15[%c2_238, %c0_239, %c0_240, %c0_241] : memref<3x8x24x16xf32, #tpu.memory_space<vmem>>, vector<1x8x24x16xf32>
    %563 = vector.shape_cast %562 : vector<1x8x24x16xf32> to vector<8x24x16xf32>
    %c2_242 = arith.constant 2 : index
    %c0_243 = arith.constant 0 : index
    %564 = vector.load %arg12[%c2_242, %c0_243] : memref<3x32xf32, #tpu.memory_space<vmem>>, vector<1x32xf32>
    %565 = vector.extract_strided_slice %557 {offsets = [0, 0], sizes = [8, 8], strides = [1, 1]} : vector<8x16xf32> to vector<8x8xf32>
    %566 = vector.extract_strided_slice %561 {offsets = [0, 0], sizes = [8, 8], strides = [1, 1]} : vector<8x16xf32> to vector<8x8xf32>
    %567 = vector.extract_strided_slice %547 {offsets = [0, 0], sizes = [8, 8], strides = [1, 1]} : vector<8x32xf32> to vector<8x8xf32>
    %568 = vector.extract_strided_slice %547 {offsets = [0, 16], sizes = [8, 8], strides = [1, 1]} : vector<8x32xf32> to vector<8x8xf32>
    %569 = vector.extract_strided_slice %564 {offsets = [0, 0], sizes = [1, 8], strides = [1, 1]} : vector<1x32xf32> to vector<1x8xf32>
    %570 = vector.extract_strided_slice %564 {offsets = [0, 16], sizes = [1, 8], strides = [1, 1]} : vector<1x32xf32> to vector<1x8xf32>
    %571 = vector.shape_cast %566 : vector<8x8xf32> to vector<8x1x8xf32>
    %572 = vector.extract_strided_slice %563 {offsets = [0, 0, 0], sizes = [8, 24, 8], strides = [1, 1, 1]} : vector<8x24x16xf32> to vector<8x24x8xf32>
    %573 = vector.broadcast %571 : vector<8x1x8xf32> to vector<8x24x8xf32>
    %574 = arith.mulf %573, %572 : vector<8x24x8xf32>
    %cst_244 = arith.constant dense<0.000000e+00> : vector<8x24xf32>
    %575 = vector.multi_reduction <add>, %574, %cst_244 [2] : vector<8x24x8xf32> to vector<8x24xf32>
    %576 = vector.broadcast %569 : vector<1x8xf32> to vector<8x8xf32>
    %577 = arith.mulf %565, %576 : vector<8x8xf32>
    %cst_245 = arith.constant dense<0.000000e+00> : vector<8xf32>
    %578 = vector.multi_reduction <add>, %577, %cst_245 [1] : vector<8x8xf32> to vector<8xf32>
    %579 = vector.shape_cast %578 : vector<8xf32> to vector<8x1xf32>
    %cst_246 = arith.constant dense<0.000000e+00> : vector<8x8xf32>
    %580 = tpu.matmul %565, %567, %cst_246 {dimension_numbers = #tpu.dot_dimension_numbers<[1], [1], [0], [0], [0, 0, 1, 0], [], []>} : vector<8x8xf32>, vector<8x8xf32>, vector<8x8xf32> -> vector<8x8xf32>
    %581 = vector.extract_strided_slice %575 {offsets = [0, 0], sizes = [8, 16], strides = [1, 1]} : vector<8x24xf32> to vector<8x16xf32>
    %582 = vector.broadcast %579 : vector<8x1xf32> to vector<8x16xf32>
    %583 = arith.addf %582, %581 : vector<8x16xf32>
    %584 = vector.extract_strided_slice %575 {offsets = [0, 16], sizes = [8, 8], strides = [1, 1]} : vector<8x24xf32> to vector<8x8xf32>
    %585 = arith.addf %580, %584 : vector<8x8xf32>
    %586 = arith.addf %585, %15 : vector<8x8xf32>
    %cst_247 = arith.constant dense<0xFF800000> : vector<8xf32>
    %587 = vector.multi_reduction <maximumf>, %583, %cst_247 [1] : vector<8x16xf32> to vector<8xf32>
    %588 = vector.shape_cast %587 : vector<8xf32> to vector<8x1xf32>
    %cst_248 = arith.constant dense<0xFF800000> : vector<8xf32>
    %589 = vector.multi_reduction <maximumf>, %586, %cst_248 [1] : vector<8x8xf32> to vector<8xf32>
    %590 = vector.shape_cast %589 : vector<8xf32> to vector<8x1xf32>
    %591 = arith.maximumf %588, %590 : vector<8x1xf32>
    %592 = vector.broadcast %591 : vector<8x1xf32> to vector<8x16xf32>
    %593 = arith.subf %583, %592 : vector<8x16xf32>
    %594 = math.exp %593 : vector<8x16xf32>
    %595 = vector.broadcast %591 : vector<8x1xf32> to vector<8x8xf32>
    %596 = arith.subf %586, %595 : vector<8x8xf32>
    %597 = math.exp %596 : vector<8x8xf32>
    %cst_249 = arith.constant dense<0.000000e+00> : vector<8xf32>
    %598 = vector.multi_reduction <add>, %594, %cst_249 [1] : vector<8x16xf32> to vector<8xf32>
    %599 = vector.shape_cast %598 : vector<8xf32> to vector<8x1xf32>
    %cst_250 = arith.constant dense<0.000000e+00> : vector<8xf32>
    %600 = vector.multi_reduction <add>, %597, %cst_250 [1] : vector<8x8xf32> to vector<8xf32>
    %601 = vector.shape_cast %600 : vector<8xf32> to vector<8x1xf32>
    %602 = arith.addf %599, %601 : vector<8x1xf32>
    %603 = tpu.reciprocal %602 {approx = true} : vector<8x1xf32> -> vector<8x1xf32>
    %cst_251 = arith.constant dense<0.000000e+00> : vector<8x8xf32>
    %604 = tpu.matmul %597, %568, %cst_251 {dimension_numbers = #tpu.dot_dimension_numbers<[1], [0], [0], [1], [0, 0, 1, 1], [], []>} : vector<8x8xf32>, vector<8x8xf32>, vector<8x8xf32> -> vector<8x8xf32>
    %605 = vector.broadcast %603 : vector<8x1xf32> to vector<8x8xf32>
    %606 = arith.mulf %604, %605 : vector<8x8xf32>
    %cst_252 = arith.constant dense<0.000000e+00> : vector<8xf32>
    %607 = vector.multi_reduction <add>, %594, %cst_252 [1] : vector<8x16xf32> to vector<8xf32>
    %608 = vector.shape_cast %607 : vector<8xf32> to vector<8x1xf32>
    %609 = arith.mulf %608, %603 : vector<8x1xf32>
    %610 = vector.broadcast %609 : vector<8x1xf32> to vector<8x8xf32>
    %611 = vector.broadcast %570 : vector<1x8xf32> to vector<8x8xf32>
    %612 = arith.mulf %610, %611 : vector<8x8xf32>
    %613 = arith.addf %606, %612 : vector<8x8xf32>
    %614 = vector.extract_strided_slice %557 {offsets = [0, 8], sizes = [8, 8], strides = [1, 1]} : vector<8x16xf32> to vector<8x8xf32>
    %615 = vector.extract_strided_slice %561 {offsets = [0, 8], sizes = [8, 8], strides = [1, 1]} : vector<8x16xf32> to vector<8x8xf32>
    %616 = vector.extract_strided_slice %547 {offsets = [0, 8], sizes = [8, 8], strides = [1, 1]} : vector<8x32xf32> to vector<8x8xf32>
    %617 = vector.extract_strided_slice %547 {offsets = [0, 24], sizes = [8, 8], strides = [1, 1]} : vector<8x32xf32> to vector<8x8xf32>
    %618 = vector.extract_strided_slice %564 {offsets = [0, 8], sizes = [1, 8], strides = [1, 1]} : vector<1x32xf32> to vector<1x8xf32>
    %619 = vector.extract_strided_slice %564 {offsets = [0, 24], sizes = [1, 8], strides = [1, 1]} : vector<1x32xf32> to vector<1x8xf32>
    %620 = vector.shape_cast %615 : vector<8x8xf32> to vector<8x1x8xf32>
    %621 = vector.extract_strided_slice %563 {offsets = [0, 0, 8], sizes = [8, 24, 8], strides = [1, 1, 1]} : vector<8x24x16xf32> to vector<8x24x8xf32>
    %622 = vector.broadcast %620 : vector<8x1x8xf32> to vector<8x24x8xf32>
    %623 = arith.mulf %622, %621 : vector<8x24x8xf32>
    %cst_253 = arith.constant dense<0.000000e+00> : vector<8x24xf32>
    %624 = vector.multi_reduction <add>, %623, %cst_253 [2] : vector<8x24x8xf32> to vector<8x24xf32>
    %625 = vector.broadcast %618 : vector<1x8xf32> to vector<8x8xf32>
    %626 = arith.mulf %614, %625 : vector<8x8xf32>
    %cst_254 = arith.constant dense<0.000000e+00> : vector<8xf32>
    %627 = vector.multi_reduction <add>, %626, %cst_254 [1] : vector<8x8xf32> to vector<8xf32>
    %628 = vector.shape_cast %627 : vector<8xf32> to vector<8x1xf32>
    %cst_255 = arith.constant dense<0.000000e+00> : vector<8x8xf32>
    %629 = tpu.matmul %614, %616, %cst_255 {dimension_numbers = #tpu.dot_dimension_numbers<[1], [1], [0], [0], [0, 0, 1, 0], [], []>} : vector<8x8xf32>, vector<8x8xf32>, vector<8x8xf32> -> vector<8x8xf32>
    %630 = vector.extract_strided_slice %624 {offsets = [0, 0], sizes = [8, 16], strides = [1, 1]} : vector<8x24xf32> to vector<8x16xf32>
    %631 = vector.broadcast %628 : vector<8x1xf32> to vector<8x16xf32>
    %632 = arith.addf %631, %630 : vector<8x16xf32>
    %633 = vector.extract_strided_slice %624 {offsets = [0, 16], sizes = [8, 8], strides = [1, 1]} : vector<8x24xf32> to vector<8x8xf32>
    %634 = arith.addf %629, %633 : vector<8x8xf32>
    %635 = arith.addf %634, %15 : vector<8x8xf32>
    %cst_256 = arith.constant dense<0xFF800000> : vector<8xf32>
    %636 = vector.multi_reduction <maximumf>, %632, %cst_256 [1] : vector<8x16xf32> to vector<8xf32>
    %637 = vector.shape_cast %636 : vector<8xf32> to vector<8x1xf32>
    %cst_257 = arith.constant dense<0xFF800000> : vector<8xf32>
    %638 = vector.multi_reduction <maximumf>, %635, %cst_257 [1] : vector<8x8xf32> to vector<8xf32>
    %639 = vector.shape_cast %638 : vector<8xf32> to vector<8x1xf32>
    %640 = arith.maximumf %637, %639 : vector<8x1xf32>
    %641 = vector.broadcast %640 : vector<8x1xf32> to vector<8x16xf32>
    %642 = arith.subf %632, %641 : vector<8x16xf32>
    %643 = math.exp %642 : vector<8x16xf32>
    %644 = vector.broadcast %640 : vector<8x1xf32> to vector<8x8xf32>
    %645 = arith.subf %635, %644 : vector<8x8xf32>
    %646 = math.exp %645 : vector<8x8xf32>
    %cst_258 = arith.constant dense<0.000000e+00> : vector<8xf32>
    %647 = vector.multi_reduction <add>, %643, %cst_258 [1] : vector<8x16xf32> to vector<8xf32>
    %648 = vector.shape_cast %647 : vector<8xf32> to vector<8x1xf32>
    %cst_259 = arith.constant dense<0.000000e+00> : vector<8xf32>
    %649 = vector.multi_reduction <add>, %646, %cst_259 [1] : vector<8x8xf32> to vector<8xf32>
    %650 = vector.shape_cast %649 : vector<8xf32> to vector<8x1xf32>
    %651 = arith.addf %648, %650 : vector<8x1xf32>
    %652 = tpu.reciprocal %651 {approx = true} : vector<8x1xf32> -> vector<8x1xf32>
    %cst_260 = arith.constant dense<0.000000e+00> : vector<8x8xf32>
    %653 = tpu.matmul %646, %617, %cst_260 {dimension_numbers = #tpu.dot_dimension_numbers<[1], [0], [0], [1], [0, 0, 1, 1], [], []>} : vector<8x8xf32>, vector<8x8xf32>, vector<8x8xf32> -> vector<8x8xf32>
    %654 = vector.broadcast %652 : vector<8x1xf32> to vector<8x8xf32>
    %655 = arith.mulf %653, %654 : vector<8x8xf32>
    %cst_261 = arith.constant dense<0.000000e+00> : vector<8xf32>
    %656 = vector.multi_reduction <add>, %643, %cst_261 [1] : vector<8x16xf32> to vector<8xf32>
    %657 = vector.shape_cast %656 : vector<8xf32> to vector<8x1xf32>
    %658 = arith.mulf %657, %652 : vector<8x1xf32>
    %659 = vector.broadcast %658 : vector<8x1xf32> to vector<8x8xf32>
    %660 = vector.broadcast %619 : vector<1x8xf32> to vector<8x8xf32>
    %661 = arith.mulf %659, %660 : vector<8x8xf32>
    %662 = arith.addf %655, %661 : vector<8x8xf32>
    %663 = tpu.concatenate %613, %662 in 1 : vector<8x8xf32>, vector<8x8xf32> -> vector<8x16xf32>
    %c2_262 = arith.constant 2 : index
    %c0_263 = arith.constant 0 : index
    %c0_264 = arith.constant 0 : index
    %664 = vector.load %arg16[%c2_262, %c0_263, %c0_264] : memref<3x16x16xf32, #tpu.memory_space<vmem>>, vector<1x16x16xf32>
    %665 = vector.shape_cast %664 : vector<1x16x16xf32> to vector<16x16xf32>
    %cst_265 = arith.constant dense<0.000000e+00> : vector<8x16xf32>
    %666 = tpu.matmul %663, %665, %cst_265 {dimension_numbers = #tpu.dot_dimension_numbers<[1], [0], [0], [1], [0, 0, 1, 1], [], []>} : vector<8x16xf32>, vector<16x16xf32>, vector<8x16xf32> -> vector<8x16xf32>
    %c2_266 = arith.constant 2 : index
    %c0_267 = arith.constant 0 : index
    %667 = vector.load %arg17[%c2_266, %c0_267] : memref<3x16xf32, #tpu.memory_space<vmem>>, vector<1x16xf32>
    %668 = vector.broadcast %667 : vector<1x16xf32> to vector<8x16xf32>
    %669 = arith.addf %666, %668 : vector<8x16xf32>
    %cst_268 = arith.constant 0.000000e+00 : f32
    %670 = vector.broadcast %cst_268 : f32 to vector<8x16xf32>
    %671 = arith.maximumf %669, %670 : vector<8x16xf32>
    %c4 = arith.constant 4 : index
    %c0_269 = arith.constant 0 : index
    %c0_270 = arith.constant 0 : index
    %672 = vector.load %arg22[%c4, %c0_269, %c0_270] : memref<6x32x48xf32, #tpu.memory_space<vmem>>, vector<1x32x48xf32>
    %673 = vector.shape_cast %672 : vector<1x32x48xf32> to vector<32x48xf32>
    %c4_271 = arith.constant 4 : index
    %c0_272 = arith.constant 0 : index
    %c0_273 = arith.constant 0 : index
    %674 = vector.load %arg23[%c4_271, %c0_272, %c0_273] : memref<6x16x16xf32, #tpu.memory_space<vmem>>, vector<1x16x16xf32>
    %675 = vector.shape_cast %674 : vector<1x16x16xf32> to vector<16x16xf32>
    %c4_274 = arith.constant 4 : index
    %c0_275 = arith.constant 0 : index
    %676 = vector.load %arg24[%c4_274, %c0_275] : memref<6x16xf32, #tpu.memory_space<vmem>>, vector<1x16xf32>
    %677 = tpu.concatenate %671, %519 in 1 : vector<8x16xf32>, vector<8x16xf32> -> vector<8x32xf32>
    %cst_276 = arith.constant dense<0.000000e+00> : vector<8x48xf32>
    %678 = tpu.matmul %677, %673, %cst_276 {dimension_numbers = #tpu.dot_dimension_numbers<[1], [0], [0], [1], [0, 0, 1, 1], [], []>} : vector<8x32xf32>, vector<32x48xf32>, vector<8x48xf32> -> vector<8x48xf32>
    %679 = vector.extract_strided_slice %678 {offsets = [0, 0], sizes = [8, 16], strides = [1, 1]} : vector<8x48xf32> to vector<8x16xf32>
    %680 = arith.negf %679 : vector<8x16xf32>
    %681 = math.exp %680 : vector<8x16xf32>
    %cst_277 = arith.constant 1.000000e+00 : f32
    %682 = vector.broadcast %cst_277 : f32 to vector<8x16xf32>
    %683 = arith.addf %682, %681 : vector<8x16xf32>
    %684 = arith.divf %682, %683 : vector<8x16xf32>
    %685 = vector.extract_strided_slice %678 {offsets = [0, 16], sizes = [8, 16], strides = [1, 1]} : vector<8x48xf32> to vector<8x16xf32>
    %686 = vector.broadcast %676 : vector<1x16xf32> to vector<8x16xf32>
    %687 = arith.subf %685, %686 : vector<8x16xf32>
    %688 = arith.negf %687 : vector<8x16xf32>
    %689 = math.exp %688 : vector<8x16xf32>
    %cst_278 = arith.constant 1.000000e+00 : f32
    %690 = vector.broadcast %cst_278 : f32 to vector<8x16xf32>
    %691 = arith.addf %690, %689 : vector<8x16xf32>
    %692 = arith.divf %690, %691 : vector<8x16xf32>
    %693 = vector.extract_strided_slice %678 {offsets = [0, 32], sizes = [8, 16], strides = [1, 1]} : vector<8x48xf32> to vector<8x16xf32>
    %694 = arith.mulf %684, %519 : vector<8x16xf32>
    %cst_279 = arith.constant dense<0.000000e+00> : vector<8x16xf32>
    %695 = tpu.matmul %694, %675, %cst_279 {dimension_numbers = #tpu.dot_dimension_numbers<[1], [0], [0], [1], [0, 0, 1, 1], [], []>} : vector<8x16xf32>, vector<16x16xf32>, vector<8x16xf32> -> vector<8x16xf32>
    %696 = arith.addf %693, %695 : vector<8x16xf32>
    %697 = math.tanh %696 : vector<8x16xf32>
    %cst_280 = arith.constant 1.000000e+00 : f32
    %698 = vector.broadcast %cst_280 : f32 to vector<8x16xf32>
    %699 = arith.subf %698, %692 : vector<8x16xf32>
    %700 = arith.mulf %699, %519 : vector<8x16xf32>
    %701 = arith.mulf %692, %697 : vector<8x16xf32>
    %702 = arith.addf %700, %701 : vector<8x16xf32>
    %c2_281 = arith.constant 2 : index
    %c0_282 = arith.constant 0 : index
    %703 = vector.load %arg8[%c2_281, %c0_282] : memref<3x16xf32, #tpu.memory_space<vmem>>, vector<1x16xf32>
    %c2_283 = arith.constant 2 : index
    %c0_284 = arith.constant 0 : index
    %704 = vector.load %arg9[%c2_283, %c0_284] : memref<3x16xf32, #tpu.memory_space<vmem>>, vector<1x16xf32>
    %cst_285 = arith.constant dense<0.000000e+00> : vector<8xf32>
    %705 = vector.multi_reduction <add>, %702, %cst_285 [1] : vector<8x16xf32> to vector<8xf32>
    %706 = vector.shape_cast %705 : vector<8xf32> to vector<8x1xf32>
    %cst_286 = arith.constant 1.600000e+01 : f32
    %707 = vector.broadcast %cst_286 : f32 to vector<8x1xf32>
    %708 = arith.divf %706, %707 : vector<8x1xf32>
    %709 = vector.broadcast %708 : vector<8x1xf32> to vector<8x16xf32>
    %710 = arith.subf %702, %709 : vector<8x16xf32>
    %711 = arith.mulf %710, %710 : vector<8x16xf32>
    %cst_287 = arith.constant dense<0.000000e+00> : vector<8xf32>
    %712 = vector.multi_reduction <add>, %711, %cst_287 [1] : vector<8x16xf32> to vector<8xf32>
    %713 = vector.shape_cast %712 : vector<8xf32> to vector<8x1xf32>
    %cst_288 = arith.constant 1.600000e+01 : f32
    %714 = vector.broadcast %cst_288 : f32 to vector<8x1xf32>
    %715 = arith.divf %713, %714 : vector<8x1xf32>
    %cst_289 = arith.constant 9.99999974E-6 : f32
    %716 = vector.broadcast %cst_289 : f32 to vector<8x1xf32>
    %717 = arith.addf %715, %716 : vector<8x1xf32>
    %718 = math.rsqrt %717 : vector<8x1xf32>
    %719 = vector.broadcast %718 : vector<8x1xf32> to vector<8x16xf32>
    %720 = arith.mulf %710, %719 : vector<8x16xf32>
    %721 = vector.broadcast %703 : vector<1x16xf32> to vector<8x16xf32>
    %722 = arith.mulf %720, %721 : vector<8x16xf32>
    %723 = vector.broadcast %704 : vector<1x16xf32> to vector<8x16xf32>
    %724 = arith.addf %722, %723 : vector<8x16xf32>
    %c2_290 = arith.constant 2 : index
    %c0_291 = arith.constant 0 : index
    %c0_292 = arith.constant 0 : index
    %725 = vector.load %arg18[%c2_290, %c0_291, %c0_292] : memref<3x16x16xf32, #tpu.memory_space<vmem>>, vector<1x16x16xf32>
    %726 = vector.shape_cast %725 : vector<1x16x16xf32> to vector<16x16xf32>
    %cst_293 = arith.constant dense<0.000000e+00> : vector<8x16xf32>
    %727 = tpu.matmul %724, %726, %cst_293 {dimension_numbers = #tpu.dot_dimension_numbers<[1], [0], [0], [1], [0, 0, 1, 1], [], []>} : vector<8x16xf32>, vector<16x16xf32>, vector<8x16xf32> -> vector<8x16xf32>
    %c2_294 = arith.constant 2 : index
    %c0_295 = arith.constant 0 : index
    %728 = vector.load %arg19[%c2_294, %c0_295] : memref<3x16xf32, #tpu.memory_space<vmem>>, vector<1x16xf32>
    %729 = vector.broadcast %728 : vector<1x16xf32> to vector<8x16xf32>
    %730 = arith.addf %727, %729 : vector<8x16xf32>
    %cst_296 = arith.constant 0.000000e+00 : f32
    %731 = vector.broadcast %cst_296 : f32 to vector<8x16xf32>
    %732 = arith.maximumf %730, %731 : vector<8x16xf32>
    %c2_297 = arith.constant 2 : index
    %c0_298 = arith.constant 0 : index
    %c0_299 = arith.constant 0 : index
    %733 = vector.load %arg20[%c2_297, %c0_298, %c0_299] : memref<3x16x16xf32, #tpu.memory_space<vmem>>, vector<1x16x16xf32>
    %734 = vector.shape_cast %733 : vector<1x16x16xf32> to vector<16x16xf32>
    %cst_300 = arith.constant dense<0.000000e+00> : vector<8x16xf32>
    %735 = tpu.matmul %732, %734, %cst_300 {dimension_numbers = #tpu.dot_dimension_numbers<[1], [0], [0], [1], [0, 0, 1, 1], [], []>} : vector<8x16xf32>, vector<16x16xf32>, vector<8x16xf32> -> vector<8x16xf32>
    %c2_301 = arith.constant 2 : index
    %c0_302 = arith.constant 0 : index
    %736 = vector.load %arg21[%c2_301, %c0_302] : memref<3x16xf32, #tpu.memory_space<vmem>>, vector<1x16xf32>
    %737 = vector.broadcast %736 : vector<1x16xf32> to vector<8x16xf32>
    %738 = arith.addf %735, %737 : vector<8x16xf32>
    %cst_303 = arith.constant 0.000000e+00 : f32
    %739 = vector.broadcast %cst_303 : f32 to vector<8x16xf32>
    %740 = arith.maximumf %738, %739 : vector<8x16xf32>
    %c5 = arith.constant 5 : index
    %c0_304 = arith.constant 0 : index
    %c0_305 = arith.constant 0 : index
    %741 = vector.load %arg22[%c5, %c0_304, %c0_305] : memref<6x32x48xf32, #tpu.memory_space<vmem>>, vector<1x32x48xf32>
    %742 = vector.shape_cast %741 : vector<1x32x48xf32> to vector<32x48xf32>
    %c5_306 = arith.constant 5 : index
    %c0_307 = arith.constant 0 : index
    %c0_308 = arith.constant 0 : index
    %743 = vector.load %arg23[%c5_306, %c0_307, %c0_308] : memref<6x16x16xf32, #tpu.memory_space<vmem>>, vector<1x16x16xf32>
    %744 = vector.shape_cast %743 : vector<1x16x16xf32> to vector<16x16xf32>
    %c5_309 = arith.constant 5 : index
    %c0_310 = arith.constant 0 : index
    %745 = vector.load %arg24[%c5_309, %c0_310] : memref<6x16xf32, #tpu.memory_space<vmem>>, vector<1x16xf32>
    %746 = tpu.concatenate %740, %702 in 1 : vector<8x16xf32>, vector<8x16xf32> -> vector<8x32xf32>
    %cst_311 = arith.constant dense<0.000000e+00> : vector<8x48xf32>
    %747 = tpu.matmul %746, %742, %cst_311 {dimension_numbers = #tpu.dot_dimension_numbers<[1], [0], [0], [1], [0, 0, 1, 1], [], []>} : vector<8x32xf32>, vector<32x48xf32>, vector<8x48xf32> -> vector<8x48xf32>
    %748 = vector.extract_strided_slice %747 {offsets = [0, 0], sizes = [8, 16], strides = [1, 1]} : vector<8x48xf32> to vector<8x16xf32>
    %749 = arith.negf %748 : vector<8x16xf32>
    %750 = math.exp %749 : vector<8x16xf32>
    %cst_312 = arith.constant 1.000000e+00 : f32
    %751 = vector.broadcast %cst_312 : f32 to vector<8x16xf32>
    %752 = arith.addf %751, %750 : vector<8x16xf32>
    %753 = arith.divf %751, %752 : vector<8x16xf32>
    %754 = vector.extract_strided_slice %747 {offsets = [0, 16], sizes = [8, 16], strides = [1, 1]} : vector<8x48xf32> to vector<8x16xf32>
    %755 = vector.broadcast %745 : vector<1x16xf32> to vector<8x16xf32>
    %756 = arith.subf %754, %755 : vector<8x16xf32>
    %757 = arith.negf %756 : vector<8x16xf32>
    %758 = math.exp %757 : vector<8x16xf32>
    %cst_313 = arith.constant 1.000000e+00 : f32
    %759 = vector.broadcast %cst_313 : f32 to vector<8x16xf32>
    %760 = arith.addf %759, %758 : vector<8x16xf32>
    %761 = arith.divf %759, %760 : vector<8x16xf32>
    %762 = vector.extract_strided_slice %747 {offsets = [0, 32], sizes = [8, 16], strides = [1, 1]} : vector<8x48xf32> to vector<8x16xf32>
    %763 = arith.mulf %753, %702 : vector<8x16xf32>
    %cst_314 = arith.constant dense<0.000000e+00> : vector<8x16xf32>
    %764 = tpu.matmul %763, %744, %cst_314 {dimension_numbers = #tpu.dot_dimension_numbers<[1], [0], [0], [1], [0, 0, 1, 1], [], []>} : vector<8x16xf32>, vector<16x16xf32>, vector<8x16xf32> -> vector<8x16xf32>
    %765 = arith.addf %762, %764 : vector<8x16xf32>
    %766 = math.tanh %765 : vector<8x16xf32>
    %cst_315 = arith.constant 1.000000e+00 : f32
    %767 = vector.broadcast %cst_315 : f32 to vector<8x16xf32>
    %768 = arith.subf %767, %761 : vector<8x16xf32>
    %769 = arith.mulf %768, %702 : vector<8x16xf32>
    %770 = arith.mulf %761, %766 : vector<8x16xf32>
    %771 = arith.addf %769, %770 : vector<8x16xf32>
    %c0_316 = arith.constant 0 : index
    %c0_317 = arith.constant 0 : index
    %772 = vector.load %arg25[%c0_316, %c0_317] : memref<16x32xf32, #tpu.memory_space<vmem>>, vector<16x32xf32>
    %cst_318 = arith.constant dense<0.000000e+00> : vector<8x32xf32>
    %773 = tpu.matmul %771, %772, %cst_318 {dimension_numbers = #tpu.dot_dimension_numbers<[1], [0], [0], [1], [0, 0, 1, 1], [], []>} : vector<8x16xf32>, vector<16x32xf32>, vector<8x32xf32> -> vector<8x32xf32>
    %c0_319 = arith.constant 0 : index
    %c0_320 = arith.constant 0 : index
    %774 = vector.load %arg26[%c0_319, %c0_320] : memref<1x32xf32, #tpu.memory_space<vmem>>, vector<1x32xf32>
    %775 = vector.broadcast %774 : vector<1x32xf32> to vector<8x32xf32>
    %776 = arith.addf %773, %775 : vector<8x32xf32>
    %cst_321 = arith.constant 0.000000e+00 : f32
    %777 = vector.broadcast %cst_321 : f32 to vector<8x32xf32>
    %778 = arith.maximumf %776, %777 : vector<8x32xf32>
    %c0_322 = arith.constant 0 : index
    %c0_323 = arith.constant 0 : index
    %779 = vector.load %arg27[%c0_322, %c0_323] : memref<32x5xf32, #tpu.memory_space<vmem>>, vector<32x5xf32>
    %cst_324 = arith.constant dense<0.000000e+00> : vector<8x5xf32>
    %780 = tpu.matmul %778, %779, %cst_324 {dimension_numbers = #tpu.dot_dimension_numbers<[1], [0], [0], [1], [0, 0, 1, 1], [], []>} : vector<8x32xf32>, vector<32x5xf32>, vector<8x5xf32> -> vector<8x5xf32>
    %c0_325 = arith.constant 0 : index
    %c0_326 = arith.constant 0 : index
    %781 = vector.load %arg28[%c0_325, %c0_326] : memref<1x5xf32, #tpu.memory_space<vmem>>, vector<1x5xf32>
    %782 = vector.broadcast %781 : vector<1x5xf32> to vector<8x5xf32>
    %783 = arith.addf %780, %782 : vector<8x5xf32>
    %784 = vector.extract_strided_slice %783 {offsets = [0, 0], sizes = [8, 4], strides = [1, 1]} : vector<8x5xf32> to vector<8x4xf32>
    %785 = vector.extract_strided_slice %783 {offsets = [0, 4], sizes = [8, 1], strides = [1, 1]} : vector<8x5xf32> to vector<8x1xf32>
    %cst_327 = arith.constant dense<0.000000e+00> : vector<8xf32>
    %786 = vector.multi_reduction <add>, %784, %cst_327 [1] : vector<8x4xf32> to vector<8xf32>
    %787 = vector.shape_cast %786 : vector<8xf32> to vector<8x1xf32>
    %cst_328 = arith.constant 4.000000e+00 : f32
    %788 = vector.broadcast %cst_328 : f32 to vector<8x1xf32>
    %789 = arith.divf %787, %788 : vector<8x1xf32>
    %790 = vector.broadcast %789 : vector<8x1xf32> to vector<8x4xf32>
    %791 = arith.subf %784, %790 : vector<8x4xf32>
    %792 = vector.broadcast %785 : vector<8x1xf32> to vector<8x4xf32>
    %793 = arith.addf %791, %792 : vector<8x4xf32>
    %cst_329 = arith.constant 0.000000e+00 : f32
    %794 = vector.broadcast %cst_329 : f32 to vector<8x108xf32>
    %795 = tpu.concatenate %771, %793, %794 in 1 : vector<8x16xf32>, vector<8x4xf32>, vector<8x108xf32> -> vector<8x128xf32>
    %c0_330 = arith.constant 0 : index
    %c0_331 = arith.constant 0 : index
    %796 = vector.load %arg29[%c0_330, %c0_331] : memref<8x128xf32, #tpu.memory_space<vmem>>, vector<8x128xf32>
    tpu.vector_store %arg29[%c0_330, %c0_331], %795 {strides = array<i32>} : memref<8x128xf32, #tpu.memory_space<vmem>>, vector<8x128xf32>,
    return
  }
  func.func @transform_0(%arg0: i32) -> (i32, i32) {
    %c0_i32 = arith.constant 0 : i32
    %c0_i32_0 = arith.constant 0 : i32
    return %arg0, %c0_i32 : i32, i32
  }
  func.func @transform_1(%arg0: i32) -> (i32, i32) {
    %c0_i32 = arith.constant 0 : i32
    %c0_i32_0 = arith.constant 0 : i32
    %c0_i32_1 = arith.constant 0 : i32
    return %c0_i32, %c0_i32_0 : i32, i32
  }
  func.func @transform_2(%arg0: i32) -> (i32, i32) {
    %c0_i32 = arith.constant 0 : i32
    %c0_i32_0 = arith.constant 0 : i32
    %c0_i32_1 = arith.constant 0 : i32
    return %c0_i32, %c0_i32_0 : i32, i32
  }
  func.func @transform_3(%arg0: i32) -> (i32, i32) {
    %c0_i32 = arith.constant 0 : i32
    %c0_i32_0 = arith.constant 0 : i32
    %c0_i32_1 = arith.constant 0 : i32
    return %c0_i32, %c0_i32_0 : i32, i32
  }
  func.func @transform_4(%arg0: i32) -> (i32, i32) {
    %c0_i32 = arith.constant 0 : i32
    %c0_i32_0 = arith.constant 0 : i32
    %c0_i32_1 = arith.constant 0 : i32
    return %c0_i32, %c0_i32_0 : i32, i32
  }
  func.func @transform_5(%arg0: i32) -> (i32, i32) {
    %c0_i32 = arith.constant 0 : i32
    %c0_i32_0 = arith.constant 0 : i32
    %c0_i32_1 = arith.constant 0 : i32
    return %c0_i32, %c0_i32_0 : i32, i32
  }
  func.func @transform_6(%arg0: i32) -> (i32, i32) {
    %c0_i32 = arith.constant 0 : i32
    %c0_i32_0 = arith.constant 0 : i32
    %c0_i32_1 = arith.constant 0 : i32
    return %c0_i32, %c0_i32_0 : i32, i32
  }
  func.func @transform_7(%arg0: i32) -> (i32, i32) {
    %c0_i32 = arith.constant 0 : i32
    %c0_i32_0 = arith.constant 0 : i32
    %c0_i32_1 = arith.constant 0 : i32
    return %c0_i32, %c0_i32_0 : i32, i32
  }
  func.func @transform_8(%arg0: i32) -> (i32, i32) {
    %c0_i32 = arith.constant 0 : i32
    %c0_i32_0 = arith.constant 0 : i32
    %c0_i32_1 = arith.constant 0 : i32
    return %c0_i32, %c0_i32_0 : i32, i32
  }
  func.func @transform_9(%arg0: i32) -> (i32, i32, i32) {
    %c0_i32 = arith.constant 0 : i32
    %c0_i32_0 = arith.constant 0 : i32
    %c0_i32_1 = arith.constant 0 : i32
    %c0_i32_2 = arith.constant 0 : i32
    return %c0_i32, %c0_i32_0, %c0_i32_1 : i32, i32, i32
  }
  func.func @transform_10(%arg0: i32) -> (i32, i32) {
    %c0_i32 = arith.constant 0 : i32
    %c0_i32_0 = arith.constant 0 : i32
    %c0_i32_1 = arith.constant 0 : i32
    return %c0_i32, %c0_i32_0 : i32, i32
  }
  func.func @transform_11(%arg0: i32) -> (i32, i32) {
    %c0_i32 = arith.constant 0 : i32
    %c0_i32_0 = arith.constant 0 : i32
    %c0_i32_1 = arith.constant 0 : i32
    return %c0_i32, %c0_i32_0 : i32, i32
  }
  func.func @transform_12(%arg0: i32) -> (i32, i32, i32) {
    %c0_i32 = arith.constant 0 : i32
    %c0_i32_0 = arith.constant 0 : i32
    %c0_i32_1 = arith.constant 0 : i32
    %c0_i32_2 = arith.constant 0 : i32
    return %c0_i32, %c0_i32_0, %c0_i32_1 : i32, i32, i32
  }
  func.func @transform_13(%arg0: i32) -> (i32, i32) {
    %c0_i32 = arith.constant 0 : i32
    %c0_i32_0 = arith.constant 0 : i32
    %c0_i32_1 = arith.constant 0 : i32
    return %c0_i32, %c0_i32_0 : i32, i32
  }
  func.func @transform_14(%arg0: i32) -> (i32, i32, i32, i32) {
    %c0_i32 = arith.constant 0 : i32
    %c0_i32_0 = arith.constant 0 : i32
    %c0_i32_1 = arith.constant 0 : i32
    %c0_i32_2 = arith.constant 0 : i32
    %c0_i32_3 = arith.constant 0 : i32
    return %c0_i32, %c0_i32_0, %c0_i32_1, %c0_i32_2 : i32, i32, i32, i32
  }
  func.func @transform_15(%arg0: i32) -> (i32, i32, i32) {
    %c0_i32 = arith.constant 0 : i32
    %c0_i32_0 = arith.constant 0 : i32
    %c0_i32_1 = arith.constant 0 : i32
    %c0_i32_2 = arith.constant 0 : i32
    return %c0_i32, %c0_i32_0, %c0_i32_1 : i32, i32, i32
  }
  func.func @transform_16(%arg0: i32) -> (i32, i32) {
    %c0_i32 = arith.constant 0 : i32
    %c0_i32_0 = arith.constant 0 : i32
    %c0_i32_1 = arith.constant 0 : i32
    return %c0_i32, %c0_i32_0 : i32, i32
  }
  func.func @transform_17(%arg0: i32) -> (i32, i32, i32) {
    %c0_i32 = arith.constant 0 : i32
    %c0_i32_0 = arith.constant 0 : i32
    %c0_i32_1 = arith.constant 0 : i32
    %c0_i32_2 = arith.constant 0 : i32
    return %c0_i32, %c0_i32_0, %c0_i32_1 : i32, i32, i32
  }
  func.func @transform_18(%arg0: i32) -> (i32, i32) {
    %c0_i32 = arith.constant 0 : i32
    %c0_i32_0 = arith.constant 0 : i32
    %c0_i32_1 = arith.constant 0 : i32
    return %c0_i32, %c0_i32_0 : i32, i32
  }
  func.func @transform_19(%arg0: i32) -> (i32, i32, i32) {
    %c0_i32 = arith.constant 0 : i32
    %c0_i32_0 = arith.constant 0 : i32
    %c0_i32_1 = arith.constant 0 : i32
    %c0_i32_2 = arith.constant 0 : i32
    return %c0_i32, %c0_i32_0, %c0_i32_1 : i32, i32, i32
  }
  func.func @transform_20(%arg0: i32) -> (i32, i32) {
    %c0_i32 = arith.constant 0 : i32
    %c0_i32_0 = arith.constant 0 : i32
    %c0_i32_1 = arith.constant 0 : i32
    return %c0_i32, %c0_i32_0 : i32, i32
  }
  func.func @transform_21(%arg0: i32) -> (i32, i32, i32) {
    %c0_i32 = arith.constant 0 : i32
    %c0_i32_0 = arith.constant 0 : i32
    %c0_i32_1 = arith.constant 0 : i32
    %c0_i32_2 = arith.constant 0 : i32
    return %c0_i32, %c0_i32_0, %c0_i32_1 : i32, i32, i32
  }
  func.func @transform_22(%arg0: i32) -> (i32, i32, i32) {
    %c0_i32 = arith.constant 0 : i32
    %c0_i32_0 = arith.constant 0 : i32
    %c0_i32_1 = arith.constant 0 : i32
    %c0_i32_2 = arith.constant 0 : i32
    return %c0_i32, %c0_i32_0, %c0_i32_1 : i32, i32, i32
  }
  func.func @transform_23(%arg0: i32) -> (i32, i32) {
    %c0_i32 = arith.constant 0 : i32
    %c0_i32_0 = arith.constant 0 : i32
    %c0_i32_1 = arith.constant 0 : i32
    return %c0_i32, %c0_i32_0 : i32, i32
  }
  func.func @transform_24(%arg0: i32) -> (i32, i32) {
    %c0_i32 = arith.constant 0 : i32
    %c0_i32_0 = arith.constant 0 : i32
    %c0_i32_1 = arith.constant 0 : i32
    return %c0_i32, %c0_i32_0 : i32, i32
  }
  func.func @transform_25(%arg0: i32) -> (i32, i32) {
    %c0_i32 = arith.constant 0 : i32
    %c0_i32_0 = arith.constant 0 : i32
    %c0_i32_1 = arith.constant 0 : i32
    return %c0_i32, %c0_i32_0 : i32, i32
  }
  func.func @transform_26(%arg0: i32) -> (i32, i32) {
    %c0_i32 = arith.constant 0 : i32
    %c0_i32_0 = arith.constant 0 : i32
    %c0_i32_1 = arith.constant 0 : i32
    return %c0_i32, %c0_i32_0 : i32, i32
  }
  func.func @transform_27(%arg0: i32) -> (i32, i32) {
    %c0_i32 = arith.constant 0 : i32
    %c0_i32_0 = arith.constant 0 : i32
    %c0_i32_1 = arith.constant 0 : i32
    return %c0_i32, %c0_i32_0 : i32, i32
  }
  func.func @transform_28(%arg0: i32) -> (i32, i32) {
    %c0_i32 = arith.constant 0 : i32
    %c0_i32_0 = arith.constant 0 : i32
    return %arg0, %c0_i32 : i32, i32
  }
}

</mosaic_0001>

<bundles_post_ra>
// kernel: gtrxl_dqn_forward.1
= control target key start
LH: loop header
LB: loop body
LE: loop exit
PB: predicated region body
PF: predicated region fallthrough
CT: control target
= control target key end

     0   :  { %s9958_s0 = inlined_call_operand.vmem [shape: f32[32,32], index: 0, kind: input, shape index: {}]   ;;  %s9959_s1 = inlined_call_operand.vmem [shape: f32[32,16], index: 1, kind: input, shape index: {}]   ;;  %s9960_s2 = inlined_call_operand.vmem [shape: f32[1,16], index: 2, kind: input, shape index: {}]   ;;  %s9961_s3 = inlined_call_operand.vmem [shape: f32[1,16], index: 3, kind: input, shape index: {}]   ;;  %s9962_s4 = inlined_call_operand.vmem [shape: f32[1,16], index: 4, kind: input, shape index: {}]   ;;  %s9963_s5 = inlined_call_operand.vmem [shape: f32[3,16], index: 5, kind: input, shape index: {}]   ;;  %s9964_s6 = inlined_call_operand.vmem [shape: f32[3,16], index: 6, kind: input, shape index: {}]   ;;  %s9965_s7 = inlined_call_operand.vmem [shape: f32[3,16], index: 7, kind: input, shape index: {}]   ;;  %s9966_s8 = inlined_call_operand.vmem [shape: f32[3,16], index: 8, kind: input, shape index: {}]   ;;  %s9967_s9 = inlined_call_operand.vmem [shape: f32[3,16,32], index: 9, kind: input, shape index: {}]   ;;  %s9968_s10 = inlined_call_operand.vmem [shape: f32[3,32], index: 10, kind: input, shape index: {}]   ;;  %s9969_s11 = inlined_call_operand.vmem [shape: f32[3,32], index: 11, kind: input, shape index: {}]   ;;  %s9970_s12 = inlined_call_operand.vmem [shape: f32[3,16,16], index: 12, kind: input, shape index: {}]   ;;  %s9971_s13 = inlined_call_operand.vmem [shape: f32[3,16], index: 13, kind: input, shape index: {}]   ;;  %s9972_s14 = inlined_call_operand.vmem [shape: f32[3,8,24,16], index: 14, kind: input, shape index: {}]   ;;  %s9973_s15 = inlined_call_operand.vmem [shape: f32[3,16,16], index: 15, kind: input, shape index: {}]   ;;  %s9974_s16 = inlined_call_operand.vmem [shape: f32[3,16], index: 16, kind: input, shape index: {}]   ;;  %s9975_s17 = inlined_call_operand.vmem [shape: f32[3,16,16], index: 17, kind: input, shape index: {}]   ;;  %s9976_s18 = inlined_call_operand.vmem [shape: f32[3,16], index: 18, kind: input, shape index: {}]   ;;  %s9977_s19 = inlined_call_operand.vmem [shape: f32[3,16,16], index: 19, kind: input, shape index: {}]   ;;  %s9978_s20 = inlined_call_operand.vmem [shape: f32[3,16], index: 20, kind: input, shape index: {}]   ;;  %s9979_s21 = inlined_call_operand.vmem [shape: f32[6,32,48], index: 21, kind: input, shape index: {}]   ;;  %s9980_s22 = inlined_call_operand.vmem [shape: f32[6,16,16], index: 22, kind: input, shape index: {}]   ;;  %s9981_s23 = inlined_call_operand.vmem [shape: f32[6,16], index: 23, kind: input, shape index: {}]   ;;  %s9982_s24 = inlined_call_operand.vmem [shape: f32[16,32], index: 24, kind: input, shape index: {}]   ;;  %s9983_s25 = inlined_call_operand.vmem [shape: f32[1,32], index: 25, kind: input, shape index: {}]   ;;  %s9984_s26 = inlined_call_operand.vmem [shape: f32[32,5], index: 26, kind: input, shape index: {}]   ;;  %s9985_s27 = inlined_call_operand.vmem [shape: f32[1,5], index: 27, kind: input, shape index: {}]   ;;  %s9986_s28 = inlined_call_operand.vmem [shape: f32[32,128], index: 28, kind: output, shape index: {}]  }
   0x1   :  { %10019 = sst [smem:[#allocation4_spill]] %s9958_s0 }
   0x2   :  { %10020 = sst [smem:[#allocation5_spill]] %s9959_s1 }
   0x3   :  { %10021 = sst [smem:[#allocation6_spill]] %s9960_s2 }
   0x4   :  { %10022 = sst [smem:[#allocation7_spill]] %s9961_s3 }
   0x5   :  { %10023 = sst [smem:[#allocation8_spill]] %s9962_s4 }
   0x6   :  { %10024 = sst [smem:[#allocation9_spill]] %s9963_s5 }
   0x7   :  { %10025 = sst [smem:[#allocation10_spill]] %s9964_s6 }
   0x8   :  { %10026 = sst [smem:[#allocation11_spill]] %s9965_s7 }
   0x9   :  { %10027 = sst [smem:[#allocation12_spill]] %s9966_s8  ;;  %s8044_s8 = smov 0  }
   0xa   :  { %10028 = sst [smem:[#allocation13_spill]] %s9967_s9 }
   0xb   :  { %10029 = sst [smem:[#allocation14_spill]] %s9968_s10 }
   0xc   :  { %10030 = sst [smem:[#allocation15_spill]] %s9969_s11 }
   0xd   :  { %10031 = sst [smem:[#allocation16_spill]] %s9970_s12 }
   0xe   :  { %10032 = sst [smem:[#allocation17_spill]] %s9973_s15 }
   0xf   :  { %10033 = sst [smem:[#allocation18_spill]] %s9982_s24 }
  0x10   :  { %10034 = sst [smem:[#allocation19_spill]] %s9983_s25 }
  0x11   :  { %10035 = sst [smem:[#allocation20_spill]] %s9984_s26 }
  0x12   :  { %10036 = sst [smem:[#allocation21_spill]] %s9985_s27 }
  0x13   :  { %10037 = sst [smem:[#allocation22_spill]] %s9986_s28 }
  0x14 LB: > { %10038 = sst [smem:[#allocation2_spill]] %s7886_s8  ;;  %s6993_s5 = sadd.s32 4294967295, %s7886_s8   ;;  %s7886_s8 = sphi %s8044_s8, %s38_s8  }
  0x15   : > { %p6997_p0 = scmp.ge.s32.totalorder %s7886_s8, 1  ;;  %p761_p1 = scmp.lt.s32.totalorder %s7886_s8, 5 }
  0x17   : > { %p762_p2 = pnand %p6997_p0, %p761_p1 }
  0x19   : > { %765 = sbr.rel (%p762_p2) target bundleno = 14320 (0x37f0), region = 132 }
  0x20   : > { %s10039_s3 = sld [smem:[#allocation5_spill]]  ;;  %v7888_v3 = vmov 0.0|0.0   ;;  %vm7889_vm0 = vmmov 0   ;;  %v7890_v6 = vmov 0.0   ;;  %p833_p3 = scmp.lt.s32.totalorder %s6993_s5, 3  ;;  %vm853_vm1 = vcmask 261120  }
  0x21   : > { %7633 = vmatprep.subr.bf16.mxu0 %v7888_v3  ;;  %7339 = vmatprep.mubr.msk.f32.mxu0 %vm7889_vm0, %v7890_v6  ;;  %s10041_s4 = sld [smem:[#allocation4_spill]]  ;;  %s10042_s10 = sld [smem:[#allocation6_spill]]  ;;  %vm938_vm2 = vcmask 130048   ;;  %v930_v36 = vlaneseq  ;;  %v7891_v37 = vmov 1966171168   ;;  %vm1278_vm3 = vcmask 64512  }
  0x22   : > { %7639 = vmatprep.subr.bf16.mxu1 %v7888_v3  ;;  %7346 = vmatprep.mubr.msk.f32.mxu1 %vm7889_vm0, %v7890_v6  ;;  %s10074_s5 = smov (!%p833_p3, %s6993_s5), 3  ;;  %s10043_s29 = sld [smem:[#allocation13_spill]]  ;;  %v1167_v38 = vunpack.c.l.s4 %v7891_v37  ;;  %v7006_v42 = vld [vmem:[%s9971_s13] ss:$0 sm:$0xff]  ;;  %v1141_v60 = vld [vmem:[%s9972_s14 + $0x10] sm:$0xff]  ;;  %vm1384_vm4 = vcmask 130112  }
  0x23   : > { %10040 = sst [smem:[#allocation3_spill]] %s10074_s5  ;;  %s9998_s7 = sshll.u32 %s10074_s5, 3  ;;  %v8132_v43 = vshrl.u32 %v930_v36, 7  ;;  %v1139_v63 = vld [vmem:[%s9972_s14] sm:$0xff]  ;;  %vm1449_vm5 = vcmask 1041409   ;;  %vm1451_vm6 = vcmask 1042434  }
  0x24   : > { %s10047_s30 = sld [smem:[#allocation14_spill]]  ;;  %s10006_s11 = smov 120   ;;  %v1168_v44 = vunpack.c.0.s8 %v1167_v38  ;;  %vm1453_vm7 = vcmask 1043459   ;;  %vm1455_vm8 = vcmask 1044484   ;;  %vm1457_vm9 = vcmask 1045509  }
  0x25   : > { %s10048_s1 = sld [smem:[#allocation7_spill]]  ;;  %s10049_s8 = sld [smem:[#allocation8_spill]]  ;;  %v8153_v57 = vsub.s32 0, %v8132_v43  ;;  %vm1459_vm10 = vcmask 1046534   ;;  %vm1461_vm12 = vcmask 1047559   ;;  %vm6918_vm13 = vcmask 31744  }
  0x26   : > { %v842_v0 = vld [vmem:[%s10039_s3] sm:$0xff]  ;;  %v843_v1 = vld [vmem:[%s10039_s3 + $0x8] sm:$0xff]  ;;  %v844_v2 = vld [vmem:[%s10039_s3 + $0x10] sm:$0xff]  ;;  %v8142_v52 = vsub.s32 %v1168_v44, %v8132_v43  ;;  %s10051_s2 = sld [smem:[#allocation15_spill]]  ;;  %s10004_s0 = smov 104   ;;  %vm6937_vm14 = vcmask 162816  }
  0x27   : > { %v7634_v4 = vpack.c.bf16 %v843_v1, %v842_v0  ;;  %v845_v5 = vld [vmem:[%s10039_s3 + $0x18] sm:$0xff]  ;;  %s836_s9 = scalar_lea.vmem %s10041_s4, %s9998_s7  ;;  %v7000_v9 = vld [vmem:[%s10042_s10] ss:$0 sm:$0xff]  ;;  %s10045_s10 = sld [smem:[#allocation16_spill]] }
  0x28   : > { %v7637_v7 = vpack.c.bf16 %v845_v5, %v844_v2  ;;  %v841_v8 = vld [vmem:[%s836_s9] sm:$0xff]  ;;  %v964_v21 = vld [vmem:[%s10043_s29 + $0x8] sm:$0xff]  ;;  %s10044_s9 = sld [smem:[#allocation9_spill]]  ;;  %s10046_s7 = sld [smem:[#allocation10_spill]] }
  0x29   : > { %7635 = vmatpush3.bf16.msra.mxu0 %v7634_v4  ;;  %v963_v20 = vld [vmem:[%s10043_s29] sm:$0xff]  ;;  %v1140_v4 = vld [vmem:[%s9972_s14 + $0x8] sm:$0xff]  ;;  %s10052_s15 = sld [smem:[#allocation17_spill]]  ;;  %s10002_s3 = smov 8  }
  0x2a   : > { %7636 = vmatprep.subr.bf16.mxu0 %v7888_v3  ;;  %v7640_v22 = vpack.c.bf16 %v964_v21, %v963_v20  ;;  %v7004_v35 = vld [vmem:[%s10047_s30] ss:$0 sm:$0xff]  ;;  %v1142_v20 = vld [vmem:[%s9972_s14 + $0x18] sm:$0xff]  ;;  %v1145_v21 = vld [vmem:[%s9972_s14 + $0x30] sm:$0xff]  ;;  %s10012_s12 = smov 16   ;;  %s10055_s6 = sld [smem:[#allocation12_spill]] }
  0x2b   : > { %v7008_v45 = vld [vmem:[%s10048_s1] ss:$0 sm:$0xff]  ;;  %s10050_s28 = smov %s10049_s8  ;;  %s10056_s25 = smov 16  }
  0x2c   : > { %7641 = vmatpush3.bf16.msra.mxu1 %v7640_v22  ;;  %v7009_v46 = vld [vmem:[%s10049_s8] ss:$0 sm:$0xff]  ;;  %s10008_s8 = smov 112   ;;  %s10057_s24 = smov 32  }
  0x2d   : > { %7638 = vmatpush3.bf16.msra.mxu0 %v7637_v7  ;;  %7642 = vmatprep.subr.bf16.mxu1 %v7888_v3  ;;  %v1043_v29 = vld [vmem:[%s10045_s10] sm:$0xff]  ;;  %v1044_v30 = vld [vmem:[%s10045_s10 + $0x8] sm:$0xff]  ;;  %s10059_s26 = smov 104   ;;  %s10060_s27 = smov 8  }
  0x2e   : > { %7366 = vmatprep.subr.mxu0 %v7890_v6  ;;  %v7002_v27 = vld [vmem:[%s10044_s9] ss:$0 sm:$0xff]  ;;  %v7643_v33 = vpack.c.bf16 %v1044_v30, %v1043_v29 }
  0x2f   : > { %v7003_v31 = vld [vmem:[%s10046_s7] ss:$0 sm:$0xff] }
  0x30   : > { %7340 = vmatmul.mubr.msk.f32.vlgmr.msra.gmra.mrb[0].mxu0 %vm853_vm1, %v841_v8  ;;  %v8147_v55 = vld [vmem:[%s10051_s2] ss:$0 sm:$0xff] }
  0x31   : > { %7368 = vmatprep.mubr.msk.f32.mxu0 %vm7889_vm0, %v7890_v6  ;;  %v1147_v29 = vld [vmem:[%s9972_s14 + $0x40] sm:$0xff] }
 0x103   : > { %v923_v10 = vpop.f32.mrb[0].mxu0 }
 0x104   : > { %v924_v11 = vadd.f32 %v7000_v9, %v923_v10  ;;  %v7341_v12 = vpop.f32.mrb[1].mxu0 }
 0x106   : > { %v8086_v13 = vmax.f32 %v924_v11, 0.0 }
 0x108   : > { %v939_v14 = vsel %vm938_vm2, %v8086_v13, 0.0 }
 0x109   : > { %940 = vadd.xlane.f32.xlu0 %v939_v14 }
 0x196   : > { %v941_v15 = vpop.xlane.xlu0 %940 }
 0x197   : > { %v943_v16 = vmul.f32 0.0625, %v941_v15 }
 0x199   : > { %v944_v17 = vsub.f32 %v8086_v13, %v943_v16  ;;  %v1144_v16 = vld [vmem:[%s9972_s14 + $0x28] sm:$0xff] }
 0x19b   : > { %v945_v18 = vmul.f32 %v944_v17, %v944_v17 }
 0x19d   : > { %v946_v19 = vsel %vm938_vm2, %v945_v18, 0.0 }
 0x19e   : > { %947 = vadd.xlane.f32.xlu0 %v946_v19 }
 0x22b   : > { %v948_v23 = vpop.xlane.xlu0 %947 }
 0x22c   : > { %v949_v24 = vmul.f32 0.0625, %v948_v23 }
 0x22e   : > { %v950_v25 = vadd.f32 1e-05, %v949_v24 }
 0x230   : > { %7768 = vrsqrt.f32 %v950_v25  ;;  %v1143_v25 = vld [vmem:[%s9972_s14 + $0x20] sm:$0xff] }
 0x23a   : > { %v7769_v26 = vpop.eup %7768 }
 0x23b   : > { %v952_v28 = vmul.f32 %v7769_v26, %v944_v17  ;;  %v1151_v26 = vld [vmem:[%s9972_s14 + $0x60] sm:$0xff] }
 0x23d   : > { %v957_v32 = vmul.f32 %v7002_v27, %v952_v28 }
 0x23f   : > { %v962_v34 = vadd.f32 %v7003_v31, %v957_v32  ;;  %v1146_v31 = vld [vmem:[%s9972_s14 + $0x38] sm:$0xff] }
 0x241   : > { %7347 = vmatmul.mubr.msk.f32.vlgmr.msra.gmra.mrb[0].mxu1 %vm938_vm2, %v962_v34 }
 0x242   : > { %7644 = vmatpush3.bf16.msra.mxu1 %v7643_v33  ;;  %7353 = vmatprep.mubr.msk.f32.mxu1 %vm7889_vm0, %v7890_v6  ;;  %v1153_v33 = vld [vmem:[%s9972_s14 + $0x70] sm:$0xff] }
 0x243   : > { %7356 = vmatprep.subr.mxu1 %v7890_v6 }
 0x245   : > { %7354 = vmatmul.mubr.msk.f32.vlgmr.msra.gmra.mrb[2].mxu1 %vm938_vm2, %v8086_v13 }
 0x246   : > { %7358 = vmatprep.mubr.msk.f32.mxu1 %vm7889_vm0, %v7890_v6 }
 0x314   : > { %v1039_v39 = vpop.f32.mrb[0].mxu1 }
 0x315   : > { %v8122_v40 = vadd.f32 %v7004_v35, %v1039_v39  ;;  %v7348_v41 = vpop.f32.mrb[1].mxu1  ;;  %v1152_v35 = vld [vmem:[%s9972_s14 + $0x68] sm:$0xff] }
 0x317   : > { %1969 = vrot.lane.b32.xlu1 %v8122_v40, %s10006_s11  ;;  %7357 = vmatpush3.xpose.msk.msra.mxu1 %vm1278_vm3, %v8122_v40 }
 0x318   : > { %v1119_v47 = vpop.f32.mrb[2].mxu1  ;;  %7361 = vmatprep.subr.mxu1 %v7890_v6 }
 0x319   : > { %v1120_v48 = vadd.f32 %v7006_v42, %v1119_v47  ;;  %v7355_v49 = vpop.f32.mrb[3].mxu1 }
 0x31b   : > { %v1129_v50 = vadd.f32 %v7008_v45, %v1120_v48  ;;  %v1137_v51 = vadd.f32 %v7009_v46, %v1120_v48 }
 0x31d   : > { %v1130_v53 = vmul.f32 0.35355338, %v1129_v50  ;;  %v1138_v54 = vmul.f32 0.35355338, %v1137_v51  ;;  %v1150_v50 = vld [vmem:[%s9972_s14 + $0x58] sm:$0xff] }
 0x31f   : > { %v1172_v56 = vrot.slane %v1138_v54, %v8142_v52  ;;  %1967 = vrot.lane.b32.xlu1 %v1130_v53, %s10006_s11  ;;  %7359 = vmatmul.mubr.msk.f32.vlgmr.msra.gmra.mrb[4].mxu1 %vm1278_vm3, %v1130_v53  ;;  %v1355_v59 = vmul.f32 %v8147_v55, %v1130_v53  ;;  %v1165_v11 = vcombine.high %v1138_v54, %v1138_v54 }
 0x320   : > { %7363 = vmatprep.mubr.msk.f32.mxu1 %vm7889_vm0, %v7890_v6 }
 0x321   : > { %v1188_v58 = vrot.slane %v1172_v56, %v8142_v52  ;;  %v1356_v1 = vsel %vm1278_vm3, %v1355_v59, 0.0  ;;  %v1180_v9 = vcombine.high %v1172_v56, %v1172_v56  ;;  %v1179_v14 = vrot.slane %v1165_v11, %v8142_v52  ;;  %v1149_v56 = vld [vmem:[%s9972_s14 + $0x50] sm:$0xff]  ;;  %v1154_v11 = vld [vmem:[%s9972_s14 + $0x78] sm:$0xff] }
 0x323   : > { %1864 = vrot.lane.b32.xlu1 %v1355_v59, %s10006_s11  ;;  %v1217_v61 = vrot.slane %v1188_v58, %v8153_v57  ;;  %v1202_v10 = vrot.slane %v1180_v9, %v8142_v52  ;;  %v1210_v15 = vcombine.high %v1188_v58, %v1188_v58  ;;  %v8184_v18 = vrot.slane %v1179_v14, %v8142_v52  ;;  %v1148_v9 = vld [vmem:[%s9972_s14 + $0x48] sm:$0xff] }
 0x324   : > { %v1181_v48 = vcombine.high %v1179_v14, %v1179_v14  ;;  %v1159_v14 = vld [vmem:[%s9972_s14 + $0xa0] sm:$0xff] }
 0x325   : > { %v1256_v62 = vmul.f32 %v1217_v61, %v1141_v60  ;;  %v1254_v2 = vmul.f32 %v1217_v61, %v1139_v63  ;;  %v1255_v7 = vmul.f32 %v1217_v61, %v1140_v4  ;;  %v1221_v12 = vrot.slane %v1202_v10, %v8153_v57  ;;  %v1156_v61 = vld [vmem:[%s9972_s14 + $0x88] sm:$0xff] }
 0x326   : > { %v1225_v19 = vrot.slane %v1210_v15, %v8153_v57  ;;  %v1233_v24 = vrot.slane %v8184_v18, %v8153_v57  ;;  %v1212_v46 = vcombine.high %v1202_v10, %v1202_v10  ;;  %v1209_v54 = vrot.slane %v1181_v48, %v8142_v52 }
 0x327   : > { %1723 = vrot.lane.b32.xlu0 %v1256_v62, %s10006_s11  ;;  %v1285_v0 = vsel %vm1278_vm3, %v1256_v62, 0.0  ;;  %v1279_v5 = vsel %vm1278_vm3, %v1254_v2, 0.0  ;;  %v1282_v8 = vsel %vm1278_vm3, %v1255_v7, 0.0  ;;  %v1259_v17 = vmul.f32 %v1221_v12, %v1144_v16  ;;  %v1158_v16 = vld [vmem:[%s9972_s14 + $0x98] sm:$0xff] }
 0x328   : > { %v1257_v22 = vmul.f32 %v1221_v12, %v1142_v20  ;;  %v1260_v23 = vmul.f32 %v1225_v19, %v1145_v21  ;;  %v1258_v27 = vmul.f32 %v1221_v12, %v1143_v25  ;;  %v1266_v28 = vmul.f32 %v1233_v24, %v1151_v26 }
 0x329   : > { %v1262_v30 = vmul.f32 %v1225_v19, %v1147_v29  ;;  %v1261_v32 = vmul.f32 %v1225_v19, %v1146_v31  ;;  %v1268_v34 = vmul.f32 %v1233_v24, %v1153_v33  ;;  %v1267_v37 = vmul.f32 %v1233_v24, %v1152_v35  ;;  %v1161_v35 = vld [vmem:[%s9972_s14 + $0xb0] sm:$0xff] }
 0x32a   : > { %v1291_v38 = vsel %vm1278_vm3, %v1258_v27, 0.0  ;;  %v1297_v41 = vsel %vm1278_vm3, %v1260_v23, 0.0  ;;  %v1315_v42 = vsel %vm1278_vm3, %v1266_v28, 0.0  ;;  %v1294_v45 = vsel %vm1278_vm3, %v1259_v17, 0.0 }
 0x32b   : > { %v1288_v47 = vsel %vm1278_vm3, %v1257_v22, 0.0  ;;  %v1229_v49 = vrot.slane %v1212_v46, %v8153_v57  ;;  %v1303_v51 = vsel %vm1278_vm3, %v1262_v30, 0.0  ;;  %v1300_v58 = vsel %vm1278_vm3, %v1261_v32, 0.0 }
 0x32c   : > { %v1237_v60 = vrot.slane %v1209_v54, %v8153_v57  ;;  %v1321_v62 = vsel %vm1278_vm3, %v1268_v34, 0.0  ;;  %v1213_v26 = vcombine.high %v1209_v54, %v1209_v54 }
 0x32d   : > { %v1265_v53 = vmul.f32 %v1229_v49, %v1150_v50  ;;  %v1264_v59 = vmul.f32 %v1229_v49, %v1149_v56  ;;  %v1263_v10 = vmul.f32 %v1229_v49, %v1148_v9 }
 0x32e   : > { %v1271_v63 = vmul.f32 %v1237_v60, %v1156_v61  ;;  %v1269_v12 = vmul.f32 %v1237_v60, %v1154_v11  ;;  %v1245_v31 = vrot.slane %v1213_v26, %v8153_v57 }
 0x32f   : > { %v1309_v19 = vsel %vm1278_vm3, %v1264_v59, 0.0  ;;  %v1306_v25 = vsel %vm1278_vm3, %v1263_v10, 0.0 }
 0x330   : > { %v1330_v20 = vsel %vm1278_vm3, %v1271_v63, 0.0  ;;  %v1324_v29 = vsel %vm1278_vm3, %v1269_v12, 0.0 }
 0x346   : > { %1286 = vadd.xlane.f32.xlu0 %v1285_v0  ;;  %v1211_v0 = vcombine.high %v8184_v18, %v8184_v18  ;;  %v1312_v18 = vsel %vm1278_vm3, %v1265_v53, 0.0 }
 0x347   : > { %1357 = vadd.xlane.f32.xlu1 %v1356_v1  ;;  %v1155_v1 = vld [vmem:[%s9972_s14 + $0x80] sm:$0xff] }
 0x348   : > { %v1270_v4 = vmul.f32 %v1237_v60, %v1155_v1 }
 0x34a   : > { %1280 = vadd.xlane.f32.xlu0 %v1279_v5  ;;  %v1241_v5 = vrot.slane %v1211_v0, %v8153_v57  ;;  %v1327_v21 = vsel %vm1278_vm3, %v1270_v4, 0.0 }
 0x34c   : > { %v1274_v15 = vmul.f32 %v1241_v5, %v1159_v14 }
 0x34e   : > { %1283 = vadd.xlane.f32.xlu0 %v1282_v8  ;;  %v1339_v33 = vsel %vm1278_vm3, %v1274_v15, 0.0 }
 0x358   : > { %1719 = vrot.lane.b32.xlu1 %v1254_v2, %s10006_s11  ;;  %v1318_v2 = vsel %vm1278_vm3, %v1267_v37, 0.0 }
 0x35c   : > { %1721 = vrot.lane.b32.xlu1 %v1255_v7, %s10006_s11  ;;  %v1157_v7 = vld [vmem:[%s9972_s14 + $0x90] sm:$0xff] }
 0x35d   : > { %v1272_v8 = vmul.f32 %v1241_v5, %v1157_v7 }
 0x360   : > { %1729 = vrot.lane.b32.xlu1 %v1259_v17, %s10006_s11  ;;  %v1273_v17 = vmul.f32 %v1241_v5, %v1158_v16 }
 0x364   : > { %1725 = vrot.lane.b32.xlu1 %v1257_v22, %s10006_s11  ;;  %1731 = vrot.lane.b32.xlu0 %v1260_v23, %s10006_s11  ;;  %v1336_v22 = vsel %vm1278_vm3, %v1273_v17, 0.0 }
 0x368   : > { %1727 = vrot.lane.b32.xlu1 %v1258_v27, %s10006_s11  ;;  %1743 = vrot.lane.b32.xlu0 %v1266_v28, %s10006_s11 }
 0x36c   : > { %1735 = vrot.lane.b32.xlu1 %v1262_v30, %s10006_s11 }
 0x370   : > { %1733 = vrot.lane.b32.xlu1 %v1261_v32, %s10006_s11  ;;  %v1162_v32 = vld [vmem:[%s9972_s14 + $0xb8] sm:$0xff] }
 0x374   : > { %1747 = vrot.lane.b32.xlu1 %v1268_v34, %s10006_s11  ;;  %v1277_v34 = vmul.f32 %v1245_v31, %v1162_v32 }
 0x376   : > { %v1348_v11 = vsel %vm1278_vm3, %v1277_v34, 0.0 }
 0x378   : > { %1745 = vrot.lane.b32.xlu1 %v1267_v37, %s10006_s11 }
 0x387   : > { %1292 = vadd.xlane.f32.xlu0 %v1291_v38 }
 0x389   : > { %v1970_v39 = vpop.permute.xlu1 %1969 }
 0x38a   : > { %7367 = vmatpush3.xpose.msk.msra.mxu0 %vm1278_vm3, %v1970_v39  ;;  %v1333_v39 = vsel %vm1278_vm3, %v1272_v8, 0.0 }
 0x38b   : > { %7645 = vmatprep.subr.bf16.mxu0 %v7888_v3  ;;  %1298 = vadd.xlane.f32.xlu0 %v1297_v41  ;;  %v1276_v41 = vmul.f32 %v1245_v31, %v1161_v35 }
 0x38f   : > { %1316 = vadd.xlane.f32.xlu0 %v1315_v42 }
 0x391   : > { %v1968_v44 = vpop.permute.xlu1 %1967 }
 0x392   : > { %7369 = vmatmul.mubr.msk.f32.vlgmr.msra.gmra.mrb[2].mxu0 %vm1278_vm3, %v1968_v44 }
 0x393   : > { %7380 = vmatprep.mubr.msk.f32.mxu0 %vm7889_vm0, %v7890_v6 }
 0x395   : > { %v8283_v23 = vpop.permute.xlu1 %1864 }
 0x399   : > { %v1724_v38 = vpop.permute.xlu0 %1723 }
 0x39c   : > { %1295 = vadd.xlane.f32.xlu1 %v1294_v45 }
 0x3a0   : > { %1289 = vadd.xlane.f32.xlu1 %v1288_v47  ;;  %v1160_v47 = vld [vmem:[%s9972_s14 + $0xa8] sm:$0xff] }
 0x3a1   : > { %v1275_v49 = vmul.f32 %v1245_v31, %v1160_v47 }
 0x3a4   : > { %1304 = vadd.xlane.f32.xlu1 %v1303_v51 }
 0x3a5   : > { %1741 = vrot.lane.b32.xlu0 %v1265_v53, %s10006_s11 }
 0x3a8   : > { %1301 = vadd.xlane.f32.xlu1 %v1300_v58 }
 0x3a9   : > { %1739 = vrot.lane.b32.xlu0 %v1264_v59, %s10006_s11  ;;  %v1345_v59 = vsel %vm1278_vm3, %v1276_v41, 0.0 }
 0x3ac   : > { %1322 = vadd.xlane.f32.xlu1 %v1321_v62 }
 0x3ad   : > { %1753 = vrot.lane.b32.xlu0 %v1271_v63, %s10006_s11 }
 0x3b0   : > { %1319 = vadd.xlane.f32.xlu1 %v1318_v2 }
 0x3b1   : > { %1751 = vrot.lane.b32.xlu0 %v1270_v4, %s10006_s11 }
 0x3b5   : > { %1755 = vrot.lane.b32.xlu0 %v1272_v8, %s10006_s11 }
 0x3c1   : > { %1737 = vrot.lane.b32.xlu1 %v1263_v10, %s10006_s11 }
 0x3c5   : > { %1749 = vrot.lane.b32.xlu1 %v1269_v12, %s10006_s11 }
 0x3c9   : > { %1759 = vrot.lane.b32.xlu1 %v1274_v15, %s10006_s11  ;;  %v1342_v15 = vsel %vm1278_vm3, %v1275_v49, 0.0 }
 0x3cd   : > { %1757 = vrot.lane.b32.xlu1 %v1273_v17, %s10006_s11 }
 0x3d3   : > { %v8302_v42 = vpop.xlane.xlu0 %1286 }
 0x3d4   : > { %1313 = vadd.xlane.f32.xlu0 %v1312_v18  ;;  %v8285_v24 = vpop.xlane.xlu1 %1357  ;;  %v1797_v18 = vsel %vm1278_vm3, %v1724_v38, 0.0 }
 0x3d7   : > { %v8304_v45 = vpop.xlane.xlu0 %1280 }
 0x3d8   : > { %1310 = vadd.xlane.f32.xlu0 %v1309_v19  ;;  %v1720_v30 = vpop.permute.xlu1 %1719 }
 0x3d9   : > { %v1791_v61 = vsel %vm1278_vm3, %v1720_v30, 0.0 }
 0x3db   : > { %v8309_v48 = vpop.xlane.xlu0 %1283 }
 0x3dc   : > { %1331 = vadd.xlane.f32.xlu0 %v1330_v20  ;;  %v1722_v37 = vpop.permute.xlu1 %1721 }
 0x3df   : > { %v1732_v51 = vpop.permute.xlu0 %1731 }
 0x3e0   : > { %1328 = vadd.xlane.f32.xlu0 %v1327_v21  ;;  %v1730_v44 = vpop.permute.xlu1 %1729  ;;  %v1809_v9 = vsel %vm1278_vm3, %v1732_v51, 0.0 }
 0x3e1   : > { %v1806_v0 = vsel %vm1278_vm3, %v1730_v44, 0.0 }
 0x3e3   : > { %v1744_v54 = vpop.permute.xlu0 %1743 }
 0x3e4   : > { %1337 = vadd.xlane.f32.xlu0 %v1336_v22  ;;  %v1726_v46 = vpop.permute.xlu1 %1725  ;;  %v1827_v14 = vsel %vm1278_vm3, %v1744_v54, 0.0  ;;  %v1794_v22 = vsel %vm1278_vm3, %v1722_v37, 0.0 }
 0x3e5   : > { %v1800_v2 = vsel %vm1278_vm3, %v1726_v46, 0.0 }
 0x3e8   : > { %v1728_v50 = vpop.permute.xlu1 %1727 }
 0x3ec   : > { %v1736_v53 = vpop.permute.xlu1 %1735 }
 0x3ed   : > { %v1815_v5 = vsel %vm1278_vm3, %v1736_v53, 0.0 }
 0x3f0   : > { %v1734_v56 = vpop.permute.xlu1 %1733 }
 0x3f1   : > { %1307 = vadd.xlane.f32.xlu1 %v1306_v25  ;;  %v1812_v31 = vsel %vm1278_vm3, %v1734_v56, 0.0 }
 0x3f2   : > { %v8288_v27 = vpop.f32.mrb[4].mxu1 }
 0x3f3   : > { %v7360_v28 = vpop.f32.mrb[5].mxu1 }
 0x3f4   : > { %v1748_v60 = vpop.permute.xlu1 %1747  ;;  %v1803_v28 = vsel %vm1278_vm3, %v1728_v50, 0.0 }
 0x3f5   : > { %1325 = vadd.xlane.f32.xlu1 %v1324_v29  ;;  %v1833_v35 = vsel %vm1278_vm3, %v1748_v60, 0.0 }
 0x3f8   : > { %v1746_v63 = vpop.permute.xlu1 %1745 }
 0x3f9   : > { %1340 = vadd.xlane.f32.xlu1 %v1339_v33  ;;  %v1830_v37 = vsel %vm1278_vm3, %v1746_v63, 0.0 }
 0x3fa   : > { %1765 = vrot.lane.b32.xlu0 %v1277_v34, %s10006_s11 }
 0x3fd   : > { %1334 = vadd.xlane.f32.xlu1 %v1333_v39 }
 0x3fe   : > { %1763 = vrot.lane.b32.xlu0 %v1276_v41, %s10006_s11 }
 0x40e   : > { %1761 = vrot.lane.b32.xlu1 %v1275_v49, %s10006_s11  ;;  %s10010_s11 = smov 32  }
 0x414   : > { %v8312_v58 = vpop.xlane.xlu0 %1292 }
 0x418   : > { %v8316_v62 = vpop.xlane.xlu0 %1298 }
 0x41c   : > { %v8319_v1 = vpop.xlane.xlu0 %1316 }
 0x41d   : > { %1346 = vadd.xlane.f32.xlu0 %v1345_v59 }
 0x420   : > { %v1742_v8 = vpop.permute.xlu0 %1741 }
 0x421   : > { %1792 = vadd.xlane.f32.xlu0 %v1791_v61  ;;  %v1824_v17 = vsel %vm1278_vm3, %v1742_v8, 0.0 }
 0x424   : > { %v1740_v12 = vpop.permute.xlu0 %1739 }
 0x425   : > { %1807 = vadd.xlane.f32.xlu0 %v1806_v0  ;;  %v1821_v21 = vsel %vm1278_vm3, %v1740_v12, 0.0 }
 0x428   : > { %v1754_v19 = vpop.permute.xlu0 %1753 }
 0x429   : > { %v8322_v4 = vpop.xlane.xlu1 %1295  ;;  %1801 = vadd.xlane.f32.xlu0 %v1800_v2  ;;  %v1842_v26 = vsel %vm1278_vm3, %v1754_v19, 0.0 }
 0x42c   : > { %v1752_v25 = vpop.permute.xlu0 %1751 }
 0x42d   : > { %v8325_v7 = vpop.xlane.xlu1 %1289  ;;  %1816 = vadd.xlane.f32.xlu0 %v1815_v5  ;;  %v1839_v30 = vsel %vm1278_vm3, %v1752_v25, 0.0 }
 0x430   : > { %v1756_v32 = vpop.permute.xlu0 %1755 }
 0x431   : > { %v8328_v10 = vpop.xlane.xlu1 %1304  ;;  %1810 = vadd.xlane.f32.xlu0 %v1809_v9  ;;  %v1845_v34 = vsel %vm1278_vm3, %v1756_v32, 0.0 }
 0x432   : > { %1349 = vadd.xlane.f32.xlu1 %v1348_v11 }
 0x435   : > { %1828 = vadd.xlane.f32.xlu0 %v1827_v14  ;;  %v8333_v16 = vpop.xlane.xlu1 %1301 }
 0x436   : > { %1343 = vadd.xlane.f32.xlu1 %v1342_v15  ;;  %v1867_v15 = vsel %vm1278_vm3, %v8283_v23, 0.0 }
 0x439   : > { %1825 = vadd.xlane.f32.xlu0 %v1824_v17  ;;  %v8337_v20 = vpop.xlane.xlu1 %1322  ;;  %v933_v17 = vand.u32 127, %v930_v36 }
 0x43a   : > { %1798 = vadd.xlane.f32.xlu1 %v1797_v18 }
 0x43b   : > { %v1379_v18 = vadd.s32 4294967288, %v933_v17  ;;  %vm934_vm11 = vcmp.gt.s32.totalorder %v933_v17, %v8132_v43 }
 0x43d   : > { %1822 = vadd.xlane.f32.xlu0 %v1821_v21  ;;  %v8343_v29 = vpop.xlane.xlu1 %1319  ;;  %v8369_v19 = vsub.s32 %v1379_v18, %v8132_v43  ;;  %v8372_v21 = vsub.s32 %v933_v17, %v8132_v43 }
 0x43e   : > { %1795 = vadd.xlane.f32.xlu1 %v1794_v22 }
 0x43f   : > { %v1383_v22 = vrot.slane %v8309_v48, %v8369_v19  ;;  %v1480_v25 = vrot.slane %v8322_v4, %v8372_v21  ;;  %v1389_v23 = vrot.slane %v8325_v7, %v8372_v21  ;;  %v1484_v36 = vrot.slane %v8328_v10, %v8372_v21 }
 0x440   : > { %v1393_v4 = vrot.slane %v8312_v58, %v8369_v19 }
 0x441   : > { %1843 = vadd.xlane.f32.xlu0 %v1842_v26  ;;  %v1738_v33 = vpop.permute.xlu1 %1737  ;;  %v1476_v26 = vrot.slane %v8302_v42, %v8372_v21  ;;  %v1398_v42 = vrot.slane %v8316_v62, %v8372_v21 }
 0x442   : > { %1804 = vadd.xlane.f32.xlu1 %v1803_v28  ;;  %v1818_v39 = vsel %vm1278_vm3, %v1738_v33, 0.0  ;;  %v1378_v28 = vrot.slane %v8304_v45, %v8372_v21  ;;  %v1394_v45 = vsel %vm1384_vm4, %v1393_v4, %v1389_v23 }
 0x443   : > { %v1505_v10 = vsel %vm1449_vm5, %v1480_v25, %v1476_v26 }
 0x444   : > { %v1385_v7 = vsel %vm1384_vm4, %v1383_v22, %v1378_v28  ;;  %v1506_v32 = vsel %vm1451_vm6, %v1484_v36, %v1505_v10 }
 0x445   : > { %1840 = vadd.xlane.f32.xlu0 %v1839_v30  ;;  %v1750_v38 = vpop.permute.xlu1 %1749  ;;  %v1402_v30 = vrot.slane %v8333_v16, %v8369_v19 }
 0x446   : > { %1813 = vadd.xlane.f32.xlu1 %v1812_v31  ;;  %v1836_v44 = vsel %vm1278_vm3, %v1750_v38, 0.0  ;;  %v1420_v38 = vrot.slane %v8343_v29, %v8369_v19 }
 0x449   : > { %1846 = vadd.xlane.f32.xlu0 %v1845_v34  ;;  %v1760_v41 = vpop.permute.xlu1 %1759  ;;  %v1403_v34 = vsel %vm1384_vm4, %v1402_v30, %v1398_v42 }
 0x44a   : > { %1834 = vadd.xlane.f32.xlu1 %v1833_v35  ;;  %v1851_v46 = vsel %vm1278_vm3, %v1760_v41, 0.0  ;;  %v1492_v35 = vrot.slane %v8337_v20, %v8372_v21 }
 0x44d   : > { %v1758_v47 = vpop.permute.xlu1 %1757 }
 0x44e   : > { %1831 = vadd.xlane.f32.xlu1 %v1830_v37  ;;  %v1848_v49 = vsel %vm1278_vm3, %v1758_v47, 0.0  ;;  %v1450_v37 = vsel %vm1449_vm5, %v1394_v45, %v1385_v7 }
 0x44f   : > { %v1452_v20 = vsel %vm1451_vm6, %v1403_v34, %v1450_v37 }
 0x452   : > { %1819 = vadd.xlane.f32.xlu1 %v1818_v39 }
 0x456   : > { %1837 = vadd.xlane.f32.xlu1 %v1836_v44 }
 0x45a   : > { %1852 = vadd.xlane.f32.xlu1 %v1851_v46 }
 0x45e   : > { %1849 = vadd.xlane.f32.xlu1 %v1848_v49 }
 0x461   : > { %v1314_v50 = vpop.xlane.xlu0 %1313 }
 0x462   : > { %v1488_v48 = vrot.slane %v1314_v50, %v8372_v21 }
 0x464   : > { %v1507_v58 = vsel %vm1453_vm7, %v1488_v48, %v1506_v32 }
 0x465   : > { %v8354_v51 = vpop.f32.mrb[2].mxu0  ;;  %v1311_v53 = vpop.xlane.xlu0 %1310  ;;  %v1508_v44 = vsel %vm1455_vm8, %v1492_v35, %v1507_v58 }
 0x466   : > { %v7370_v54 = vpop.f32.mrb[3].mxu0  ;;  %v1411_v33 = vrot.slane %v1311_v53, %v8369_v19 }
 0x467   : > { %v1416_v54 = vrot.slane %v8319_v1, %v8372_v21 }
 0x469   : > { %v8356_v56 = vpop.xlane.xlu0 %1331 }
 0x46a   : > { %v1496_v16 = vrot.slane %v8356_v56, %v8372_v21 }
 0x46c   : > { %v1509_v50 = vsel %vm1457_vm9, %v1496_v16, %v1508_v44 }
 0x46d   : > { %v8358_v59 = vpop.xlane.xlu0 %1328 }
 0x46e   : > { %v1429_v29 = vrot.slane %v8358_v59, %v8369_v19  ;;  %v1421_v59 = vsel %vm1384_vm4, %v1420_v38, %v1416_v54 }
 0x471   : > { %v8360_v60 = vpop.xlane.xlu0 %1337 }
 0x472   : > { %v1438_v56 = vrot.slane %v8360_v60, %v8369_v19 }
 0x475   : > { %v1766_v61 = vpop.permute.xlu0 %1765 }
 0x476   : > { %v1860_v63 = vsel %vm1278_vm3, %v1766_v61, 0.0 }
 0x477   : > { %1861 = vadd.xlane.f32.xlu0 %v1860_v63 }
 0x479   : > { %v1764_v0 = vpop.permute.xlu0 %1763 }
 0x47a   : > { %v1857_v2 = vsel %vm1278_vm3, %v1764_v0, 0.0  ;;  %v8427_v0 = vsel %vm934_vm11, -1e+30, %v7890_v6 }
 0x47b   : > { %1858 = vadd.xlane.f32.xlu1 %v1857_v2 }
 0x47e   : > { %v1308_v5 = vpop.xlane.xlu1 %1307 }
 0x47f   : > { %v1407_v31 = vrot.slane %v1308_v5, %v8372_v21 }
 0x481   : > { %v1412_v39 = vsel %vm1384_vm4, %v1411_v33, %v1407_v31 }
 0x482   : > { %v1326_v8 = vpop.xlane.xlu1 %1325  ;;  %v1454_v61 = vsel %vm1453_vm7, %v1412_v39, %v1452_v20 }
 0x483   : > { %v1425_v41 = vrot.slane %v1326_v8, %v8372_v21 }
 0x485   : > { %v1430_v63 = vsel %vm1384_vm4, %v1429_v29, %v1425_v41 }
 0x486   : > { %v1341_v9 = vpop.xlane.xlu1 %1340 }
 0x487   : > { %v1500_v62 = vrot.slane %v1341_v9, %v8372_v21 }
 0x489   : > { %v1510_v43 = vsel %vm1459_vm10, %v1500_v62, %v1509_v50 }
 0x48a   : > { %v1335_v11 = vpop.xlane.xlu1 %1334 }
 0x48b   : > { %v1434_v46 = vrot.slane %v1335_v11, %v8372_v21  ;;  %v1456_v11 = vsel %vm1455_vm8, %v1421_v59, %v1454_v61 }
 0x48d   : > { %v1439_v5 = vsel %vm1384_vm4, %v1438_v56, %v1434_v46 }
 0x48e   : > { %v1762_v12 = vpop.permute.xlu1 %1761 }
 0x48f   : > { %v1854_v14 = vsel %vm1278_vm3, %v1762_v12, 0.0 }
 0x490   : > { %1855 = vadd.xlane.f32.xlu0 %v1854_v14 }
 0x494   : > { %1868 = vadd.xlane.f32.xlu0 %v1867_v15  ;;  %v1458_v15 = vsel %vm1457_vm9, %v1430_v63, %v1456_v11 }
 0x495   : > { %v1460_v18 = vsel %vm1459_vm10, %v1439_v5, %v1458_v15 }
 0x4aa   : > { %v1347_v47 = vpop.xlane.xlu0 %1346 }
 0x4ab   : > { %v1447_v60 = vrot.slane %v1347_v47, %v8369_v19 }
 0x4ae   : > { %v8436_v12 = vpop.xlane.xlu0 %1792 }
 0x4b2   : > { %v1808_v36 = vpop.xlane.xlu0 %1807 }
 0x4b3   : > { %v1986_v34 = vrot.slane %v1808_v36, %v8372_v21 }
 0x4b6   : > { %v1802_v28 = vpop.xlane.xlu0 %1801 }
 0x4ba   : > { %v1817_v4 = vpop.xlane.xlu0 %1816 }
 0x4bb   : > { %v1990_v38 = vrot.slane %v1817_v4, %v8372_v21 }
 0x4be   : > { %v1811_v7 = vpop.xlane.xlu0 %1810 }
 0x4bf   : > { %v1350_v49 = vpop.xlane.xlu1 %1349  ;;  %v1907_v11 = vrot.slane %v1811_v7, %v8372_v21 }
 0x4c0   : > { %v1504_v53 = vrot.slane %v1350_v49, %v8372_v21 }
 0x4c2   : > { %v1511_v2 = vsel %vm1461_vm12, %v1504_v53, %v1510_v43  ;;  %v1829_v31 = vpop.xlane.xlu0 %1828 }
 0x4c3   : > { %v1344_v8 = vpop.xlane.xlu1 %1343  ;;  %v1586_v1 = vadd.f32 %v8288_v27, %v1511_v2 }
 0x4c4   : > { %v1443_v9 = vrot.slane %v1344_v8, %v8372_v21 }
 0x4c5   : > { %v8439_v14 = vadd.f32 %v1586_v1, %v8427_v0  ;;  %v1898_v1 = vrot.slane %v1802_v28, %v8372_v21 }
 0x4c6   : > { %v1448_v17 = vsel %vm1384_vm4, %v1447_v60, %v1443_v9  ;;  %v1826_v45 = vpop.xlane.xlu0 %1825 }
 0x4c7   : > { %v1593_v27 = vsel %vm1278_vm3, %v8439_v14, -inf  ;;  %v1462_v22 = vsel %vm1461_vm12, %v1448_v17, %v1460_v18  ;;  %v1799_v26 = vpop.xlane.xlu1 %1798  ;;  %v1994_v44 = vrot.slane %v1826_v45, %v8372_v21 }
 0x4c8   : > { %1594 = vmax.xlane.f32.xlu0 %v1593_v27  ;;  %v8448_v25 = vadd.f32 %v1462_v22, %v8285_v24  ;;  %v1982_v16 = vrot.slane %v1799_v26, %v8372_v21 }
 0x4ca   : > { %v1590_v23 = vsel %vm938_vm2, %v8448_v25, -inf  ;;  %v1823_v58 = vpop.xlane.xlu0 %1822  ;;  %v2011_v37 = vsel %vm1449_vm5, %v1986_v34, %v1982_v16 }
 0x4cb   : > { %1591 = vmax.xlane.f32.xlu1 %v1590_v23  ;;  %v1796_v48 = vpop.xlane.xlu1 %1795  ;;  %v2012_v39 = vsel %vm1451_vm6, %v1990_v38, %v2011_v37  ;;  %v1920_v15 = vrot.slane %v1823_v58, %v8369_v19 }
 0x4cc   : > { %v2013_v49 = vsel %vm1453_vm7, %v1994_v44, %v2012_v39  ;;  %v1893_v60 = vrot.slane %v1796_v48, %v8369_v19 }
 0x4ce   : > { %v1844_v24 = vpop.xlane.xlu0 %1843 }
 0x4cf   : > { %v1805_v30 = vpop.xlane.xlu1 %1804  ;;  %v2002_v29 = vrot.slane %v1844_v24, %v8372_v21 }
 0x4d0   : > { %v1902_v5 = vrot.slane %v1805_v30, %v8369_v19  ;;  %v1925_v30 = vrot.slane %v1829_v31, %v8372_v21 }
 0x4d2   : > { %v1841_v62 = vpop.xlane.xlu0 %1840  ;;  %v1903_v17 = vsel %vm1384_vm4, %v1902_v5, %v1898_v1 }
 0x4d3   : > { %v1814_v10 = vpop.xlane.xlu1 %1813 }
 0x4d4   : > { %v1911_v8 = vrot.slane %v1814_v10, %v8369_v19 }
 0x4d6   : > { %v1847_v47 = vpop.xlane.xlu0 %1846  ;;  %v1912_v27 = vsel %vm1384_vm4, %v1911_v8, %v1907_v11 }
 0x4d7   : > { %v1835_v42 = vpop.xlane.xlu1 %1834  ;;  %v1943_v7 = vrot.slane %v1847_v47, %v8372_v21 }
 0x4d8   : > { %v1998_v41 = vrot.slane %v1835_v42, %v8372_v21 }
 0x4da   : > { %v2014_v20 = vsel %vm1455_vm8, %v1998_v41, %v2013_v49 }
 0x4db   : > { %v1832_v32 = vpop.xlane.xlu1 %1831  ;;  %v2015_v54 = vsel %vm1457_vm9, %v2002_v29, %v2014_v20 }
 0x4dc   : > { %v1929_v28 = vrot.slane %v1832_v32, %v8369_v19 }
 0x4de   : > { %v1930_v58 = vsel %vm1384_vm4, %v1929_v28, %v1925_v30 }
 0x4df   : > { %v1820_v33 = vpop.xlane.xlu1 %1819 }
 0x4e0   : > { %v1916_v9 = vrot.slane %v1820_v33, %v8372_v21 }
 0x4e2   : > { %v1921_v23 = vsel %vm1384_vm4, %v1920_v15, %v1916_v9 }
 0x4e3   : > { %v1838_v35 = vpop.xlane.xlu1 %1837 }
 0x4e4   : > { %v1934_v36 = vrot.slane %v1838_v35, %v8372_v21 }
 0x4e7   : > { %v1853_v46 = vpop.xlane.xlu1 %1852 }
 0x4e8   : > { %v2006_v50 = vrot.slane %v1853_v46, %v8372_v21 }
 0x4ea   : > { %v2016_v61 = vsel %vm1459_vm10, %v2006_v50, %v2015_v54 }
 0x4eb   : > { %v1850_v18 = vpop.xlane.xlu1 %1849 }
 0x4ec   : > { %v1947_v48 = vrot.slane %v1850_v18, %v8369_v19 }
 0x4ee   : > { %v1948_v33 = vsel %vm1384_vm4, %v1947_v48, %v1943_v7 }
 0x504   : > { %v1862_v53 = vpop.xlane.xlu0 %1861 }
 0x505   : > { %v2010_v56 = vrot.slane %v1862_v53, %v8372_v21 }
 0x507   : > { %v2017_v43 = vsel %vm1461_vm12, %v2010_v56, %v2016_v61 }
 0x508   : > { %v2090_v63 = vadd.f32 %v8354_v51, %v2017_v43  ;;  %v1889_v51 = vrot.slane %v8436_v12, %v8372_v21  ;;  %v1938_v12 = vrot.slane %v1841_v62, %v8369_v19  ;;  %v1859_v42 = vpop.xlane.xlu1 %1858 }
 0x509   : > { %v1956_v24 = vrot.slane %v1859_v42, %v8369_v19 }
 0x50a   : > { %v2093_v2 = vadd.f32 %v2090_v63, %v8427_v0  ;;  %v1894_v22 = vsel %vm1384_vm4, %v1893_v60, %v1889_v51  ;;  %v1939_v45 = vsel %vm1384_vm4, %v1938_v12, %v1934_v36  ;;  %v2205_v36 = vld [vmem:[%s10052_s15 + $0x8] sm:$0xff] }
 0x50b   : > { %v1958_v26 = vsel %vm1449_vm5, %v1903_v17, %v1894_v22 }
 0x50c   : > { %v2097_v59 = vsel %vm1278_vm3, %v2093_v2, -inf  ;;  %v1959_v4 = vsel %vm1451_vm6, %v1912_v27, %v1958_v26 }
 0x50d   : > { %2098 = vmax.xlane.f32.xlu0 %v2097_v59  ;;  %v1960_v10 = vsel %vm1453_vm7, %v1921_v23, %v1959_v4  ;;  %v2204_v23 = vld [vmem:[%s10052_s15] sm:$0xff] }
 0x50e   : > { %v1961_v34 = vsel %vm1455_vm8, %v1930_v58, %v1960_v10  ;;  %v7646_v26 = vpack.c.bf16 %v2205_v36, %v2204_v23 }
 0x50f   : > { %v1962_v31 = vsel %vm1457_vm9, %v1939_v45, %v1961_v34 }
 0x510   : > { %v1963_v62 = vsel %vm1459_vm10, %v1948_v33, %v1962_v31  ;;  %7647 = vmatpush3.bf16.msra.mxu0 %v7646_v26 }
 0x511   : > { %7654 = vmatprep.subr.bf16.mxu0 %v7888_v3 }
 0x51d   : > { %v1856_v32 = vpop.xlane.xlu0 %1855 }
 0x51e   : > { %v1952_v16 = vrot.slane %v1856_v32, %v8372_v21 }
 0x520   : > { %v1957_v35 = vsel %vm1384_vm4, %v1956_v24, %v1952_v16  ;;  %v2285_v24 = vld [vmem:[%s9979_s21] sm:$0xff]  ;;  %v2286_v16 = vld [vmem:[%s9979_s21 + $0x8] sm:$0xff] }
 0x521   : > { %v1869_v37 = vpop.xlane.xlu0 %1868  ;;  %v1964_v38 = vsel %vm1461_vm12, %v1957_v35, %v1963_v62  ;;  %v7649_v34 = vpack.c.bf16 %v2286_v16, %v2285_v24  ;;  %v2520_v24 = vld [vmem:[%s9975_s17 + $0x8] sm:$0xff] }
 0x522   : > { %v1966_v39 = vadd.f32 %v1964_v38, %v1869_v37 }
 0x523   : > { %2115 = vrot.lane.b32.xlu0 %v8122_v40, %s10004_s0 }
 0x524   : > { %v2094_v41 = vsel %vm938_vm2, %v1966_v39, -inf }
 0x525   : > { %2095 = vmax.xlane.f32.xlu1 %v2094_v41  ;;  %v2288_v41 = vld [vmem:[%s9979_s21 + $0x18] sm:$0xff] }
 0x536   : > { %1611 = vrot.lane.b32.xlu1 %v8122_v40, %s10008_s8 }
 0x555   : > { %v1595_v46 = vpop.xlane.xlu0 %1594 }
 0x558   : > { %v1592_v44 = vpop.xlane.xlu1 %1591 }
 0x559   : > { %v1596_v47 = vmax.f32 %v1592_v44, %v1595_v46  ;;  %v7021_v46 = vld [vmem:[%s9981_s23] ss:$0 sm:$0xff] }
 0x55b   : > { %v1600_v49 = vsub.f32 %v8439_v14, %v1596_v47  ;;  %v1597_v53 = vsub.f32 %v8448_v25, %v1596_v47  ;;  %v7017_v47 = vld [vmem:[%s9974_s16] ss:$0 sm:$0xff] }
 0x55d   : > { %v1601_v20 = vmul.f32 1.442695, %v1600_v49  ;;  %v1598_v59 = vmul.f32 1.442695, %v1597_v53 }
 0x55f   : > { %7770 = vpow2.f32 %v1601_v20 }
 0x569   : > { %v7771_v63 = vpop.eup %7770 }
 0x56a   : > { %v1606_v11 = vsel %vm1278_vm3, %v7771_v63, 0.0 }
 0x59a   : > { %v2099_v50 = vpop.xlane.xlu0 %2098 }
 0x59e   : > { %v2116_v40 = vpop.permute.xlu0 %2115 }
 0x5b2   : > { %v2096_v29 = vpop.xlane.xlu1 %2095 }
 0x5b3   : > { %v2100_v54 = vmax.f32 %v2096_v29, %v2099_v50 }
 0x5b5   : > { %v2101_v56 = vsub.f32 %v1966_v39, %v2100_v54  ;;  %v2104_v61 = vsub.f32 %v2093_v2, %v2100_v54  ;;  %v2287_v39 = vld [vmem:[%s9979_s21 + $0x10] sm:$0xff] }
 0x5b6   : > { %v1612_v43 = vpop.permute.xlu1 %1611  ;;  %v7652_v44 = vpack.c.bf16 %v2288_v41, %v2287_v39 }
 0x5b7   : > { %v2102_v5 = vmul.f32 1.442695, %v2101_v56  ;;  %v2105_v8 = vmul.f32 1.442695, %v2104_v61  ;;  %7362 = vmatpush3.msra.mxu1 %v1612_v43  ;;  %v2289_v56 = vld [vmem:[%s9980_s22] sm:$0xff]  ;;  %v2290_v61 = vld [vmem:[%s9980_s22 + $0x8] sm:$0xff] }
 0x5b8   : > { %7364 = vmatmul.mubr.msk.f32.vlgmr.msra.gmra.mrb[6].mxu1 %vm1278_vm3, %v7771_v63  ;;  %7371 = vmatprep.subr.mxu1 %v7890_v6  ;;  %v7655_v43 = vpack.c.bf16 %v2290_v61, %v2289_v56 }
 0x5b9   : > { %7772 = vpow2.f32 %v2102_v5  ;;  %7372 = vmatpush3.msra.mxu1 %v2116_v40  ;;  %7373 = vmatprep.mubr.msk.f32.mxu1 %vm7889_vm0, %v7890_v6 }
 0x5ba   : > { %7774 = vpow2.f32 %v2105_v8  ;;  %7648 = vmatprep.subr.bf16.mxu1 %v7888_v3 }
 0x5bb   : > { %7776 = vpow2.f32 %v1598_v59 }
 0x5c3   : > { %v7773_v14 = vpop.eup %7772 }
 0x5c4   : > { %v7775_v25 = vpop.eup %7774  ;;  %v2107_v2 = vsel %vm938_vm2, %v7773_v14, 0.0 }
 0x5c5   : > { %v7777_v1 = vpop.eup %7776  ;;  %7374 = vmatmul.mubr.msk.f32.vlgmr.msra.gmra.mrb[8].mxu1 %vm1278_vm3, %v7775_v25  ;;  %v2110_v60 = vsel %vm1278_vm3, %v7775_v25, 0.0  ;;  %2108 = vadd.xlane.f32.xlu1 %v2107_v2 }
 0x5c6   : > { %2111 = vadd.xlane.f32.xlu0 %v2110_v60  ;;  %7391 = vmatprep.mubr.msk.f32.mxu1 %vm7889_vm0, %v7890_v6  ;;  %v1603_v9 = vsel %vm938_vm2, %v7777_v1, 0.0 }
 0x5c7   : > { %7650 = vmatpush3.bf16.msra.mxu1 %v7649_v34 }
 0x5c8   : > { %7651 = vmatprep.subr.bf16.mxu1 %v7888_v3 }
 0x5c9   : > { %1604 = vadd.xlane.f32.xlu1 %v1603_v9 }
 0x5ca   : > { %1607 = vadd.xlane.f32.xlu0 %v1606_v11 }
 0x5cb   : > { %7653 = vmatpush3.bf16.msra.mxu1 %v7652_v44 }
 0x5cc   : > { %7660 = vmatprep.subr.bf16.mxu1 %v7888_v3 }
 0x652   : > { %v2109_v51 = vpop.xlane.xlu1 %2108 }
 0x653   : > { %v2112_v15 = vpop.xlane.xlu0 %2111 }
 0x654   : > { %v2113_v17 = vadd.f32 %v2112_v15, %v2109_v51 }
 0x656   : > { %7778 = vrcp.f32 %v2113_v17  ;;  %v1605_v18 = vpop.xlane.xlu1 %1604 }
 0x657   : > { %v1608_v27 = vpop.xlane.xlu0 %1607 }
 0x658   : > { %v1609_v22 = vadd.f32 %v1608_v27, %v1605_v18 }
 0x65a   : > { %7780 = vrcp.f32 %v1609_v22 }
 0x660   : > { %v7779_v28 = vpop.eup %7778 }
 0x661   : > { %v2192_v48 = vmul.f32 %v7779_v28, %v2109_v51 }
 0x663   : > { %v2193_v12 = vmul.f32 %v8147_v55, %v2192_v48 }
 0x664   : > { %v7781_v4 = vpop.eup %7780 }
 0x665   : > { %2195 = vrot.lane.b32.xlu1 %v2193_v12, %s10004_s0  ;;  %v1688_v30 = vmul.f32 %v7781_v4, %v1605_v18  ;;  %s10054_s0 = sld [smem:[#allocation11_spill]] }
 0x667   : > { %v1689_v7 = vmul.f32 %v8147_v55, %v1688_v30 }
 0x669   : > { %1691 = vrot.lane.b32.xlu0 %v1689_v7, %s10008_s8  ;;  %s10053_s8 = smov 112  }
 0x68b   : > { %v1683_v10 = vpop.f32.mrb[6].mxu1 }
 0x68c   : > { %v1687_v42 = vmul.f32 %v7781_v4, %v1683_v10  ;;  %v7365_v45 = vpop.f32.mrb[7].mxu1  ;;  %v7024_v4 = vld [vmem:[%s10054_s0] ss:$0 sm:$0xff] }
 0x698   : > { %v2187_v58 = vpop.f32.mrb[8].mxu1 }
 0x699   : > { %v2191_v33 = vmul.f32 %v7779_v28, %v2187_v58  ;;  %v7375_v32 = vpop.f32.mrb[9].mxu1 }
 0x69a   : > { %v2519_v32 = vld [vmem:[%s9975_s17] sm:$0xff] }
 0x69b   : > { %v7658_v16 = vpack.c.bf16 %v2520_v24, %v2519_v32 }
 0x6d7   : > { %v2196_v55 = vpop.permute.xlu1 %2195 }
 0x6d8   : > { %v2198_v31 = vadd.f32 %v2196_v55, %v2191_v33  ;;  %v7025_v33 = vld [vmem:[%s10055_s6] ss:$0 sm:$0xff] }
 0x6da   : > { %2200 = vrot.lane.b32.xlu1 %v2198_v31, %s10002_s3  ;;  %s10067_s3 = sld [smem:[#allocation19_spill]] }
 0x6db   : > { %v1692_v35 = vpop.permute.xlu0 %1691 }
 0x6dc   : > { %v1694_v62 = vadd.f32 %v1692_v35, %v1687_v42 }
 0x6de   : > { %2292 = vrot.lane.b32.xlu1 %v8086_v13, %s10012_s12 }
 0x6e2   : > { %2380 = vrot.lane.b32.xlu1 %v7021_v46, %s10012_s12  ;;  %v2602_v46 = vld [vmem:[%s9977_s19] sm:$0xff] }
 0x74c   : > { %v2201_v37 = vpop.permute.xlu1 %2200 }
 0x74d   : > { %v2203_v38 = vsel %vm1278_vm3, %v1694_v62, %v2201_v37 }
 0x74e   : > { %7381 = vmatmul.mubr.msk.f32.vlgmr.msra.gmra.mrb[4].mxu0 %vm938_vm2, %v2203_v38 }
 0x74f   : > { %7398 = vmatprep.mubr.msk.f32.mxu0 %vm7889_vm0, %v7890_v6  ;;  %7656 = vmatpush3.bf16.msra.mxu0 %v7655_v43 }
 0x750   : > { %v2293_v53 = vpop.permute.xlu1 %2292  ;;  %7657 = vmatprep.subr.bf16.mxu0 %v7888_v3 }
 0x754   : > { %v2381_v51 = vpop.permute.xlu1 %2380 }
 0x821   : > { %v2280_v49 = vpop.f32.mrb[4].mxu0 }
 0x822   : > { %v2281_v20 = vadd.f32 %v7017_v47, %v2280_v49  ;;  %v7382_v50 = vpop.f32.mrb[5].mxu0  ;;  %v2603_v47 = vld [vmem:[%s9977_s19 + $0x8] sm:$0xff] }
 0x823   : > { %v7661_v49 = vpack.c.bf16 %v2603_v47, %v2602_v46  ;;  %v7031_v50 = vld [vmem:[%s9979_s21 + $0x28] sm:$0xff] }
 0x824   : > { %v2284_v29 = vmax.f32 %v2281_v20, 0.0  ;;  %v7030_v20 = vld [vmem:[%s9979_s21 + $0x20] sm:$0xff] }
 0x826   : > { %v2295_v54 = vsel %vm938_vm2, %v2284_v29, %v2293_v53  ;;  %v7664_v29 = vpack.c.bf16 %v7031_v50, %v7030_v20 }
 0x827   : > { %7392 = vmatmul.mubr.msk.f32.vlgmr.msra.gmra.mrb[10].mxu1 %vm853_vm1, %v2295_v54 }
 0x828   : > { %7412 = vmatprep.mubr.msk.f32.mxu1 %vm7889_vm0, %v7890_v6  ;;  %7662 = vmatpush3.bf16.msra.mxu1 %v7661_v49  ;;  %v7049_v49 = vld [vmem:[%s9971_s13 + $0x1] ss:$0 sm:$0xff] }
 0x829   : > { %7669 = vmatprep.subr.bf16.mxu1 %v7888_v3 }
 0x8fa   : > { %v2365_v63 = vpop.f32.mrb[10].mxu1 }
 0x8fb   : > { %v7020_v59 = vmul.f32 -1.442695, %v2365_v63  ;;  %v7393_v5 = vpop.f32.mrb[11].mxu1  ;;  %v2383_v15 = vsub.f32 %v2365_v63, %v2381_v51 }
 0x8fd   : > { %7782 = vpow2.f32 %v7020_v59  ;;  %v7022_v17 = vmul.f32 -1.442695, %v2383_v15  ;;  %v7033_v59 = vld [vmem:[%s9979_s21 + $0x38] sm:$0xff] }
 0x907   : > { %v7783_v8 = vpop.eup %7782 }
 0x908   : > { %v2372_v40 = vadd.f32 1.0, %v7783_v8  ;;  %v7038_v8 = vld [vmem:[%s9981_s23 + $0x1] ss:$0 sm:$0xff] }
 0x90a   : > { %7784 = vrcp.f32 %v2372_v40  ;;  %v7028_v40 = vld [vmem:[%s9978_s20] ss:$0 sm:$0xff] }
 0x914   : > { %v7785_v14 = vpop.eup %7784 }
 0x915   : > { %v2390_v25 = vmul.f32 %v7785_v14, %v8086_v13 }
 0x917   : > { %7399 = vmatmul.mubr.msk.f32.vlgmr.msra.gmra.mrb[6].mxu0 %vm938_vm2, %v2390_v25 }
 0x918   : > { %7405 = vmatprep.mubr.msk.f32.mxu0 %vm7889_vm0, %v7890_v6  ;;  %7659 = vmatpush3.bf16.msra.mxu0 %v7658_v16 }
 0x919   : > { %7663 = vmatprep.subr.bf16.mxu0 %v7888_v3 }
 0x9ea   : > { %v2460_v2 = vpop.f32.mrb[6].mxu0 }
 0x9eb   : > { %2465 = vrot.lane.b32.xlu0 %v2460_v2, %s10010_s11  ;;  %v7400_v1 = vpop.f32.mrb[7].mxu0  ;;  %s10058_s11 = smov 120  }
 0xa5d   : > { %v2466_v60 = vpop.permute.xlu0 %2465 }
 0xa5e   : > { %v2468_v9 = vadd.f32 %v2466_v60, %v2365_v63  ;;  %v7032_v63 = vld [vmem:[%s9979_s21 + $0x30] sm:$0xff] }
 0xa5f   : > { %v7667_v5 = vpack.c.bf16 %v7033_v59, %v7032_v63  ;;  %v7042_v63 = vld [vmem:[%s10046_s7 + $0x1] ss:$0 sm:$0xff]  ;;  %v7877_v59 = vld [vmem:[%s10048_s1] ss:$0 sm:$0xff] }
 0xa60   : > { %7786 = vtanh.f32 %v2468_v9  ;;  %v7034_v9 = vld [vmem:[%s9980_s22 + $0x10] sm:$0xff] }
 0xa61   : > { %7788 = vpow2.f32 %v7022_v17 }
 0xa6a   : > { %v7787_v11 = vpop.eup %7786 }
 0xa6b   : > { %2473 = vrot.lane.b32.xlu0 %v7787_v11, %s10053_s8  ;;  %v7789_v13 = vpop.eup %7788  ;;  %v7035_v11 = vld [vmem:[%s9980_s22 + $0x18] sm:$0xff] }
 0xa6c   : > { %v2387_v18 = vadd.f32 1.0, %v7789_v13  ;;  %v7670_v51 = vpack.c.bf16 %v7035_v11, %v7034_v9  ;;  %v7052_v9 = vld [vmem:[%s9972_s14 + $0xc8] sm:$0xff] }
 0xa6e   : > { %7790 = vrcp.f32 %v2387_v18 }
 0xa78   : > { %v7791_v27 = vpop.eup %7790 }
 0xa79   : > { %v2470_v22 = vsub.f32 1.0, %v7791_v27 }
 0xa7b   : > { %v2471_v36 = vmul.f32 %v2470_v22, %v2293_v53  ;;  %v7026_v53 = vld [vmem:[%s9976_s18] ss:$0 sm:$0xff] }
 0xadd   : > { %v2474_v23 = vpop.permute.xlu0 %2473 }
 0xade   : > { %v2476_v26 = vmul.f32 %v7791_v27, %v2474_v23 }
 0xae0   : > { %v8577_v28 = vadd.f32 %v2476_v26, %v2471_v36 }
 0xae2   : > { %2481 = vrot.lane.b32.xlu1 %v8577_v28, %s10053_s8 }
 0xb54   : > { %v8581_v48 = vpop.permute.xlu1 %2481 }
 0xb55   : > { %v2484_v12 = vsel %vm938_vm2, %v8581_v48, 0.0 }
 0xb56   : > { %2485 = vadd.xlane.f32.xlu0 %v2484_v12 }
 0xb6c   : > { %2506 = vrot.lane.b32.xlu0 %v7024_v4, %s10012_s12 }
 0xbe3   : > { %v2486_v30 = vpop.xlane.xlu0 %2485 }
 0xbe4   : > { %v2487_v7 = vmul.f32 0.0625, %v2486_v30  ;;  %v7047_v30 = vld [vmem:[%s10045_s10 + $0x10] sm:$0xff] }
 0xbe6   : > { %v2488_v10 = vsub.f32 %v8577_v28, %v2487_v7 }
 0xbe7   : > { %v2507_v62 = vpop.permute.xlu0 %2506 }
 0xbe8   : > { %v2489_v42 = vmul.f32 %v2488_v10, %v2488_v10 }
 0xbea   : > { %2491 = vrot.lane.b32.xlu1 %v2489_v42, %s10053_s8 }
 0xc5c   : > { %v2492_v45 = vpop.permute.xlu1 %2491 }
 0xc5d   : > { %v2494_v58 = vsel %vm938_vm2, %v2492_v45, 0.0 }
 0xc5e   : > { %2495 = vadd.xlane.f32.xlu1 %v2494_v58 }
 0xc6f   : > { %2515 = vrot.lane.b32.xlu1 %v7025_v33, %s10012_s12  ;;  %s10063_s12 = sld [smem:[#allocation17_spill]] }
 0xc73   : > { %2777 = vrot.lane.b32.xlu1 %v7038_v8, %s10056_s25 }
 0xceb   : > { %v2496_v34 = vpop.xlane.xlu1 %2495 }
 0xcec   : > { %v2497_v55 = vmul.f32 0.0625, %v2496_v34 }
 0xcee   : > { %v2498_v31 = vadd.f32 1e-05, %v2497_v55 }
 0xcef   : > { %v2516_v38 = vpop.permute.xlu1 %2515 }
 0xcf0   : > { %7792 = vrsqrt.f32 %v2498_v31 }
 0xcf3   : > { %v2778_v42 = vpop.permute.xlu1 %2777 }
 0xcfa   : > { %v7793_v35 = vpop.eup %7792 }
 0xcfb   : > { %v2500_v37 = vmul.f32 %v7793_v35, %v2488_v10 }
 0xcfd   : > { %v2509_v39 = vmul.f32 %v2507_v62, %v2500_v37 }
 0xcff   : > { %v2518_v41 = vadd.f32 %v2516_v38, %v2509_v39 }
 0xd01   : > { %2527 = vrot.lane.b32.xlu0 %v2518_v41, %s10053_s8 }
 0xd73   : > { %v2528_v44 = vpop.permute.xlu0 %2527 }
 0xd74   : > { %7406 = vmatmul.mubr.msk.f32.vlgmr.msra.gmra.mrb[8].mxu0 %vm938_vm2, %v2528_v44  ;;  %v7041_v44 = vld [vmem:[%s10044_s9 + $0x1] ss:$0 sm:$0xff] }
 0xd75   : > { %7423 = vmatprep.mubr.msk.f32.mxu0 %vm7889_vm0, %v7890_v6  ;;  %7665 = vmatpush3.bf16.msra.mxu0 %v7664_v29  ;;  %v7876_v29 = vld [vmem:[%s10050_s28] ss:$0 sm:$0xff] }
 0xd76   : > { %7666 = vmatprep.subr.bf16.mxu0 %v7888_v3 }
 0xd79   : > { %7668 = vmatpush3.bf16.msra.mxu0 %v7667_v5 }
 0xd7a   : > { %7675 = vmatprep.subr.bf16.mxu0 %v7888_v3 }
 0xe47   : > { %v2597_v54 = vpop.f32.mrb[8].mxu0 }
 0xe48   : > { %v2598_v56 = vadd.f32 %v7026_v53, %v2597_v54  ;;  %v7407_v61 = vpop.f32.mrb[9].mxu0 }
 0xe4a   : > { %v2601_v43 = vmax.f32 %v2598_v56, 0.0 }
 0xe4c   : > { %7413 = vmatmul.mubr.msk.f32.vlgmr.msra.gmra.mrb[12].mxu1 %vm938_vm2, %v2601_v43 }
 0xe4d   : > { %7430 = vmatprep.mubr.msk.f32.mxu1 %vm7889_vm0, %v7890_v6  ;;  %7671 = vmatpush3.bf16.msra.mxu1 %v7670_v51 }
 0xe4e   : > { %7672 = vmatprep.subr.bf16.mxu1 %v7888_v3 }
 0xf1f   : > { %v2678_v14 = vpop.f32.mrb[12].mxu1 }
 0xf20   : > { %v2679_v25 = vadd.f32 %v7028_v40, %v2678_v14  ;;  %v7414_v2 = vpop.f32.mrb[13].mxu1 }
 0xf21   : > { %v7056_v2 = vld [vmem:[%s9972_s14 + $0xe8] sm:$0xff] }
 0xf22   : > { %v2682_v1 = vmax.f32 %v2679_v25, 0.0 }
 0xf24   : > { %v2692_v60 = vsel %vm938_vm2, %v2682_v1, %v8577_v28 }
 0xf25   : > { %7424 = vmatmul.mubr.msk.f32.vlgmr.msra.gmra.mrb[10].mxu0 %vm853_vm1, %v2692_v60 }
 0xf26   : > { %7444 = vmatprep.mubr.msk.f32.mxu0 %vm7889_vm0, %v7890_v6 }
 0xff8   : > { %v2762_v15 = vpop.f32.mrb[10].mxu0 }
 0xff9   : > { %v7037_v17 = vmul.f32 -1.442695, %v2762_v15  ;;  %v7425_v13 = vpop.f32.mrb[11].mxu0  ;;  %v2780_v45 = vsub.f32 %v2762_v15, %v2778_v42 }
 0xffb   : > { %7794 = vpow2.f32 %v7037_v17  ;;  %v7039_v58 = vmul.f32 -1.442695, %v2780_v45 }
0x1005   : > { %v7795_v18 = vpop.eup %7794 }
0x1006   : > { %v2769_v27 = vadd.f32 1.0, %v7795_v18 }
0x1008   : > { %7796 = vrcp.f32 %v2769_v27 }
0x1012   : > { %v7797_v22 = vpop.eup %7796 }
0x1013   : > { %v2787_v23 = vmul.f32 %v7797_v22, %v8581_v48  ;;  %v7048_v48 = vld [vmem:[%s10045_s10 + $0x18] sm:$0xff]  ;;  %v7057_v22 = vld [vmem:[%s9972_s14 + $0xf0] sm:$0xff] }
0x1014   : > { %v7676_v7 = vpack.c.bf16 %v7048_v48, %v7047_v30 }
0x1015   : > { %7431 = vmatmul.mubr.msk.f32.vlgmr.msra.gmra.mrb[14].mxu1 %vm938_vm2, %v2787_v23 }
0x1016   : > { %7437 = vmatprep.mubr.msk.f32.mxu1 %vm7889_vm0, %v7890_v6  ;;  %7677 = vmatpush3.bf16.msra.mxu0 %v7676_v7  ;;  %v7061_v7 = vld [vmem:[%s9972_s14 + $0x110] sm:$0xff] }
0x1017   : > { %7452 = vmatprep.subr.mxu0 %v7890_v6 }
0x10e8   : > { %v2857_v36 = vpop.f32.mrb[14].mxu1 }
0x10e9   : > { %2862 = vrot.lane.b32.xlu0 %v2857_v36, %s10057_s24  ;;  %v7432_v26 = vpop.f32.mrb[15].mxu1 }
0x115b   : > { %v2863_v12 = vpop.permute.xlu0 %2862 }
0x115c   : > { %v2865_v4 = vadd.f32 %v2863_v12, %v2762_v15  ;;  %v7055_v15 = vld [vmem:[%s9972_s14 + $0xe0] sm:$0xff]  ;;  %v7062_v12 = vld [vmem:[%s9972_s14 + $0x118] sm:$0xff] }
0x115e   : > { %7798 = vtanh.f32 %v2865_v4 }
0x115f   : > { %7800 = vpow2.f32 %v7039_v58  ;;  %v7063_v58 = vld [vmem:[%s9972_s14 + $0x120] sm:$0xff] }
0x1168   : > { %v7799_v10 = vpop.eup %7798 }
0x1169   : > { %2870 = vrot.lane.b32.xlu0 %v7799_v10, %s10053_s8  ;;  %v7801_v33 = vpop.eup %7800 }
0x116a   : > { %v2784_v32 = vadd.f32 1.0, %v7801_v33 }
0x116c   : > { %7802 = vrcp.f32 %v2784_v32 }
0x1176   : > { %v7803_v24 = vpop.eup %7802 }
0x1177   : > { %v2867_v16 = vsub.f32 1.0, %v7803_v24 }
0x1179   : > { %v2868_v55 = vmul.f32 %v2867_v16, %v8577_v28 }
0x11db   : > { %v2871_v34 = vpop.permute.xlu0 %2870 }
0x11dc   : > { %v2873_v31 = vmul.f32 %v7803_v24, %v2871_v34  ;;  %v7068_v24 = vld [vmem:[%s9972_s14 + $0x148] sm:$0xff] }
0x11de   : > { %v8667_v35 = vadd.f32 %v2873_v31, %v2868_v55  ;;  %v7067_v55 = vld [vmem:[%s9972_s14 + $0x140] sm:$0xff] }
0x11e0   : > { %2878 = vrot.lane.b32.xlu1 %v8667_v35, %s10053_s8 }
0x1252   : > { %v8671_v62 = vpop.permute.xlu1 %2878 }
0x1253   : > { %7445 = vmatmul.mubr.msk.f32.vlgmr.msra.gmra.mrb[12].mxu0 %vm938_vm2, %v8671_v62  ;;  %v2881_v37 = vsel %vm938_vm2, %v8671_v62, 0.0 }
0x1254   : > { %2882 = vadd.xlane.f32.xlu0 %v2881_v37  ;;  %7454 = vmatprep.mubr.msk.f32.mxu0 %vm7889_vm0, %v7890_v6 }
0x126a   : > { %2903 = vrot.lane.b32.xlu0 %v7041_v44, %s10056_s25 }
0x12e1   : > { %v2883_v38 = vpop.xlane.xlu0 %2882 }
0x12e2   : > { %v2884_v28 = vmul.f32 0.0625, %v2883_v38 }
0x12e4   : > { %v8680_v39 = vsub.f32 %v8667_v35, %v2884_v28  ;;  %v7069_v28 = vld [vmem:[%s9972_s14 + $0x150] sm:$0xff] }
0x12e6   : > { %v2886_v41 = vmul.f32 %v8680_v39, %v8680_v39 }
0x12e8   : > { %2888 = vrot.lane.b32.xlu1 %v2886_v41, %s10053_s8 }
0x1326   : > { %v3075_v46 = vpop.f32.mrb[12].mxu0 }
0x1327   : > { %v7446_v47 = vpop.f32.mrb[13].mxu0  ;;  %v3076_v20 = vadd.f32 %v7049_v49, %v3075_v46  ;;  %v7074_v46 = vld [vmem:[%s9972_s14 + $0x178] sm:$0xff]  ;;  %v7073_v49 = vld [vmem:[%s9972_s14 + $0x170] sm:$0xff] }
0x1329   : > { %v3081_v53 = vadd.f32 %v7876_v29, %v3076_v20  ;;  %v3079_v5 = vadd.f32 %v7877_v59, %v3076_v20 }
0x132b   : > { %v3082_v56 = vmul.f32 0.35355338, %v3081_v53  ;;  %v8705_v40 = vmul.f32 0.35355338, %v3079_v5 }
0x132d   : > { %v3117_v61 = vrot.slane %v3082_v56, %v8142_v52  ;;  %v3110_v17 = vcombine.high %v3082_v56, %v3082_v56 }
0x132f   : > { %v3125_v43 = vcombine.high %v3117_v61, %v3117_v61  ;;  %v3133_v14 = vrot.slane %v3117_v61, %v8142_v52  ;;  %v3124_v23 = vrot.slane %v3110_v17, %v8142_v52 }
0x1331   : > { %v3147_v8 = vrot.slane %v3125_v43, %v8142_v52  ;;  %v8717_v1 = vrot.slane %v3133_v14, %v8153_v57  ;;  %v3155_v11 = vcombine.high %v3133_v14, %v3133_v14  ;;  %v3126_v4 = vcombine.high %v3124_v23, %v3124_v23 }
0x1332   : > { %v3140_v30 = vrot.slane %v3124_v23, %v8142_v52  ;;  %v2904_v23 = vpop.permute.xlu0 %2903 }
0x1333   : > { %v8709_v25 = vrot.slane %v3147_v8, %v8153_v57  ;;  %v3200_v51 = vmul.f32 %v7052_v9, %v8717_v1  ;;  %v3157_v13 = vcombine.high %v3147_v8, %v3147_v8  ;;  %v8733_v18 = vrot.slane %v3155_v11, %v8153_v57  ;;  %v7043_v11 = vld [vmem:[%s10043_s29 + $0x10] sm:$0xff] }
0x1334   : > { %v3154_v10 = vrot.slane %v3126_v4, %v8142_v52  ;;  %v8757_v42 = vrot.slane %v3140_v30, %v8153_v57  ;;  %v3156_v16 = vcombine.high %v3140_v30, %v3140_v30 }
0x1335   : > { %v8720_v60 = vmul.f32 %v7056_v2, %v8709_v25  ;;  %v3203_v27 = vmul.f32 %v7055_v15, %v8709_v25  ;;  %v3205_v36 = vmul.f32 %v7057_v22, %v8733_v18  ;;  %v8743_v26 = vrot.slane %v3157_v13, %v8153_v57 }
0x1336   : > { %v3211_v33 = vmul.f32 %v7063_v58, %v8757_v42  ;;  %v8766_v32 = vrot.slane %v3154_v10, %v8153_v57  ;;  %v3158_v31 = vcombine.high %v3154_v10, %v3154_v10  ;;  %v8779_v38 = vrot.slane %v3156_v16, %v8153_v57  ;;  %v7051_v58 = vld [vmem:[%s9972_s14 + $0xc0] sm:$0xff] }
0x1337   : > { %v3210_v48 = vmul.f32 %v7062_v12, %v8743_v26  ;;  %v3209_v45 = vmul.f32 %v7061_v7, %v8743_v26  ;;  %v3235_v56 = vsel %vm1278_vm3, %v3203_v27, 0.0  ;;  %v3241_v61 = vsel %vm1278_vm3, %v3205_v36, 0.0  ;;  %v7045_v7 = vld [vmem:[%s10047_s30 + $0x1] ss:$0 sm:$0xff] }
0x1338   : > { %v3216_v34 = vmul.f32 %v7068_v24, %v8766_v32  ;;  %v3215_v37 = vmul.f32 %v7067_v55, %v8766_v32  ;;  %v8786_v41 = vmul.f32 %v7069_v28, %v8779_v38  ;;  %v8789_v44 = vrot.slane %v3158_v31, %v8153_v57  ;;  %v7054_v24 = vld [vmem:[%s9972_s14 + $0xd8] sm:$0xff]  ;;  %v7065_v28 = vld [vmem:[%s9972_s14 + $0x130] sm:$0xff] }
0x1339   : > { %v3256_v43 = vsel %vm1278_vm3, %v3210_v48, 0.0  ;;  %v3259_v59 = vsel %vm1278_vm3, %v3211_v33, 0.0  ;;  %v3202_v16 = vmul.f32 %v7054_v24, %v8709_v25  ;;  %v7060_v25 = vld [vmem:[%s9972_s14 + $0x108] sm:$0xff] }
0x133a   : > { %v8797_v47 = vmul.f32 %v7074_v46, %v8789_v44  ;;  %v8805_v20 = vmul.f32 %v7073_v49, %v8789_v44  ;;  %v3274_v5 = vsel %vm1278_vm3, %v3216_v34, 0.0  ;;  %v3271_v12 = vsel %vm1278_vm3, %v3215_v37, 0.0 }
0x133b   : > { %v3213_v46 = vmul.f32 %v7065_v28, %v8757_v42 }
0x135a   : > { %v2889_v50 = vpop.permute.xlu1 %2888 }
0x135b   : > { %v2891_v54 = vsel %vm938_vm2, %v2889_v50, 0.0  ;;  %v7053_v50 = vld [vmem:[%s9972_s14 + $0xd0] sm:$0xff] }
0x135c   : > { %2892 = vadd.xlane.f32.xlu1 %v2891_v54  ;;  %v3201_v29 = vmul.f32 %v7053_v50, %v8717_v1  ;;  %v3226_v54 = vsel %vm1278_vm3, %v3200_v51, 0.0 }
0x135e   : > { %v3229_v53 = vsel %vm1278_vm3, %v3201_v29, 0.0 }
0x136d   : > { %2912 = vrot.lane.b32.xlu1 %v7042_v63, %s10056_s25  ;;  %v3253_v63 = vsel %vm1278_vm3, %v3209_v45, 0.0 }
0x1371   : > { %3902 = vrot.lane.b32.xlu1 %v8705_v40, %s10058_s11 }
0x1375   : > { %3664 = vrot.lane.b32.xlu1 %v8720_v60, %s10058_s11 }
0x1379   : > { %3656 = vrot.lane.b32.xlu1 %v3200_v51, %s10058_s11  ;;  %v7044_v51 = vld [vmem:[%s10043_s29 + $0x18] sm:$0xff] }
0x137a   : > { %v7673_v15 = vpack.c.bf16 %v7044_v51, %v7043_v11 }
0x137c   : > { %7674 = vmatpush3.bf16.msra.mxu1 %v7673_v15 }
0x137d   : > { %3662 = vrot.lane.b32.xlu1 %v3203_v27, %s10058_s11  ;;  %7447 = vmatprep.subr.mxu1 %v7890_v6 }
0x1381   : > { %3666 = vrot.lane.b32.xlu1 %v3205_v36, %s10058_s11 }
0x1385   : > { %3676 = vrot.lane.b32.xlu1 %v3210_v48, %s10058_s11 }
0x1389   : > { %3674 = vrot.lane.b32.xlu1 %v3209_v45, %s10058_s11 }
0x138d   : > { %3678 = vrot.lane.b32.xlu1 %v3211_v33, %s10058_s11  ;;  %v3199_v33 = vmul.f32 %v7051_v58, %v8717_v1  ;;  %v7058_v1 = vld [vmem:[%s9972_s14 + $0xf8] sm:$0xff] }
0x138e   : > { %v3206_v31 = vmul.f32 %v7058_v1, %v8733_v18  ;;  %v3292_v1 = vsel %vm1278_vm3, %v8797_v47, 0.0 }
0x1391   : > { %3688 = vrot.lane.b32.xlu1 %v3216_v34, %s10058_s11  ;;  %v7059_v34 = vld [vmem:[%s9972_s14 + $0x100] sm:$0xff] }
0x1392   : > { %v3207_v55 = vmul.f32 %v7059_v34, %v8733_v18  ;;  %v7064_v18 = vld [vmem:[%s9972_s14 + $0x128] sm:$0xff] }
0x1393   : > { %v3212_v49 = vmul.f32 %v7064_v18, %v8757_v42  ;;  %v7070_v42 = vld [vmem:[%s9972_s14 + $0x158] sm:$0xff] }
0x1395   : > { %3686 = vrot.lane.b32.xlu1 %v3215_v37, %s10058_s11  ;;  %v3208_v37 = vmul.f32 %v7060_v25, %v8743_v26  ;;  %v7066_v26 = vld [vmem:[%s9972_s14 + $0x138] sm:$0xff] }
0x1396   : > { %v3214_v50 = vmul.f32 %v7066_v26, %v8766_v32  ;;  %v7072_v32 = vld [vmem:[%s9972_s14 + $0x168] sm:$0xff] }
0x1399   : > { %3690 = vrot.lane.b32.xlu1 %v8786_v41, %s10058_s11 }
0x139d   : > { %3700 = vrot.lane.b32.xlu1 %v8797_v47, %s10058_s11 }
0x13a1   : > { %3698 = vrot.lane.b32.xlu1 %v8805_v20, %s10058_s11 }
0x13c5   : > { %3230 = vadd.xlane.f32.xlu1 %v3229_v53 }
0x13c9   : > { %3227 = vadd.xlane.f32.xlu1 %v3226_v54  ;;  %v3218_v54 = vmul.f32 %v7070_v42, %v8779_v38 }
0x13cd   : > { %3236 = vadd.xlane.f32.xlu1 %v3235_v56  ;;  %v8906_v56 = vmul.f32 %v7072_v32, %v8789_v44  ;;  %v3223_v44 = vsel %vm1278_vm3, %v3199_v33, 0.0 }
0x13cf   : > { %v3286_v18 = vsel %vm1278_vm3, %v8906_v56, 0.0 }
0x13d1   : > { %3242 = vadd.xlane.f32.xlu1 %v3241_v61  ;;  %v8911_v61 = vld [vmem:[%s10051_s2 + $0x1] ss:$0 sm:$0xff]  ;;  %s10071_s2 = sld [smem:[#allocation22_spill]] }
0x13d5   : > { %3257 = vadd.xlane.f32.xlu1 %v3256_v43  ;;  %v3238_v43 = vsel %vm1278_vm3, %v8720_v60, 0.0  ;;  %v3262_v60 = vsel %vm1278_vm3, %v3212_v49, 0.0 }
0x13d9   : > { %3254 = vadd.xlane.f32.xlu1 %v3253_v63  ;;  %v3232_v63 = vsel %vm1278_vm3, %v3202_v16, 0.0 }
0x13dd   : > { %3260 = vadd.xlane.f32.xlu1 %v3259_v59  ;;  %v3247_v59 = vsel %vm1278_vm3, %v3207_v55, 0.0 }
0x13e1   : > { %3275 = vadd.xlane.f32.xlu1 %v3274_v5  ;;  %v3244_v5 = vsel %vm1278_vm3, %v3206_v31, 0.0 }
0x13e9   : > { %v2893_v8 = vpop.xlane.xlu1 %2892 }
0x13ea   : > { %v2894_v14 = vmul.f32 0.0625, %v2893_v8  ;;  %v3265_v8 = vsel %vm1278_vm3, %v3213_v46, 0.0 }
0x13ec   : > { %v2895_v2 = vadd.f32 1e-05, %v2894_v14 }
0x13ed   : > { %v2913_v9 = vpop.permute.xlu1 %2912 }
0x13ee   : > { %7804 = vrsqrt.f32 %v2895_v2 }
0x13f1   : > { %v8827_v17 = vpop.permute.xlu1 %3902 }
0x13f5   : > { %v3665_v13 = vpop.permute.xlu1 %3664 }
0x13f6   : > { %v3741_v27 = vsel %vm1278_vm3, %v3665_v13, 0.0 }
0x13f7   : > { %3742 = vadd.xlane.f32.xlu1 %v3741_v27  ;;  %v3268_v27 = vsel %vm1278_vm3, %v3214_v50, 0.0 }
0x13f8   : > { %v7805_v22 = vpop.eup %7804 }
0x13f9   : > { %v2897_v36 = vmul.f32 %v7805_v22, %v8680_v39  ;;  %v3657_v14 = vpop.permute.xlu1 %3656 }
0x13fb   : > { %v2906_v4 = vmul.f32 %v2904_v23, %v2897_v36  ;;  %3272 = vadd.xlane.f32.xlu1 %v3271_v12 }
0x13fd   : > { %v2915_v30 = vadd.f32 %v2913_v9, %v2906_v4  ;;  %v3663_v51 = vpop.permute.xlu1 %3662 }
0x13ff   : > { %2925 = vrot.lane.b32.xlu0 %v2915_v30, %s10053_s8  ;;  %v3729_v30 = vsel %vm1278_vm3, %v3657_v14, 0.0 }
0x1401   : > { %v3667_v22 = vpop.permute.xlu1 %3666 }
0x1402   : > { %v3744_v24 = vsel %vm1278_vm3, %v3667_v22, 0.0 }
0x1471   : > { %v2926_v48 = vpop.permute.xlu0 %2925 }
0x1472   : > { %7438 = vmatmul.mubr.msk.f32.vlgmr.msra.gmra.mrb[16].mxu1 %vm938_vm2, %v2926_v48  ;;  %v3677_v48 = vpop.permute.xlu1 %3676 }
0x1473   : > { %7449 = vmatprep.mubr.msk.f32.mxu1 %vm7889_vm0, %v7890_v6 }
0x1476   : > { %v3675_v58 = vpop.permute.xlu1 %3674 }
0x1545   : > { %v2995_v10 = vpop.f32.mrb[16].mxu1 }
0x1546   : > { %v8840_v45 = vadd.f32 %v7045_v7, %v2995_v10  ;;  %v7439_v39 = vpop.f32.mrb[17].mxu1  ;;  %v3280_v10 = vsel %vm1278_vm3, %v3218_v54, 0.0 }
0x1547   : > { %v3738_v39 = vsel %vm1278_vm3, %v3663_v51, 0.0 }
0x1548   : > { %3904 = vrot.lane.b32.xlu0 %v8840_v45, %s10058_s11  ;;  %7448 = vmatpush3.xpose.msk.msra.mxu1 %vm1278_vm3, %v8840_v45 }
0x1549   : > { %7457 = vmatprep.subr.mxu1 %v7890_v6 }
0x154b   : > { %7450 = vmatmul.mubr.msk.f32.vlgmr.msra.gmra.mrb[18].mxu1 %vm1278_vm3, %v8705_v40 }
0x154c   : > { %3658 = vrot.lane.b32.xlu0 %v3201_v29, %s10058_s11  ;;  %7459 = vmatprep.mubr.msk.f32.mxu1 %vm7889_vm0, %v7890_v6  ;;  %v7071_v29 = vld [vmem:[%s9972_s14 + $0x160] sm:$0xff] }
0x154d   : > { %v3219_v53 = vmul.f32 %v7071_v29, %v8779_v38  ;;  %v8917_v38 = vmul.f32 %v8911_v61, %v8705_v40  ;;  %v3250_v40 = vsel %vm1278_vm3, %v3208_v37, 0.0 }
0x1550   : > { %3654 = vrot.lane.b32.xlu0 %v3199_v33, %s10058_s11 }
0x1554   : > { %3660 = vrot.lane.b32.xlu0 %v3202_v16, %s10058_s11  ;;  %v3277_v16 = vsel %vm1278_vm3, %v8786_v41, 0.0 }
0x1558   : > { %3670 = vrot.lane.b32.xlu0 %v3207_v55, %s10058_s11  ;;  %v3759_v55 = vsel %vm1278_vm3, %v3677_v48, 0.0 }
0x155c   : > { %3668 = vrot.lane.b32.xlu0 %v3206_v31, %s10058_s11  ;;  %v3679_v31 = vpop.permute.xlu1 %3678 }
0x155d   : > { %v3762_v47 = vsel %vm1278_vm3, %v3679_v31, 0.0 }
0x1560   : > { %3672 = vrot.lane.b32.xlu0 %v3208_v37, %s10058_s11  ;;  %v3289_v37 = vsel %vm1278_vm3, %v8805_v20, 0.0  ;;  %v3689_v41 = vpop.permute.xlu1 %3688 }
0x1561   : > { %v3777_v29 = vsel %vm1278_vm3, %v3689_v41, 0.0 }
0x1564   : > { %3682 = vrot.lane.b32.xlu0 %v3213_v46, %s10058_s11  ;;  %v3756_v46 = vsel %vm1278_vm3, %v3675_v58, 0.0 }
0x1568   : > { %3680 = vrot.lane.b32.xlu0 %v3212_v49, %s10058_s11 }
0x156c   : > { %3684 = vrot.lane.b32.xlu0 %v3214_v50, %s10058_s11  ;;  %v3687_v50 = vpop.permute.xlu1 %3686 }
0x1570   : > { %3694 = vrot.lane.b32.xlu0 %v3219_v53, %s10058_s11  ;;  %v3691_v42 = vpop.permute.xlu1 %3690 }
0x1574   : > { %3692 = vrot.lane.b32.xlu0 %v3218_v54, %s10058_s11  ;;  %v3774_v54 = vsel %vm1278_vm3, %v3687_v50, 0.0 }
0x1578   : > { %3696 = vrot.lane.b32.xlu0 %v8906_v56, %s10058_s11 }
0x157c   : > { %3799 = vrot.lane.b32.xlu0 %v8917_v38, %s10058_s11 }
0x159b   : > { %3239 = vadd.xlane.f32.xlu0 %v3238_v43  ;;  %v3780_v43 = vsel %vm1278_vm3, %v3691_v42, 0.0 }
0x159f   : > { %3224 = vadd.xlane.f32.xlu0 %v3223_v44 }
0x15a3   : > { %3233 = vadd.xlane.f32.xlu0 %v3232_v63  ;;  %v3701_v63 = vpop.permute.xlu1 %3700 }
0x15a7   : > { %3248 = vadd.xlane.f32.xlu0 %v3247_v59 }
0x15ab   : > { %3245 = vadd.xlane.f32.xlu0 %v3244_v5  ;;  %v3795_v5 = vsel %vm1278_vm3, %v3701_v63, 0.0 }
0x15af   : > { %3251 = vadd.xlane.f32.xlu0 %v3250_v40 }
0x15b3   : > { %3266 = vadd.xlane.f32.xlu0 %v3265_v8 }
0x15b7   : > { %3263 = vadd.xlane.f32.xlu0 %v3262_v60 }
0x15ba   : > { %v3905_v2 = vpop.permute.xlu0 %3904 }
0x15bb   : > { %7458 = vmatpush3.xpose.msk.msra.mxu1 %vm1278_vm3, %v3905_v2 }
0x15bc   : > { %7678 = vmatprep.subr.bf16.mxu1 %v7888_v3 }
0x15be   : > { %v3659_v9 = vpop.permute.xlu0 %3658  ;;  %7460 = vmatmul.mubr.msk.f32.vlgmr.msra.gmra.mrb[20].mxu1 %vm1278_vm3, %v8827_v17  ;;  %v3283_v17 = vsel %vm1278_vm3, %v3219_v53, 0.0 }
0x15bf   : > { %v3732_v11 = vsel %vm1278_vm3, %v3659_v9, 0.0  ;;  %7471 = vmatprep.mubr.msk.f32.mxu1 %vm7889_vm0, %v7890_v6  ;;  %v3300_v9 = vsel %vm1278_vm3, %v8917_v38, 0.0 }
0x15c0   : > { %3733 = vadd.xlane.f32.xlu0 %v3732_v11  ;;  %v3699_v11 = vpop.permute.xlu1 %3698 }
0x15c1   : > { %v3792_v51 = vsel %vm1278_vm3, %v3699_v11, 0.0 }
0x15c2   : > { %v3655_v15 = vpop.permute.xlu0 %3654 }
0x15c3   : > { %v3726_v13 = vsel %vm1278_vm3, %v3655_v15, 0.0 }
0x15c4   : > { %3727 = vadd.xlane.f32.xlu1 %v3726_v13  ;;  %3269 = vadd.xlane.f32.xlu0 %v3268_v27  ;;  %v3231_v15 = vpop.xlane.xlu1 %3230 }
0x15c6   : > { %v3661_v23 = vpop.permute.xlu0 %3660 }
0x15c7   : > { %v3735_v36 = vsel %vm1278_vm3, %v3661_v23, 0.0 }
0x15c8   : > { %3736 = vadd.xlane.f32.xlu1 %v3735_v36  ;;  %3284 = vadd.xlane.f32.xlu0 %v3283_v17  ;;  %v8973_v27 = vpop.xlane.xlu1 %3227 }
0x15ca   : > { %v3671_v12 = vpop.permute.xlu0 %3670 }
0x15cb   : > { %v3750_v4 = vsel %vm1278_vm3, %v3671_v12, 0.0 }
0x15cc   : > { %3751 = vadd.xlane.f32.xlu1 %v3750_v4  ;;  %3730 = vadd.xlane.f32.xlu0 %v3729_v30  ;;  %v8975_v23 = vpop.xlane.xlu1 %3236 }
0x15ce   : > { %v3669_v7 = vpop.permute.xlu0 %3668 }
0x15cf   : > { %v3747_v28 = vsel %vm1278_vm3, %v3669_v7, 0.0 }
0x15d0   : > { %3281 = vadd.xlane.f32.xlu1 %v3280_v10  ;;  %3739 = vadd.xlane.f32.xlu0 %v3738_v39  ;;  %v8977_v17 = vpop.xlane.xlu1 %3242 }
0x15d2   : > { %v3673_v33 = vpop.permute.xlu0 %3672 }
0x15d3   : > { %v3753_v26 = vsel %vm1278_vm3, %v3673_v33, 0.0 }
0x15d4   : > { %3745 = vadd.xlane.f32.xlu1 %v3744_v24  ;;  %3278 = vadd.xlane.f32.xlu0 %v3277_v16  ;;  %v3258_v38 = vpop.xlane.xlu1 %3257 }
0x15d6   : > { %v3683_v34 = vpop.permute.xlu0 %3682 }
0x15d7   : > { %v3768_v53 = vsel %vm1278_vm3, %v3683_v34, 0.0 }
0x15d8   : > { %3760 = vadd.xlane.f32.xlu1 %v3759_v55  ;;  %3293 = vadd.xlane.f32.xlu0 %v3292_v1  ;;  %v8983_v48 = vpop.xlane.xlu1 %3254 }
0x15da   : > { %v3681_v25 = vpop.permute.xlu0 %3680 }
0x15db   : > { %v3765_v32 = vsel %vm1278_vm3, %v3681_v25, 0.0 }
0x15dc   : > { %3290 = vadd.xlane.f32.xlu1 %v3289_v37  ;;  %3748 = vadd.xlane.f32.xlu0 %v3747_v28  ;;  %v8985_v10 = vpop.xlane.xlu1 %3260 }
0x15de   : > { %v3685_v49 = vpop.permute.xlu0 %3684 }
0x15df   : > { %v3771_v44 = vsel %vm1278_vm3, %v3685_v49, 0.0  ;;  %v3411_v49 = vrot.slane %v3231_v15, %v8372_v21 }
0x15e0   : > { %3757 = vadd.xlane.f32.xlu1 %v3756_v46  ;;  %3287 = vadd.xlane.f32.xlu0 %v3286_v18  ;;  %v3276_v58 = vpop.xlane.xlu1 %3275 }
0x15e2   : > { %v3695_v20 = vpop.permute.xlu0 %3694 }
0x15e3   : > { %v3786_v40 = vsel %vm1278_vm3, %v3695_v20, 0.0 }
0x15e4   : > { %3763 = vadd.xlane.f32.xlu1 %v3762_v47  ;;  %3754 = vadd.xlane.f32.xlu0 %v3753_v26  ;;  %v8989_v24 = vpop.xlane.xlu1 %3742 }
0x15e6   : > { %v3693_v56 = vpop.permute.xlu0 %3692 }
0x15e7   : > { %v3783_v60 = vsel %vm1278_vm3, %v3693_v56, 0.0 }
0x15e8   : > { %3778 = vadd.xlane.f32.xlu1 %v3777_v29  ;;  %3769 = vadd.xlane.f32.xlu0 %v3768_v53  ;;  %v8993_v34 = vpop.xlane.xlu1 %3272  ;;  %v3423_v53 = vrot.slane %v3258_v38, %v8372_v21 }
0x15ea   : > { %v3697_v59 = vpop.permute.xlu0 %3696 }
0x15eb   : > { %v3789_v8 = vsel %vm1278_vm3, %v3697_v59, 0.0 }
0x15ec   : > { %3775 = vadd.xlane.f32.xlu1 %v3774_v54  ;;  %3766 = vadd.xlane.f32.xlu0 %v3765_v32 }
0x15ee   : > { %v3800_v14 = vpop.permute.xlu0 %3799 }
0x15ef   : > { %v3802_v2 = vsel %vm1278_vm3, %v3800_v14, 0.0 }
0x15f0   : > { %3781 = vadd.xlane.f32.xlu1 %v3780_v43  ;;  %3772 = vadd.xlane.f32.xlu0 %v3771_v44  ;;  %v3431_v44 = vrot.slane %v3276_v58, %v8372_v21 }
0x15f4   : > { %3796 = vadd.xlane.f32.xlu1 %v3795_v5  ;;  %3787 = vadd.xlane.f32.xlu0 %v3786_v40 }
0x15f8   : > { %3790 = vadd.xlane.f32.xlu1 %v3789_v8  ;;  %3784 = vadd.xlane.f32.xlu0 %v3783_v60 }
0x15fc   : > { %3803 = vadd.xlane.f32.xlu1 %v3802_v2  ;;  %3301 = vadd.xlane.f32.xlu0 %v3300_v9 }
0x1600   : > { %3793 = vadd.xlane.f32.xlu0 %v3792_v51 }
0x161e   : > { %v3520_v13 = vpop.f32.mrb[18].mxu1 }
0x161f   : > { %v7451_v22 = vpop.f32.mrb[19].mxu1 }
0x1628   : > { %v3240_v36 = vpop.xlane.xlu0 %3239 }
0x1629   : > { %v3415_v46 = vrot.slane %v3240_v36, %v8372_v21 }
0x162b   : > { %v3440_v50 = vsel %vm1449_vm5, %v3415_v46, %v3411_v49 }
0x162c   : > { %v8979_v12 = vpop.xlane.xlu0 %3224 }
0x162d   : > { %v3322_v49 = vrot.slane %v8979_v12, %v8372_v21 }
0x1630   : > { %v8981_v4 = vpop.xlane.xlu0 %3233 }
0x1634   : > { %v3249_v30 = vpop.xlane.xlu0 %3248 }
0x1635   : > { %v3419_v18 = vrot.slane %v3249_v30, %v8372_v21 }
0x1637   : > { %v3441_v20 = vsel %vm1451_vm6, %v3419_v18, %v3440_v50  ;;  %v3335_v18 = vrot.slane %v8975_v23, %v8369_v19 }
0x1638   : > { %v3246_v7 = vpop.xlane.xlu0 %3245  ;;  %v3442_v32 = vsel %vm1453_vm7, %v3423_v53, %v3441_v20  ;;  %v3340_v20 = vrot.slane %v8977_v17, %v8372_v21 }
0x163c   : > { %v8987_v39 = vpop.xlane.xlu0 %3251 }
0x163d   : > { %v3349_v50 = vrot.slane %v8987_v39, %v8372_v21  ;;  %v3358_v39 = vrot.slane %v8985_v10, %v8372_v21 }
0x1640   : > { %v3267_v33 = vpop.xlane.xlu0 %3266 }
0x1641   : > { %v3427_v29 = vrot.slane %v3267_v33, %v8372_v21  ;;  %v3344_v33 = vrot.slane %v3246_v7, %v8369_v19  ;;  %v3353_v7 = vrot.slane %v8983_v48, %v8369_v19 }
0x1643   : > { %v3443_v56 = vsel %vm1455_vm8, %v3427_v29, %v3442_v32  ;;  %v3345_v53 = vsel %vm1384_vm4, %v3344_v33, %v3340_v20  ;;  %v3354_v17 = vsel %vm1384_vm4, %v3353_v7, %v3349_v50 }
0x1644   : > { %v8991_v16 = vpop.xlane.xlu0 %3263  ;;  %v3444_v5 = vsel %vm1457_vm9, %v3431_v44, %v3443_v56 }
0x1645   : > { %v3362_v23 = vrot.slane %v8991_v16, %v8369_v19  ;;  %v3371_v16 = vrot.slane %v8993_v34, %v8369_v19 }
0x1647   : > { %v3363_v10 = vsel %vm1384_vm4, %v3362_v23, %v3358_v39 }
0x164d   : > { %v8995_v55 = vpop.xlane.xlu0 %3733 }
0x164e   : > { %v3917_v56 = vrot.slane %v8995_v55, %v8372_v21 }
0x1651   : > { %v8997_v1 = vpop.xlane.xlu1 %3727  ;;  %v8999_v31 = vpop.xlane.xlu0 %3269 }
0x1655   : > { %v9001_v25 = vpop.xlane.xlu1 %3736  ;;  %v3285_v37 = vpop.xlane.xlu0 %3284 }
0x1656   : > { %v3435_v43 = vrot.slane %v3285_v37, %v8372_v21  ;;  %v3833_v33 = vrot.slane %v9001_v25, %v8372_v21 }
0x1658   : > { %v3445_v8 = vsel %vm1459_vm10, %v3435_v43, %v3444_v5  ;;  %v3921_v5 = vrot.slane %v8989_v24, %v8372_v21 }
0x1659   : > { %v9003_v28 = vpop.xlane.xlu1 %3751  ;;  %v9005_v41 = vpop.xlane.xlu0 %3730 }
0x165a   : > { %v3925_v34 = vrot.slane %v9003_v28, %v8372_v21  ;;  %v3946_v24 = vsel %vm1449_vm5, %v3921_v5, %v3917_v56 }
0x165c   : > { %v3947_v50 = vsel %vm1451_vm6, %v3925_v34, %v3946_v24 }
0x165d   : > { %v9010_v47 = vpop.xlane.xlu1 %3281  ;;  %v9012_v26 = vpop.xlane.xlu0 %3739 }
0x1661   : > { %v9018_v42 = vpop.xlane.xlu1 %3745  ;;  %v9020_v54 = vpop.xlane.xlu0 %3278 }
0x1665   : > { %v9026_v63 = vpop.xlane.xlu1 %3760  ;;  %v3294_v59 = vpop.xlane.xlu0 %3293 }
0x1666   : > { %v3439_v40 = vrot.slane %v3294_v59, %v8372_v21  ;;  %v3376_v59 = vrot.slane %v9020_v54, %v8372_v21 }
0x1668   : > { %v3446_v60 = vsel %vm1461_vm12, %v3439_v40, %v3445_v8 }
0x1669   : > { %v3291_v14 = vpop.xlane.xlu1 %3290  ;;  %v9032_v2 = vpop.xlane.xlu0 %3748  ;;  %v3521_v9 = vadd.f32 %v3520_v13, %v3446_v60  ;;  %v3331_v13 = vrot.slane %v8981_v4, %v8372_v21  ;;  %v3326_v4 = vrot.slane %v8973_v27, %v8369_v19  ;;  %v3367_v27 = vrot.slane %v8999_v31, %v8372_v21 }
0x166a   : > { %v3828_v60 = vrot.slane %v9005_v41, %v8369_v19  ;;  %v3929_v41 = vrot.slane %v9026_v63, %v8372_v21  ;;  %v3842_v63 = vrot.slane %v9018_v42, %v8372_v21 }
0x166b   : > { %v9035_v11 = vadd.f32 %v3521_v9, %v8427_v0  ;;  %v3336_v29 = vsel %vm1384_vm4, %v3335_v18, %v3331_v13  ;;  %v3327_v32 = vsel %vm1384_vm4, %v3326_v4, %v3322_v49  ;;  %v3372_v55 = vsel %vm1384_vm4, %v3371_v16, %v3367_v27 }
0x166c   : > { %v3391_v48 = vsel %vm1449_vm5, %v3336_v29, %v3327_v32  ;;  %v3380_v9 = vrot.slane %v9010_v47, %v8369_v19  ;;  %v3824_v13 = vrot.slane %v8997_v1, %v8372_v21  ;;  %v3846_v47 = vrot.slane %v9032_v2, %v8369_v19 }
0x166d   : > { %v9037_v51 = vpop.xlane.xlu1 %3757  ;;  %v3288_v15 = vpop.xlane.xlu0 %3287  ;;  %v3528_v22 = vsel %vm1278_vm3, %v9035_v11, -inf  ;;  %v3392_v44 = vsel %vm1451_vm6, %v3345_v53, %v3391_v48  ;;  %v3948_v29 = vsel %vm1453_vm7, %v3929_v41, %v3947_v50 }
0x166e   : > { %3529 = vmax.xlane.f32.xlu1 %v3528_v22  ;;  %v3393_v31 = vsel %vm1453_vm7, %v3354_v17, %v3392_v44  ;;  %v3385_v40 = vrot.slane %v3288_v15, %v8372_v21  ;;  %v3837_v22 = vrot.slane %v9012_v26, %v8369_v19  ;;  %v3389_v15 = vrot.slane %v3291_v14, %v8369_v19 }
0x166f   : > { %v3394_v54 = vsel %vm1455_vm8, %v3363_v10, %v3393_v31  ;;  %v3381_v28 = vsel %vm1384_vm4, %v3380_v9, %v3376_v59  ;;  %v3829_v20 = vsel %vm1384_vm4, %v3828_v60, %v3824_v13  ;;  %v3847_v23 = vsel %vm1384_vm4, %v3846_v47, %v3842_v63 }
0x1670   : > { %v3390_v14 = vsel %vm1384_vm4, %v3389_v15, %v3385_v40  ;;  %v3395_v1 = vsel %vm1457_vm9, %v3372_v55, %v3394_v54  ;;  %v3838_v25 = vsel %vm1384_vm4, %v3837_v22, %v3833_v33 }
0x1671   : > { %v9041_v36 = vpop.xlane.xlu1 %3763  ;;  %v9043_v38 = vpop.xlane.xlu0 %3754  ;;  %v3396_v7 = vsel %vm1459_vm10, %v3381_v28, %v3395_v1  ;;  %v3893_v56 = vsel %vm1449_vm5, %v3838_v25, %v3829_v20 }
0x1672   : > { %v3851_v18 = vrot.slane %v9043_v38, %v8372_v21  ;;  %v3855_v38 = vrot.slane %v9037_v51, %v8369_v19  ;;  %v3397_v42 = vsel %vm1461_vm12, %v3390_v14, %v3396_v7 }
0x1674   : > { %v3856_v39 = vsel %vm1384_vm4, %v3855_v38, %v3851_v18 }
0x1675   : > { %v9045_v30 = vpop.xlane.xlu1 %3778  ;;  %v9047_v58 = vpop.xlane.xlu0 %3769 }
0x1676   : > { %v3933_v2 = vrot.slane %v9047_v58, %v8372_v21  ;;  %v3860_v58 = vrot.slane %v9041_v36, %v8372_v21  ;;  %v3937_v51 = vrot.slane %v9045_v30, %v8372_v21  ;;  %v3894_v30 = vsel %vm1451_vm6, %v3847_v23, %v3893_v56 }
0x1677   : > { %v3895_v5 = vsel %vm1453_vm7, %v3856_v39, %v3894_v30 }
0x1678   : > { %v3949_v17 = vsel %vm1455_vm8, %v3933_v2, %v3948_v29 }
0x1679   : > { %v9052_v37 = vpop.xlane.xlu1 %3775  ;;  %v9054_v46 = vpop.xlane.xlu0 %3766 }
0x167a   : > { %v3864_v4 = vrot.slane %v9054_v46, %v8369_v19  ;;  %v3873_v27 = vrot.slane %v9052_v37, %v8369_v19 }
0x167c   : > { %v3865_v36 = vsel %vm1384_vm4, %v3864_v4, %v3860_v58 }
0x167d   : > { %v3773_v12 = vpop.xlane.xlu0 %3772  ;;  %v3782_v43 = vpop.xlane.xlu1 %3781  ;;  %v3896_v55 = vsel %vm1455_vm8, %v3865_v36, %v3895_v5 }
0x167e   : > { %v3869_v53 = vrot.slane %v3773_v12, %v8372_v21  ;;  %v3878_v16 = vrot.slane %v3782_v43, %v8372_v21 }
0x1680   : > { %v3874_v10 = vsel %vm1384_vm4, %v3873_v27, %v3869_v53 }
0x1681   : > { %v3788_v8 = vpop.xlane.xlu0 %3787  ;;  %v3797_v26 = vpop.xlane.xlu1 %3796  ;;  %v3897_v9 = vsel %vm1457_vm9, %v3874_v10, %v3896_v55  ;;  %v7082_v10 = vld [vmem:[%s10052_s15 + $0x10] sm:$0xff] }
0x1682   : > { %v3941_v12 = vrot.slane %v3788_v8, %v8372_v21  ;;  %v3945_v37 = vrot.slane %v3797_v26, %v8372_v21  ;;  %v3950_v8 = vsel %vm1457_vm9, %v3937_v51, %v3949_v17 }
0x1684   : > { %v3951_v60 = vsel %vm1459_vm10, %v3941_v12, %v3950_v8 }
0x1685   : > { %v3785_v49 = vpop.xlane.xlu0 %3784  ;;  %v3791_v44 = vpop.xlane.xlu1 %3790  ;;  %v3952_v15 = vsel %vm1461_vm12, %v3945_v37, %v3951_v60 }
0x1686   : > { %v3882_v46 = vrot.slane %v3785_v49, %v8369_v19  ;;  %v3887_v43 = vrot.slane %v3791_v44, %v8372_v21 }
0x1688   : > { %v3883_v31 = vsel %vm1384_vm4, %v3882_v46, %v3878_v16 }
0x1689   : > { %v3302_v32 = vpop.xlane.xlu0 %3301  ;;  %v3898_v24 = vsel %vm1459_vm10, %v3883_v31, %v3897_v9  ;;  %v3804_v22 = vpop.xlane.xlu1 %3803 }
0x168a   : > { %v3399_v48 = vadd.f32 %v3397_v42, %v3302_v32 }
0x168c   : > { %v3525_v59 = vsel %vm938_vm2, %v3399_v48, -inf }
0x168d   : > { %3526 = vmax.xlane.f32.xlu0 %v3525_v59  ;;  %v3794_v40 = vpop.xlane.xlu0 %3793  ;;  %v7083_v59 = vld [vmem:[%s10052_s15 + $0x18] sm:$0xff]  ;;  %s10061_s15 = sld [smem:[#allocation15_spill]] }
0x168e   : > { %v3891_v34 = vrot.slane %v3794_v40, %v8369_v19  ;;  %v7679_v5 = vpack.c.bf16 %v7083_v59, %v7082_v10 }
0x1690   : > { %v3892_v54 = vsel %vm1384_vm4, %v3891_v34, %v3887_v43  ;;  %7680 = vmatpush3.bf16.msra.mxu1 %v7679_v5 }
0x1691   : > { %v4024_v13 = vpop.f32.mrb[20].mxu1  ;;  %v3899_v28 = vsel %vm1461_vm12, %v3892_v54, %v3898_v24  ;;  %7687 = vmatprep.subr.bf16.mxu1 %v7888_v3 }
0x1692   : > { %v4025_v41 = vadd.f32 %v4024_v13, %v3952_v15  ;;  %v7461_v47 = vpop.f32.mrb[21].mxu1  ;;  %v3901_v33 = vadd.f32 %v3899_v28, %v3804_v22  ;;  %v7086_v15 = vld [vmem:[%s9979_s21 + $0x40] sm:$0xff]  ;;  %v7087_v13 = vld [vmem:[%s9979_s21 + $0x48] sm:$0xff] }
0x1693   : > { %v7682_v28 = vpack.c.bf16 %v7087_v13, %v7086_v15 }
0x1694   : > { %v4028_v18 = vadd.f32 %v4025_v41, %v8427_v0  ;;  %v4029_v26 = vsel %vm938_vm2, %v3901_v33, -inf }
0x1695   : > { %4030 = vmax.xlane.f32.xlu0 %v4029_v26 }
0x1696   : > { %v4032_v49 = vsel %vm1278_vm3, %v4028_v18, -inf }
0x1697   : > { %4033 = vmax.xlane.f32.xlu1 %v4032_v49  ;;  %v7088_v49 = vld [vmem:[%s9979_s21 + $0x50] sm:$0xff] }
0x16a8   : > { %4050 = vrot.lane.b32.xlu1 %v8840_v45, %s10059_s26 }
0x16ab   : > { %3546 = vrot.lane.b32.xlu0 %v8840_v45, %s10053_s8 }
0x16fb   : > { %v3530_v14 = vpop.xlane.xlu1 %3529 }
0x171a   : > { %v3527_v1 = vpop.xlane.xlu0 %3526 }
0x171b   : > { %v3531_v50 = vmax.f32 %v3527_v1, %v3530_v14  ;;  %v7089_v14 = vld [vmem:[%s9979_s21 + $0x58] sm:$0xff] }
0x171c   : > { %v7685_v1 = vpack.c.bf16 %v7089_v14, %v7088_v49 }
0x171d   : > { %v3535_v20 = vsub.f32 %v9035_v11, %v3531_v50  ;;  %v3532_v4 = vsub.f32 %v3399_v48, %v3531_v50  ;;  %v7094_v50 = vld [vmem:[%s9981_s23 + $0x2] ss:$0 sm:$0xff] }
0x171f   : > { %v3536_v63 = vmul.f32 1.442695, %v3535_v20  ;;  %v3533_v45 = vmul.f32 1.442695, %v3532_v4  ;;  %v7084_v20 = vld [vmem:[%s9974_s16 + $0x1] ss:$0 sm:$0xff] }
0x1721   : > { %7806 = vpow2.f32 %v3536_v63 }
0x1722   : > { %v4031_v2 = vpop.xlane.xlu0 %4030 }
0x1724   : > { %v4034_v25 = vpop.xlane.xlu1 %4033 }
0x1725   : > { %v4035_v38 = vmax.f32 %v4031_v2, %v4034_v25 }
0x1726   : > { %v3547_v7 = vpop.permute.xlu0 %3546 }
0x1727   : > { %v4036_v29 = vsub.f32 %v3901_v33, %v4035_v38  ;;  %v4039_v23 = vsub.f32 %v4028_v18, %v4035_v38  ;;  %7453 = vmatpush3.msra.mxu0 %v3547_v7  ;;  %v7090_v7 = vld [vmem:[%s9980_s22 + $0x20] sm:$0xff] }
0x1728   : > { %7462 = vmatprep.subr.mxu0 %v7890_v6  ;;  %v4051_v39 = vpop.permute.xlu1 %4050 }
0x1729   : > { %v4037_v53 = vmul.f32 1.442695, %v4036_v29  ;;  %v4040_v42 = vmul.f32 1.442695, %v4039_v23  ;;  %v7091_v29 = vld [vmem:[%s9980_s22 + $0x28] sm:$0xff] }
0x172a   : > { %v7688_v23 = vpack.c.bf16 %v7091_v29, %v7090_v7 }
0x172b   : > { %7808 = vpow2.f32 %v4037_v53  ;;  %v7807_v58 = vpop.eup %7806 }
0x172c   : > { %7810 = vpow2.f32 %v4040_v42  ;;  %7455 = vmatmul.mubr.msk.f32.vlgmr.msra.gmra.mrb[14].mxu0 %vm1278_vm3, %v7807_v58  ;;  %v3541_v27 = vsel %vm1278_vm3, %v7807_v58, 0.0 }
0x172d   : > { %7812 = vpow2.f32 %v3533_v45  ;;  %7463 = vmatpush3.msra.mxu0 %v4051_v39  ;;  %7464 = vmatprep.mubr.msk.f32.mxu0 %vm7889_vm0, %v7890_v6 }
0x172e   : > { %7681 = vmatprep.subr.bf16.mxu0 %v7888_v3 }
0x1735   : > { %v7809_v11 = vpop.eup %7808 }
0x1736   : > { %v7811_v51 = vpop.eup %7810  ;;  %v4042_v46 = vsel %vm938_vm2, %v7809_v11, 0.0 }
0x1737   : > { %7465 = vmatmul.mubr.msk.f32.vlgmr.msra.gmra.mrb[16].mxu0 %vm1278_vm3, %v7811_v51  ;;  %v4045_v32 = vsel %vm1278_vm3, %v7811_v51, 0.0  ;;  %4043 = vadd.xlane.f32.xlu1 %v4042_v46  ;;  %v7813_v17 = vpop.eup %7812 }
0x1738   : > { %4046 = vadd.xlane.f32.xlu0 %v4045_v32  ;;  %7482 = vmatprep.mubr.msk.f32.mxu0 %vm7889_vm0, %v7890_v6  ;;  %v3538_v12 = vsel %vm938_vm2, %v7813_v17, 0.0 }
0x1739   : > { %7683 = vmatpush3.bf16.msra.mxu0 %v7682_v28 }
0x173a   : > { %7684 = vmatprep.subr.bf16.mxu0 %v7888_v3 }
0x173b   : > { %3542 = vadd.xlane.f32.xlu1 %v3541_v27 }
0x173c   : > { %3539 = vadd.xlane.f32.xlu0 %v3538_v12 }
0x173d   : > { %7686 = vmatpush3.bf16.msra.mxu0 %v7685_v1  ;;  %v7103_v1 = vld [vmem:[%s9977_s19 + $0x10] sm:$0xff] }
0x173e   : > { %7693 = vmatprep.subr.bf16.mxu0 %v7888_v3 }
0x17c4   : > { %v4044_v48 = vpop.xlane.xlu1 %4043 }
0x17c5   : > { %v4047_v56 = vpop.xlane.xlu0 %4046 }
0x17c6   : > { %v4048_v36 = vadd.f32 %v4047_v56, %v4044_v48 }
0x17c8   : > { %7814 = vrcp.f32 %v4048_v36  ;;  %v3543_v16 = vpop.xlane.xlu1 %3542 }
0x17c9   : > { %v3540_v44 = vpop.xlane.xlu0 %3539 }
0x17ca   : > { %v3544_v30 = vadd.f32 %v3543_v16, %v3540_v44 }
0x17cc   : > { %7816 = vrcp.f32 %v3544_v30 }
0x17d2   : > { %v7815_v37 = vpop.eup %7814 }
0x17d3   : > { %v4127_v31 = vmul.f32 %v7815_v37, %v4044_v48 }
0x17d5   : > { %v4128_v40 = vmul.f32 %v8911_v61, %v4127_v31 }
0x17d6   : > { %v7817_v8 = vpop.eup %7816 }
0x17d7   : > { %v3623_v55 = vmul.f32 %v7817_v8, %v3540_v44  ;;  %4130 = vrot.lane.b32.xlu0 %v4128_v40, %s10059_s26  ;;  %s10066_s26 = sld [smem:[#allocation20_spill]] }
0x17d9   : > { %v3624_v43 = vmul.f32 %v8911_v61, %v3623_v55 }
0x17db   : > { %3626 = vrot.lane.b32.xlu1 %v3624_v43, %s10053_s8 }
0x17ff   : > { %v3618_v34 = vpop.f32.mrb[14].mxu0 }
0x1800   : > { %v3622_v60 = vmul.f32 %v7817_v8, %v3618_v34  ;;  %v7456_v9 = vpop.f32.mrb[15].mxu0  ;;  %v7097_v8 = vld [vmem:[%s10054_s0 + $0x1] ss:$0 sm:$0xff] }
0x180a   : > { %v4122_v54 = vpop.f32.mrb[16].mxu0 }
0x180b   : > { %v4126_v24 = vmul.f32 %v7815_v37, %v4122_v54  ;;  %v7466_v22 = vpop.f32.mrb[17].mxu0  ;;  %v7098_v54 = vld [vmem:[%s10055_s6 + $0x1] ss:$0 sm:$0xff] }
0x180c   : > { %v7100_v22 = vld [vmem:[%s9975_s17 + $0x18] sm:$0xff] }
0x1849   : > { %v4131_v61 = vpop.permute.xlu0 %4130 }
0x184a   : > { %v4133_v41 = vadd.f32 %v4131_v61, %v4126_v24  ;;  %v7099_v24 = vld [vmem:[%s9975_s17 + $0x10] sm:$0xff] }
0x184b   : > { %v7691_v15 = vpack.c.bf16 %v7100_v22, %v7099_v24 }
0x184c   : > { %4135 = vrot.lane.b32.xlu1 %v4133_v41, %s10060_s27  ;;  %s10069_s27 = sld [smem:[#allocation3_spill]] }
0x184d   : > { %v3627_v47 = vpop.permute.xlu1 %3626 }
0x184e   : > { %v3629_v33 = vadd.f32 %v3627_v47, %v3622_v60 }
0x1850   : > { %4315 = vrot.lane.b32.xlu1 %v7094_v50, %s10056_s25  ;;  %v7104_v50 = vld [vmem:[%s9977_s19 + $0x18] sm:$0xff] }
0x1852   : > { %s10070_s5 = sshll.u32 %s10069_s27, 3 }
0x18be   : > { %v4136_v18 = vpop.permute.xlu1 %4135 }
0x18bf   : > { %v4138_v26 = vsel %vm1278_vm3, %v3629_v33, %v4136_v18 }
0x18c0   : > { %7472 = vmatmul.mubr.msk.f32.vlgmr.msra.gmra.mrb[22].mxu1 %vm938_vm2, %v4138_v26 }
0x18c1   : > { %7489 = vmatprep.mubr.msk.f32.mxu1 %vm7889_vm0, %v7890_v6  ;;  %7689 = vmatpush3.bf16.msra.mxu1 %v7688_v23 }
0x18c2   : > { %7690 = vmatprep.subr.bf16.mxu1 %v7888_v3  ;;  %v4316_v48 = vpop.permute.xlu1 %4315 }
0x1993   : > { %v4216_v63 = vpop.f32.mrb[22].mxu1 }
0x1994   : > { %v4217_v2 = vadd.f32 %v7084_v20, %v4216_v63  ;;  %v7473_v25 = vpop.f32.mrb[23].mxu1  ;;  %v7694_v20 = vpack.c.bf16 %v7104_v50, %v7103_v1  ;;  %v7107_v63 = vld [vmem:[%s9979_s21 + $0x60] sm:$0xff] }
0x1996   : > { %v4220_v38 = vmax.f32 %v4217_v2, 0.0  ;;  %v7108_v2 = vld [vmem:[%s9979_s21 + $0x68] sm:$0xff] }
0x1997   : > { %v7697_v25 = vpack.c.bf16 %v7108_v2, %v7107_v63 }
0x1998   : > { %v4230_v4 = vsel %vm938_vm2, %v4220_v38, %v8667_v35  ;;  %v7101_v38 = vld [vmem:[%s9976_s18 + $0x1] ss:$0 sm:$0xff] }
0x1999   : > { %7483 = vmatmul.mubr.msk.f32.vlgmr.msra.gmra.mrb[18].mxu0 %vm853_vm1, %v4230_v4 }
0x199a   : > { %7503 = vmatprep.mubr.msk.f32.mxu0 %vm7889_vm0, %v7890_v6  ;;  %7695 = vmatpush3.bf16.msra.mxu0 %v7694_v20  ;;  %v7126_v20 = vld [vmem:[%s9971_s13 + $0x2] ss:$0 sm:$0xff] }
0x199b   : > { %7702 = vmatprep.subr.bf16.mxu0 %v7888_v3 }
0x1a6c   : > { %v4300_v53 = vpop.f32.mrb[18].mxu0 }
0x1a6d   : > { %v7093_v42 = vmul.f32 -1.442695, %v4300_v53  ;;  %v7484_v45 = vpop.f32.mrb[19].mxu0  ;;  %v4318_v56 = vsub.f32 %v4300_v53, %v4316_v48 }
0x1a6f   : > { %7818 = vpow2.f32 %v7093_v42  ;;  %v7095_v36 = vmul.f32 -1.442695, %v4318_v56  ;;  %v7110_v42 = vld [vmem:[%s9979_s21 + $0x78] sm:$0xff] }
0x1a79   : > { %v7819_v58 = vpop.eup %7818 }
0x1a7a   : > { %v4307_v39 = vadd.f32 1.0, %v7819_v58  ;;  %v7115_v58 = vld [vmem:[%s9981_s23 + $0x3] ss:$0 sm:$0xff] }
0x1a7c   : > { %7820 = vrcp.f32 %v4307_v39  ;;  %v7105_v39 = vld [vmem:[%s9978_s20 + $0x1] ss:$0 sm:$0xff] }
0x1a86   : > { %v7821_v11 = vpop.eup %7820 }
0x1a87   : > { %v4325_v51 = vmul.f32 %v7821_v11, %v8671_v62 }
0x1a89   : > { %7490 = vmatmul.mubr.msk.f32.vlgmr.msra.gmra.mrb[24].mxu1 %vm938_vm2, %v4325_v51 }
0x1a8a   : > { %7496 = vmatprep.mubr.msk.f32.mxu1 %vm7889_vm0, %v7890_v6  ;;  %7692 = vmatpush3.bf16.msra.mxu1 %v7691_v15 }
0x1a8b   : > { %7696 = vmatprep.subr.bf16.mxu1 %v7888_v3 }
0x1b5c   : > { %v4395_v46 = vpop.f32.mrb[24].mxu1 }
0x1b5d   : > { %4400 = vrot.lane.b32.xlu0 %v4395_v46, %s10057_s24  ;;  %v7491_v32 = vpop.f32.mrb[25].mxu1 }
0x1bcf   : > { %v4401_v17 = vpop.permute.xlu0 %4400 }
0x1bd0   : > { %v4403_v27 = vadd.f32 %v4401_v17, %v4300_v53  ;;  %v7109_v53 = vld [vmem:[%s9979_s21 + $0x70] sm:$0xff] }
0x1bd1   : > { %v7700_v45 = vpack.c.bf16 %v7110_v42, %v7109_v53  ;;  %v7119_v53 = vld [vmem:[%s10046_s7 + $0x2] ss:$0 sm:$0xff]  ;;  %v7879_v42 = vld [vmem:[%s10048_s1] ss:$0 sm:$0xff] }
0x1bd2   : > { %7822 = vtanh.f32 %v4403_v27  ;;  %v7111_v27 = vld [vmem:[%s9980_s22 + $0x30] sm:$0xff] }
0x1bd3   : > { %7824 = vpow2.f32 %v7095_v36 }
0x1bdc   : > { %v7823_v12 = vpop.eup %7822 }
0x1bdd   : > { %4408 = vrot.lane.b32.xlu0 %v7823_v12, %s10053_s8  ;;  %v7825_v62 = vpop.eup %7824  ;;  %v7112_v12 = vld [vmem:[%s9980_s22 + $0x38] sm:$0xff] }
0x1bde   : > { %v4322_v16 = vadd.f32 1.0, %v7825_v62  ;;  %v7703_v48 = vpack.c.bf16 %v7112_v12, %v7111_v27  ;;  %v7129_v27 = vld [vmem:[%s9972_s14 + $0x188] sm:$0xff] }
0x1be0   : > { %7826 = vrcp.f32 %v4322_v16 }
0x1bea   : > { %v7827_v44 = vpop.eup %7826 }
0x1beb   : > { %v4405_v30 = vsub.f32 1.0, %v7827_v44 }
0x1bed   : > { %v4406_v59 = vmul.f32 %v4405_v30, %v8667_v35 }
0x1c4f   : > { %v4409_v10 = vpop.permute.xlu0 %4408 }
0x1c50   : > { %v4411_v5 = vmul.f32 %v7827_v44, %v4409_v10 }
0x1c52   : > { %v9237_v37 = vadd.f32 %v4411_v5, %v4406_v59 }
0x1c54   : > { %4416 = vrot.lane.b32.xlu1 %v9237_v37, %s10053_s8 }
0x1cc6   : > { %v9241_v31 = vpop.permute.xlu1 %4416 }
0x1cc7   : > { %v4419_v40 = vsel %vm938_vm2, %v9241_v31, 0.0 }
0x1cc8   : > { %4420 = vadd.xlane.f32.xlu0 %v4419_v40 }
0x1cde   : > { %4441 = vrot.lane.b32.xlu0 %v7097_v8, %s10056_s25 }
0x1d55   : > { %v4421_v55 = vpop.xlane.xlu0 %4420 }
0x1d56   : > { %v4422_v35 = vmul.f32 0.0625, %v4421_v55  ;;  %v7124_v55 = vld [vmem:[%s10045_s10 + $0x20] sm:$0xff] }
0x1d58   : > { %v4423_v43 = vsub.f32 %v9237_v37, %v4422_v35 }
0x1d59   : > { %v4442_v47 = vpop.permute.xlu0 %4441 }
0x1d5a   : > { %v4424_v34 = vmul.f32 %v4423_v43, %v4423_v43 }
0x1d5c   : > { %4426 = vrot.lane.b32.xlu1 %v4424_v34, %s10053_s8 }
0x1dce   : > { %v4427_v60 = vpop.permute.xlu1 %4426 }
0x1dcf   : > { %v4429_v9 = vsel %vm938_vm2, %v4427_v60, 0.0 }
0x1dd0   : > { %4430 = vadd.xlane.f32.xlu1 %v4429_v9 }
0x1de1   : > { %4450 = vrot.lane.b32.xlu1 %v7098_v54, %s10056_s25 }
0x1de5   : > { %4714 = vrot.lane.b32.xlu1 %v7115_v58, %s10056_s25 }
0x1e5d   : > { %v4431_v13 = vpop.xlane.xlu1 %4430 }
0x1e5e   : > { %v4432_v28 = vmul.f32 0.0625, %v4431_v13 }
0x1e60   : > { %v4433_v61 = vadd.f32 1e-05, %v4432_v28 }
0x1e61   : > { %v4451_v18 = vpop.permute.xlu1 %4450 }
0x1e62   : > { %7828 = vrsqrt.f32 %v4433_v61 }
0x1e65   : > { %v4715_v34 = vpop.permute.xlu1 %4714 }
0x1e6c   : > { %v7829_v41 = vpop.eup %7828 }
0x1e6d   : > { %v4435_v33 = vmul.f32 %v7829_v41, %v4423_v43 }
0x1e6f   : > { %v4444_v26 = vmul.f32 %v4442_v47, %v4435_v33 }
0x1e71   : > { %v4453_v49 = vadd.f32 %v4451_v18, %v4444_v26 }
0x1e73   : > { %4463 = vrot.lane.b32.xlu0 %v4453_v49, %s10053_s8 }
0x1ee5   : > { %v4464_v14 = vpop.permute.xlu0 %4463 }
0x1ee6   : > { %7497 = vmatmul.mubr.msk.f32.vlgmr.msra.gmra.mrb[26].mxu1 %vm938_vm2, %v4464_v14  ;;  %v7118_v14 = vld [vmem:[%s10044_s9 + $0x2] ss:$0 sm:$0xff] }
0x1ee7   : > { %7514 = vmatprep.mubr.msk.f32.mxu1 %vm7889_vm0, %v7890_v6  ;;  %7698 = vmatpush3.bf16.msra.mxu1 %v7697_v25  ;;  %v7878_v25 = vld [vmem:[%s10050_s28] ss:$0 sm:$0xff] }
0x1ee8   : > { %7699 = vmatprep.subr.bf16.mxu1 %v7888_v3 }
0x1eeb   : > { %7701 = vmatpush3.bf16.msra.mxu1 %v7700_v45 }
0x1eec   : > { %7708 = vmatprep.subr.bf16.mxu1 %v7888_v3 }
0x1fb9   : > { %v4533_v4 = vpop.f32.mrb[26].mxu1 }
0x1fba   : > { %v4534_v7 = vadd.f32 %v7101_v38, %v4533_v4  ;;  %v7498_v29 = vpop.f32.mrb[27].mxu1 }
0x1fbc   : > { %v4537_v23 = vmax.f32 %v4534_v7, 0.0 }
0x1fbe   : > { %7504 = vmatmul.mubr.msk.f32.vlgmr.msra.gmra.mrb[20].mxu0 %vm938_vm2, %v4537_v23 }
0x1fbf   : > { %7521 = vmatprep.mubr.msk.f32.mxu0 %vm7889_vm0, %v7890_v6  ;;  %7704 = vmatpush3.bf16.msra.mxu0 %v7703_v48 }
0x1fc0   : > { %7705 = vmatprep.subr.bf16.mxu0 %v7888_v3 }
0x2091   : > { %v4615_v11 = vpop.f32.mrb[20].mxu0 }
0x2092   : > { %v4616_v51 = vadd.f32 %v7105_v39, %v4615_v11  ;;  %v7505_v46 = vpop.f32.mrb[21].mxu0 }
0x2093   : > { %v7133_v46 = vld [vmem:[%s9972_s14 + $0x1a8] sm:$0xff] }
0x2094   : > { %v4619_v32 = vmax.f32 %v4616_v51, 0.0 }
0x2096   : > { %v4629_v17 = vsel %vm938_vm2, %v4619_v32, %v9237_v37 }
0x2097   : > { %7515 = vmatmul.mubr.msk.f32.vlgmr.msra.gmra.mrb[28].mxu1 %vm853_vm1, %v4629_v17 }
0x2098   : > { %7535 = vmatprep.mubr.msk.f32.mxu1 %vm7889_vm0, %v7890_v6 }
0x216a   : > { %v4699_v56 = vpop.f32.mrb[28].mxu1 }
0x216b   : > { %v7114_v36 = vmul.f32 -1.442695, %v4699_v56  ;;  %v7516_v62 = vpop.f32.mrb[29].mxu1  ;;  %v4717_v60 = vsub.f32 %v4699_v56, %v4715_v34 }
0x216d   : > { %7830 = vpow2.f32 %v7114_v36  ;;  %v7116_v9 = vmul.f32 -1.442695, %v4717_v60 }
0x2177   : > { %v7831_v16 = vpop.eup %7830 }
0x2178   : > { %v4706_v44 = vadd.f32 1.0, %v7831_v16 }
0x217a   : > { %7832 = vrcp.f32 %v4706_v44 }
0x2184   : > { %v7833_v30 = vpop.eup %7832 }
0x2185   : > { %v4724_v10 = vmul.f32 %v7833_v30, %v9241_v31  ;;  %v7125_v31 = vld [vmem:[%s10045_s10 + $0x28] sm:$0xff]  ;;  %v7134_v30 = vld [vmem:[%s9972_s14 + $0x1b0] sm:$0xff] }
0x2186   : > { %v7709_v35 = vpack.c.bf16 %v7125_v31, %v7124_v55 }
0x2187   : > { %7522 = vmatmul.mubr.msk.f32.vlgmr.msra.gmra.mrb[22].mxu0 %vm938_vm2, %v4724_v10 }
0x2188   : > { %7528 = vmatprep.mubr.msk.f32.mxu0 %vm7889_vm0, %v7890_v6  ;;  %7710 = vmatpush3.bf16.msra.mxu1 %v7709_v35  ;;  %v7138_v35 = vld [vmem:[%s9972_s14 + $0x1d0] sm:$0xff] }
0x2189   : > { %7543 = vmatprep.subr.mxu1 %v7890_v6 }
0x225a   : > { %v4794_v59 = vpop.f32.mrb[22].mxu0 }
0x225b   : > { %4799 = vrot.lane.b32.xlu0 %v4794_v59, %s10057_s24  ;;  %v7523_v5 = vpop.f32.mrb[23].mxu0 }
0x22cd   : > { %v4800_v40 = vpop.permute.xlu0 %4799 }
0x22ce   : > { %v4802_v8 = vadd.f32 %v4800_v40, %v4699_v56  ;;  %v7132_v56 = vld [vmem:[%s9972_s14 + $0x1a0] sm:$0xff]  ;;  %v7139_v40 = vld [vmem:[%s9972_s14 + $0x1d8] sm:$0xff] }
0x22d0   : > { %7834 = vtanh.f32 %v4802_v8 }
0x22d1   : > { %7836 = vpow2.f32 %v7116_v9  ;;  %v7140_v9 = vld [vmem:[%s9972_s14 + $0x1e0] sm:$0xff] }
0x22da   : > { %v7835_v43 = vpop.eup %7834 }
0x22db   : > { %4807 = vrot.lane.b32.xlu0 %v7835_v43, %s10053_s8  ;;  %v7837_v54 = vpop.eup %7836 }
0x22dc   : > { %v4721_v24 = vadd.f32 1.0, %v7837_v54 }
0x22de   : > { %7838 = vrcp.f32 %v4721_v24 }
0x22e8   : > { %v7839_v22 = vpop.eup %7838 }
0x22e9   : > { %v4804_v15 = vsub.f32 1.0, %v7839_v22 }
0x22eb   : > { %v4805_v28 = vmul.f32 %v4804_v15, %v9237_v37 }
0x234d   : > { %v4808_v13 = vpop.permute.xlu0 %4807 }
0x234e   : > { %v4810_v61 = vmul.f32 %v7839_v22, %v4808_v13  ;;  %v7144_v13 = vld [vmem:[%s9972_s14 + $0x200] sm:$0xff] }
0x2350   : > { %v9327_v41 = vadd.f32 %v4810_v61, %v4805_v28 }
0x2352   : > { %4815 = vrot.lane.b32.xlu1 %v9327_v41, %s10053_s8 }
0x23c4   : > { %v9331_v47 = vpop.permute.xlu1 %4815 }
0x23c5   : > { %7536 = vmatmul.mubr.msk.f32.vlgmr.msra.gmra.mrb[30].mxu1 %vm938_vm2, %v9331_v47  ;;  %v4818_v33 = vsel %vm938_vm2, %v9331_v47, 0.0 }
0x23c6   : > { %4819 = vadd.xlane.f32.xlu0 %v4818_v33  ;;  %7545 = vmatprep.mubr.msk.f32.mxu1 %vm7889_vm0, %v7890_v6 }
0x23dc   : > { %4840 = vrot.lane.b32.xlu0 %v7118_v14, %s10056_s25  ;;  %v7151_v14 = vld [vmem:[%s9972_s14 + $0x238] sm:$0xff] }
0x2453   : > { %v4820_v18 = vpop.xlane.xlu0 %4819 }
0x2454   : > { %v4821_v37 = vmul.f32 0.0625, %v4820_v18  ;;  %v7146_v18 = vld [vmem:[%s9972_s14 + $0x210] sm:$0xff] }
0x2456   : > { %v9340_v26 = vsub.f32 %v9327_v41, %v4821_v37 }
0x2458   : > { %v4823_v49 = vmul.f32 %v9340_v26, %v9340_v26 }
0x245a   : > { %4825 = vrot.lane.b32.xlu1 %v4823_v49, %s10053_s8 }
0x2498   : > { %v5012_v1 = vpop.f32.mrb[30].mxu1 }
0x2499   : > { %v7537_v50 = vpop.f32.mrb[31].mxu1  ;;  %v5013_v63 = vadd.f32 %v7126_v20, %v5012_v1  ;;  %v7130_v20 = vld [vmem:[%s9972_s14 + $0x190] sm:$0xff] }
0x249a   : > { %v7150_v50 = vld [vmem:[%s9972_s14 + $0x230] sm:$0xff] }
0x249b   : > { %v5018_v38 = vadd.f32 %v7878_v25, %v5013_v63  ;;  %v5016_v45 = vadd.f32 %v7879_v42, %v5013_v63 }
0x249d   : > { %v5019_v7 = vmul.f32 0.35355338, %v5018_v38  ;;  %v9365_v39 = vmul.f32 0.35355338, %v5016_v45 }
0x249f   : > { %v5054_v29 = vrot.slane %v5019_v7, %v8142_v52  ;;  %v5047_v36 = vcombine.high %v5019_v7, %v5019_v7 }
0x24a1   : > { %v5062_v23 = vcombine.high %v5054_v29, %v5054_v29  ;;  %v5070_v11 = vrot.slane %v5054_v29, %v8142_v52  ;;  %v5061_v10 = vrot.slane %v5047_v36, %v8142_v52 }
0x24a3   : > { %v5084_v58 = vrot.slane %v5062_v23, %v8142_v52  ;;  %v9377_v32 = vrot.slane %v5070_v11, %v8153_v57  ;;  %v5092_v12 = vcombine.high %v5070_v11, %v5070_v11  ;;  %v5063_v8 = vcombine.high %v5061_v10, %v5061_v10 }
0x24a4   : > { %v5077_v55 = vrot.slane %v5061_v10, %v8142_v52 }
0x24a5   : > { %v9369_v51 = vrot.slane %v5084_v58, %v8153_v57  ;;  %v5137_v48 = vmul.f32 %v7129_v27, %v9377_v32  ;;  %v5094_v62 = vcombine.high %v5084_v58, %v5084_v58  ;;  %v9393_v16 = vrot.slane %v5092_v12, %v8153_v57  ;;  %v7121_v27 = vld [vmem:[%s10043_s29 + $0x28] sm:$0xff] }
0x24a6   : > { %v5091_v43 = vrot.slane %v5063_v8, %v8142_v52  ;;  %v9417_v34 = vrot.slane %v5077_v55, %v8153_v57  ;;  %v7145_v52 = vld [vmem:[%s9972_s14 + $0x208] sm:$0xff]  ;;  %v5093_v22 = vcombine.high %v5077_v55, %v5077_v55  ;;  %v5138_v63 = vmul.f32 %v7130_v20, %v9377_v32  ;;  %v7122_v55 = vld [vmem:[%s10047_s30 + $0x2] ss:$0 sm:$0xff] }
0x24a7   : > { %v9380_v17 = vmul.f32 %v7133_v46, %v9369_v51  ;;  %v5140_v44 = vmul.f32 %v7132_v56, %v9369_v51  ;;  %v5142_v59 = vmul.f32 %v7134_v30, %v9393_v16  ;;  %v9403_v5 = vrot.slane %v5094_v62, %v8153_v57  ;;  %v7120_v46 = vld [vmem:[%s10043_s29 + $0x20] sm:$0xff] }
0x24a8   : > { %v5148_v54 = vmul.f32 %v7140_v9, %v9417_v34  ;;  %v9426_v24 = vrot.slane %v5091_v43, %v8153_v57  ;;  %v5095_v28 = vcombine.high %v5091_v43, %v5091_v43  ;;  %v9439_v33 = vrot.slane %v5093_v22, %v8153_v57  ;;  %v7128_v43 = vld [vmem:[%s9972_s14 + $0x180] sm:$0xff]  ;;  %v7131_v9 = vld [vmem:[%s9972_s14 + $0x198] sm:$0xff] }
0x24a9   : > { %v5147_v31 = vmul.f32 %v7139_v40, %v9403_v5  ;;  %v5146_v60 = vmul.f32 %v7138_v35, %v9403_v5  ;;  %v5163_v25 = vsel %vm1278_vm3, %v5137_v48, 0.0  ;;  %v5172_v38 = vsel %vm1278_vm3, %v5140_v44, 0.0 }
0x24aa   : > { %v5153_v15 = vmul.f32 %v7145_v52, %v9426_v24  ;;  %v5152_v61 = vmul.f32 %v7144_v13, %v9426_v24  ;;  %v9446_v37 = vmul.f32 %v7146_v18, %v9439_v33  ;;  %v9449_v49 = vrot.slane %v5095_v28, %v8153_v57  ;;  %v7136_v52 = vld [vmem:[%s9972_s14 + $0x1c0] sm:$0xff]  ;;  %v7142_v28 = vld [vmem:[%s9972_s14 + $0x1f0] sm:$0xff] }
0x24ab   : > { %v5193_v7 = vsel %vm1278_vm3, %v5147_v31, 0.0  ;;  %v5190_v29 = vsel %vm1278_vm3, %v5146_v60, 0.0  ;;  %v5196_v23 = vsel %vm1278_vm3, %v5148_v54, 0.0  ;;  %v7706_v12 = vpack.c.bf16 %v7121_v27, %v7120_v46 }
0x24ac   : > { %v9457_v1 = vmul.f32 %v7151_v14, %v9449_v49  ;;  %v9465_v57 = vmul.f32 %v7150_v50, %v9449_v49  ;;  %v5208_v10 = vsel %vm1278_vm3, %v5152_v61, 0.0  ;;  %v5144_v22 = vmul.f32 %v7136_v52, %v9393_v16  ;;  %v7148_v50 = vld [vmem:[%s9972_s14 + $0x220] sm:$0xff] }
0x24ad   : > { %7707 = vmatpush3.bf16.msra.mxu0 %v7706_v12  ;;  %v5156_v20 = vmul.f32 %v7148_v50, %v9439_v33 }
0x24ae   : > { %7538 = vmatprep.subr.mxu0 %v7890_v6  ;;  %v5229_v52 = vsel %vm1278_vm3, %v9457_v1, 0.0 }
0x24cc   : > { %v4826_v2 = vpop.permute.xlu1 %4825 }
0x24cd   : > { %v4828_v4 = vsel %vm938_vm2, %v4826_v2, 0.0  ;;  %v5166_v2 = vsel %vm1278_vm3, %v5138_v63, 0.0 }
0x24ce   : > { %4829 = vadd.xlane.f32.xlu1 %v4828_v4  ;;  %v5178_v4 = vsel %vm1278_vm3, %v5142_v59, 0.0 }
0x24df   : > { %4849 = vrot.lane.b32.xlu1 %v7119_v53, %s10056_s25  ;;  %v5211_v53 = vsel %vm1278_vm3, %v5153_v15, 0.0 }
0x24e3   : > { %5839 = vrot.lane.b32.xlu1 %v9365_v39, %s10058_s11 }
0x24e7   : > { %5601 = vrot.lane.b32.xlu1 %v9380_v17, %s10058_s11 }
0x24eb   : > { %5593 = vrot.lane.b32.xlu1 %v5137_v48, %s10058_s11 }
0x24ef   : > { %5599 = vrot.lane.b32.xlu1 %v5140_v44, %s10058_s11  ;;  %v4841_v44 = vpop.permute.xlu0 %4840 }
0x24f3   : > { %5603 = vrot.lane.b32.xlu1 %v5142_v59, %s10058_s11 }
0x24f7   : > { %5613 = vrot.lane.b32.xlu1 %v5147_v31, %s10058_s11 }
0x24fb   : > { %5611 = vrot.lane.b32.xlu1 %v5146_v60, %s10058_s11  ;;  %v5136_v60 = vmul.f32 %v7128_v43, %v9377_v32  ;;  %v7135_v32 = vld [vmem:[%s9972_s14 + $0x1b8] sm:$0xff]  ;;  %v5214_v43 = vsel %vm1278_vm3, %v9446_v37, 0.0 }
0x24ff   : > { %5615 = vrot.lane.b32.xlu1 %v5148_v54, %s10058_s11  ;;  %v5139_v54 = vmul.f32 %v7131_v9, %v9369_v51  ;;  %v7137_v51 = vld [vmem:[%s9972_s14 + $0x1c8] sm:$0xff] }
0x2500   : > { %v5145_v13 = vmul.f32 %v7137_v51, %v9403_v5  ;;  %v7143_v5 = vld [vmem:[%s9972_s14 + $0x1f8] sm:$0xff]  ;;  %v5226_v51 = vsel %vm1278_vm3, %v9465_v57, 0.0 }
0x2501   : > { %v5151_v14 = vmul.f32 %v7143_v5, %v9426_v24  ;;  %v7149_v24 = vld [vmem:[%s9972_s14 + $0x228] sm:$0xff] }
0x2503   : > { %5625 = vrot.lane.b32.xlu1 %v5153_v15, %s10058_s11  ;;  %v5143_v15 = vmul.f32 %v7135_v32, %v9393_v16  ;;  %v7141_v16 = vld [vmem:[%s9972_s14 + $0x1e8] sm:$0xff]  ;;  %v5205_v27 = vsel %vm1278_vm3, %v5151_v14, 0.0 }
0x2504   : > { %v5149_v18 = vmul.f32 %v7141_v16, %v9417_v34 }
0x2507   : > { %5623 = vrot.lane.b32.xlu1 %v5152_v61, %s10058_s11  ;;  %v5150_v61 = vmul.f32 %v7142_v28, %v9417_v34  ;;  %v7147_v34 = vld [vmem:[%s9972_s14 + $0x218] sm:$0xff] }
0x250b   : > { %5627 = vrot.lane.b32.xlu1 %v9446_v37, %s10058_s11 }
0x250f   : > { %5637 = vrot.lane.b32.xlu1 %v9457_v1, %s10058_s11 }
0x2513   : > { %5635 = vrot.lane.b32.xlu1 %v9465_v57, %s10058_s11 }
0x2537   : > { %5167 = vadd.xlane.f32.xlu1 %v5166_v2  ;;  %v9566_v2 = vmul.f32 %v7149_v24, %v9449_v49  ;;  %v5160_v49 = vsel %vm1278_vm3, %v5136_v60, 0.0 }
0x2539   : > { %v5223_v28 = vsel %vm1278_vm3, %v9566_v2, 0.0 }
0x253b   : > { %5164 = vadd.xlane.f32.xlu1 %v5163_v25  ;;  %v9571_v25 = vld [vmem:[%s10061_s15 + $0x2] ss:$0 sm:$0xff]  ;;  %s10068_s15 = sld [smem:[#allocation21_spill]] }
0x253f   : > { %5173 = vadd.xlane.f32.xlu1 %v5172_v38  ;;  %v5175_v38 = vsel %vm1278_vm3, %v9380_v17, 0.0  ;;  %v5199_v17 = vsel %vm1278_vm3, %v5149_v18, 0.0 }
0x2543   : > { %5179 = vadd.xlane.f32.xlu1 %v5178_v4  ;;  %v5169_v4 = vsel %vm1278_vm3, %v5139_v54, 0.0 }
0x2547   : > { %5194 = vadd.xlane.f32.xlu1 %v5193_v7  ;;  %v5184_v7 = vsel %vm1278_vm3, %v5144_v22, 0.0 }
0x254b   : > { %5191 = vadd.xlane.f32.xlu1 %v5190_v29  ;;  %v5181_v29 = vsel %vm1278_vm3, %v5143_v15, 0.0 }
0x254f   : > { %5197 = vadd.xlane.f32.xlu1 %v5196_v23  ;;  %v5202_v23 = vsel %vm1278_vm3, %v5150_v61, 0.0 }
0x2553   : > { %5212 = vadd.xlane.f32.xlu1 %v5211_v53 }
0x255b   : > { %v4830_v42 = vpop.xlane.xlu1 %4829 }
0x255c   : > { %v4831_v45 = vmul.f32 0.0625, %v4830_v42 }
0x255e   : > { %v4832_v58 = vadd.f32 1e-05, %v4831_v45 }
0x255f   : > { %v4850_v11 = vpop.permute.xlu1 %4849 }
0x2560   : > { %7840 = vrsqrt.f32 %v4832_v58 }
0x2563   : > { %v9487_v48 = vpop.permute.xlu1 %5839 }
0x2567   : > { %v5602_v56 = vpop.permute.xlu1 %5601 }
0x2568   : > { %v5678_v36 = vsel %vm1278_vm3, %v5602_v56, 0.0 }
0x2569   : > { %5679 = vadd.xlane.f32.xlu1 %v5678_v36 }
0x256a   : > { %v7841_v62 = vpop.eup %7840 }
0x256b   : > { %v4834_v30 = vmul.f32 %v7841_v62, %v9340_v26  ;;  %v5594_v53 = vpop.permute.xlu1 %5593  ;;  %v5220_v62 = vsel %vm1278_vm3, %v5156_v20, 0.0 }
0x256d   : > { %v4843_v59 = vmul.f32 %v4841_v44, %v4834_v30  ;;  %5209 = vadd.xlane.f32.xlu1 %v5208_v10  ;;  %v5666_v10 = vsel %vm1278_vm3, %v5594_v53, 0.0 }
0x256f   : > { %v4852_v40 = vadd.f32 %v4850_v11, %v4843_v59  ;;  %v5600_v11 = vpop.permute.xlu1 %5599 }
0x2571   : > { %4862 = vrot.lane.b32.xlu0 %v4852_v40, %s10053_s8 }
0x2573   : > { %v5604_v56 = vpop.permute.xlu1 %5603 }
0x2577   : > { %v5614_v59 = vpop.permute.xlu1 %5613 }
0x25e3   : > { %v4863_v8 = vpop.permute.xlu0 %4862 }
0x25e4   : > { %7529 = vmatmul.mubr.msk.f32.vlgmr.msra.gmra.mrb[24].mxu0 %vm938_vm2, %v4863_v8  ;;  %v5675_v8 = vsel %vm1278_vm3, %v5600_v11, 0.0 }
0x25e5   : > { %7540 = vmatprep.mubr.msk.f32.mxu0 %vm7889_vm0, %v7890_v6 }
0x26b7   : > { %v4932_v31 = vpop.f32.mrb[24].mxu0 }
0x26b8   : > { %v9500_v35 = vadd.f32 %v7122_v55, %v4932_v31  ;;  %v7530_v26 = vpop.f32.mrb[25].mxu0  ;;  %v5612_v31 = vpop.permute.xlu1 %5611 }
0x26ba   : > { %5841 = vrot.lane.b32.xlu0 %v9500_v35, %s10058_s11  ;;  %7539 = vmatpush3.xpose.msk.msra.mxu0 %vm1278_vm3, %v9500_v35 }
0x26bb   : > { %7548 = vmatprep.subr.mxu0 %v7890_v6 }
0x26bd   : > { %7541 = vmatmul.mubr.msk.f32.vlgmr.msra.gmra.mrb[26].mxu0 %vm1278_vm3, %v9365_v39 }
0x26be   : > { %5595 = vrot.lane.b32.xlu0 %v5138_v63, %s10058_s11  ;;  %7550 = vmatprep.mubr.msk.f32.mxu0 %vm7889_vm0, %v7890_v6  ;;  %v5155_v63 = vmul.f32 %v7147_v34, %v9439_v33  ;;  %v9577_v33 = vmul.f32 %v9571_v25, %v9365_v39  ;;  %v5187_v39 = vsel %vm1278_vm3, %v5145_v13, 0.0 }
0x26c0   : > { %v5217_v55 = vsel %vm1278_vm3, %v5155_v63, 0.0  ;;  %v5237_v53 = vsel %vm1278_vm3, %v9577_v33, 0.0 }
0x26c2   : > { %5591 = vrot.lane.b32.xlu0 %v5136_v60, %s10058_s11  ;;  %v5681_v60 = vsel %vm1278_vm3, %v5604_v56, 0.0 }
0x26c6   : > { %5597 = vrot.lane.b32.xlu0 %v5139_v54, %s10058_s11  ;;  %v5696_v54 = vsel %vm1278_vm3, %v5614_v59, 0.0 }
0x26ca   : > { %5607 = vrot.lane.b32.xlu0 %v5144_v22, %s10058_s11  ;;  %v5616_v22 = vpop.permute.xlu1 %5615 }
0x26cb   : > { %v5699_v1 = vsel %vm1278_vm3, %v5616_v22, 0.0 }
0x26ce   : > { %5605 = vrot.lane.b32.xlu0 %v5143_v15, %s10058_s11  ;;  %v5626_v37 = vpop.permute.xlu1 %5625 }
0x26cf   : > { %v5714_v57 = vsel %vm1278_vm3, %v5626_v37, 0.0 }
0x26d2   : > { %5609 = vrot.lane.b32.xlu0 %v5145_v13, %s10058_s11  ;;  %v5693_v13 = vsel %vm1278_vm3, %v5612_v31, 0.0 }
0x26d6   : > { %5619 = vrot.lane.b32.xlu0 %v5150_v61, %s10058_s11 }
0x26da   : > { %5617 = vrot.lane.b32.xlu0 %v5149_v18, %s10058_s11  ;;  %v5624_v18 = vpop.permute.xlu1 %5623 }
0x26de   : > { %5621 = vrot.lane.b32.xlu0 %v5151_v14, %s10058_s11  ;;  %v5628_v50 = vpop.permute.xlu1 %5627 }
0x26df   : > { %v5717_v24 = vsel %vm1278_vm3, %v5628_v50, 0.0 }
0x26e2   : > { %5631 = vrot.lane.b32.xlu0 %v5156_v20, %s10058_s11  ;;  %v5711_v20 = vsel %vm1278_vm3, %v5624_v18, 0.0 }
0x26e6   : > { %5629 = vrot.lane.b32.xlu0 %v5155_v63, %s10058_s11 }
0x26ea   : > { %5633 = vrot.lane.b32.xlu0 %v9566_v2, %s10058_s11 }
0x26ee   : > { %5736 = vrot.lane.b32.xlu0 %v9577_v33, %s10058_s11  ;;  %s10062_s11 = smov 104  }
0x270d   : > { %5176 = vadd.xlane.f32.xlu0 %v5175_v38  ;;  %v5638_v38 = vpop.permute.xlu1 %5637 }
0x2711   : > { %5161 = vadd.xlane.f32.xlu0 %v5160_v49 }
0x2715   : > { %5170 = vadd.xlane.f32.xlu0 %v5169_v4  ;;  %v5732_v4 = vsel %vm1278_vm3, %v5638_v38, 0.0 }
0x2719   : > { %5185 = vadd.xlane.f32.xlu0 %v5184_v7 }
0x271d   : > { %5182 = vadd.xlane.f32.xlu0 %v5181_v29 }
0x2721   : > { %5188 = vadd.xlane.f32.xlu0 %v5187_v39 }
0x2725   : > { %5203 = vadd.xlane.f32.xlu0 %v5202_v23 }
0x2729   : > { %5200 = vadd.xlane.f32.xlu0 %v5199_v17 }
0x272c   : > { %v5842_v42 = vpop.permute.xlu0 %5841 }
0x272d   : > { %7549 = vmatpush3.xpose.msk.msra.mxu0 %vm1278_vm3, %v5842_v42  ;;  %v5636_v42 = vpop.permute.xlu1 %5635 }
0x272e   : > { %7711 = vmatprep.subr.bf16.mxu0 %v7888_v3 }
0x2730   : > { %v5596_v45 = vpop.permute.xlu0 %5595  ;;  %7551 = vmatmul.mubr.msk.f32.vlgmr.msra.gmra.mrb[28].mxu0 %vm1278_vm3, %v9487_v48 }
0x2731   : > { %v5669_v58 = vsel %vm1278_vm3, %v5596_v45, 0.0  ;;  %7562 = vmatprep.mubr.msk.f32.mxu0 %vm7889_vm0, %v7890_v6  ;;  %v5729_v45 = vsel %vm1278_vm3, %v5636_v42, 0.0 }
0x2732   : > { %5670 = vadd.xlane.f32.xlu0 %v5669_v58  ;;  %v5168_v58 = vpop.xlane.xlu1 %5167 }
0x2733   : > { %v5348_v38 = vrot.slane %v5168_v58, %v8372_v21 }
0x2734   : > { %v5592_v46 = vpop.permute.xlu0 %5591 }
0x2735   : > { %v5663_v12 = vsel %vm1278_vm3, %v5592_v46, 0.0 }
0x2736   : > { %5206 = vadd.xlane.f32.xlu0 %v5205_v27  ;;  %5664 = vadd.xlane.f32.xlu1 %v5663_v12  ;;  %v5165_v46 = vpop.xlane.xlu1 %5164 }
0x2738   : > { %v5598_v36 = vpop.permute.xlu0 %5597 }
0x2739   : > { %v5672_v48 = vsel %vm1278_vm3, %v5598_v36, 0.0 }
0x273a   : > { %5221 = vadd.xlane.f32.xlu0 %v5220_v62  ;;  %5673 = vadd.xlane.f32.xlu1 %v5672_v48  ;;  %v5174_v12 = vpop.xlane.xlu1 %5173  ;;  %v5263_v48 = vrot.slane %v5165_v46, %v8369_v19 }
0x273c   : > { %v5608_v44 = vpop.permute.xlu0 %5607 }
0x273d   : > { %v5687_v30 = vsel %vm1278_vm3, %v5608_v44, 0.0 }
0x273e   : > { %5667 = vadd.xlane.f32.xlu0 %v5666_v10  ;;  %5688 = vadd.xlane.f32.xlu1 %v5687_v30  ;;  %v5180_v36 = vpop.xlane.xlu1 %5179  ;;  %v5272_v10 = vrot.slane %v5174_v12, %v8369_v19 }
0x2740   : > { %v5606_v40 = vpop.permute.xlu0 %5605 }
0x2741   : > { %v5684_v15 = vsel %vm1278_vm3, %v5606_v40, 0.0 }
0x2742   : > { %5676 = vadd.xlane.f32.xlu0 %v5675_v8  ;;  %5218 = vadd.xlane.f32.xlu1 %v5217_v55  ;;  %v5195_v59 = vpop.xlane.xlu1 %5194 }
0x2744   : > { %v5610_v26 = vpop.permute.xlu0 %5609 }
0x2745   : > { %v5690_v16 = vsel %vm1278_vm3, %v5610_v26, 0.0 }
0x2746   : > { %5215 = vadd.xlane.f32.xlu0 %v5214_v43  ;;  %5682 = vadd.xlane.f32.xlu1 %v5681_v60  ;;  %v5192_v26 = vpop.xlane.xlu1 %5191  ;;  %v5277_v60 = vrot.slane %v5180_v36, %v8372_v21 }
0x2748   : > { %v5620_v9 = vpop.permute.xlu0 %5619 }
0x2749   : > { %v5705_v14 = vsel %vm1278_vm3, %v5620_v9, 0.0 }
0x274a   : > { %5230 = vadd.xlane.f32.xlu0 %v5229_v52  ;;  %5697 = vadd.xlane.f32.xlu1 %v5696_v54 }
0x274c   : > { %v5618_v32 = vpop.permute.xlu0 %5617 }
0x274d   : > { %v5702_v34 = vsel %vm1278_vm3, %v5618_v32, 0.0  ;;  %v5290_v32 = vrot.slane %v5192_v26, %v8369_v19 }
0x274e   : > { %5227 = vadd.xlane.f32.xlu1 %v5226_v51  ;;  %5685 = vadd.xlane.f32.xlu0 %v5684_v15  ;;  %v5198_v15 = vpop.xlane.xlu1 %5197 }
0x2750   : > { %v5622_v61 = vpop.permute.xlu0 %5621 }
0x2751   : > { %v5708_v2 = vsel %vm1278_vm3, %v5622_v61, 0.0 }
0x2752   : > { %5694 = vadd.xlane.f32.xlu1 %v5693_v13  ;;  %5224 = vadd.xlane.f32.xlu0 %v5223_v28  ;;  %v5213_v28 = vpop.xlane.xlu1 %5212 }
0x2753   : > { %v5368_v46 = vrot.slane %v5213_v28, %v8372_v21 }
0x2754   : > { %v5632_v5 = vpop.permute.xlu0 %5631 }
0x2755   : > { %v5723_v7 = vsel %vm1278_vm3, %v5632_v5, 0.0 }
0x2756   : > { %5700 = vadd.xlane.f32.xlu1 %v5699_v1  ;;  %5691 = vadd.xlane.f32.xlu0 %v5690_v16  ;;  %v9652_v1 = vpop.xlane.xlu1 %5679 }
0x2758   : > { %v5630_v63 = vpop.permute.xlu0 %5629 }
0x2759   : > { %v5720_v29 = vsel %vm1278_vm3, %v5630_v63, 0.0 }
0x275a   : > { %5715 = vadd.xlane.f32.xlu1 %v5714_v57  ;;  %5706 = vadd.xlane.f32.xlu0 %v5705_v14  ;;  %v5210_v18 = vpop.xlane.xlu1 %5209 }
0x275c   : > { %v5634_v49 = vpop.permute.xlu0 %5633 }
0x275d   : > { %v5726_v39 = vsel %vm1278_vm3, %v5634_v49, 0.0 }
0x275e   : > { %5712 = vadd.xlane.f32.xlu1 %v5711_v20  ;;  %5703 = vadd.xlane.f32.xlu0 %v5702_v34 }
0x2760   : > { %v5737_v23 = vpop.permute.xlu0 %5736 }
0x2761   : > { %v5739_v17 = vsel %vm1278_vm3, %v5737_v23, 0.0  ;;  %v5360_v23 = vrot.slane %v5195_v59, %v8372_v21 }
0x2762   : > { %5718 = vadd.xlane.f32.xlu1 %v5717_v24  ;;  %5709 = vadd.xlane.f32.xlu0 %v5708_v2 }
0x2766   : > { %5733 = vadd.xlane.f32.xlu1 %v5732_v4  ;;  %5724 = vadd.xlane.f32.xlu0 %v5723_v7 }
0x276a   : > { %5721 = vadd.xlane.f32.xlu0 %v5720_v29  ;;  %5727 = vadd.xlane.f32.xlu1 %v5726_v39 }
0x276e   : > { %5238 = vadd.xlane.f32.xlu0 %v5237_v53  ;;  %5740 = vadd.xlane.f32.xlu1 %v5739_v17 }
0x2772   : > { %5730 = vadd.xlane.f32.xlu0 %v5729_v45 }
0x2790   : > { %v9633_v11 = vpop.f32.mrb[26].mxu0 }
0x2791   : > { %v7542_v27 = vpop.f32.mrb[27].mxu0 }
0x279a   : > { %v5177_v56 = vpop.xlane.xlu0 %5176 }
0x279b   : > { %v5352_v24 = vrot.slane %v5177_v56, %v8372_v21 }
0x279d   : > { %v5377_v7 = vsel %vm1449_vm5, %v5352_v24, %v5348_v38 }
0x279e   : > { %v5162_v62 = vpop.xlane.xlu0 %5161 }
0x279f   : > { %v5259_v44 = vrot.slane %v5162_v62, %v8372_v21 }
0x27a1   : > { %v5264_v33 = vsel %vm1384_vm4, %v5263_v48, %v5259_v44 }
0x27a2   : > { %v5171_v30 = vpop.xlane.xlu0 %5170 }
0x27a3   : > { %v5268_v40 = vrot.slane %v5171_v30, %v8372_v21 }
0x27a5   : > { %v5273_v8 = vsel %vm1384_vm4, %v5272_v10, %v5268_v40 }
0x27a6   : > { %v5328_v55 = vsel %vm1449_vm5, %v5273_v8, %v5264_v33  ;;  %v5186_v31 = vpop.xlane.xlu0 %5185 }
0x27a7   : > { %v5356_v2 = vrot.slane %v5186_v31, %v8372_v21 }
0x27a9   : > { %v5378_v29 = vsel %vm1451_vm6, %v5356_v2, %v5377_v7 }
0x27aa   : > { %v5183_v43 = vpop.xlane.xlu0 %5182  ;;  %v5379_v42 = vsel %vm1453_vm7, %v5360_v23, %v5378_v29 }
0x27ab   : > { %v5281_v9 = vrot.slane %v5183_v43, %v8369_v19 }
0x27ad   : > { %v5282_v54 = vsel %vm1384_vm4, %v5281_v9, %v5277_v60 }
0x27ae   : > { %v5329_v52 = vsel %vm1451_vm6, %v5282_v54, %v5328_v55  ;;  %v5189_v22 = vpop.xlane.xlu0 %5188 }
0x27af   : > { %v5286_v51 = vrot.slane %v5189_v22, %v8372_v21 }
0x27b1   : > { %v5291_v37 = vsel %vm1384_vm4, %v5290_v32, %v5286_v51 }
0x27b2   : > { %v9650_v13 = vsel %vm1453_vm7, %v5291_v37, %v5329_v52  ;;  %v5204_v61 = vpop.xlane.xlu0 %5203  ;;  %v5308_v37 = vrot.slane %v5210_v18, %v8369_v19 }
0x27b3   : > { %v5364_v39 = vrot.slane %v5204_v61, %v8372_v21 }
0x27b5   : > { %v5380_v45 = vsel %vm1455_vm8, %v5364_v39, %v5379_v42 }
0x27b6   : > { %v5201_v16 = vpop.xlane.xlu0 %5200  ;;  %v5381_v56 = vsel %vm1457_vm9, %v5368_v46, %v5380_v45 }
0x27b7   : > { %v5299_v54 = vrot.slane %v5201_v16, %v8369_v19 }
0x27bf   : > { %v5671_v5 = vpop.xlane.xlu0 %5670 }
0x27c0   : > { %v5854_v32 = vrot.slane %v5671_v5, %v8372_v21 }
0x27c3   : > { %v9654_v57 = vpop.xlane.xlu1 %5664  ;;  %v5207_v14 = vpop.xlane.xlu0 %5206 }
0x27c4   : > { %v5304_v22 = vrot.slane %v5207_v14, %v8372_v21  ;;  %v5761_v29 = vrot.slane %v9654_v57, %v8372_v21 }
0x27c6   : > { %v5309_v2 = vsel %vm1384_vm4, %v5308_v37, %v5304_v22 }
0x27c7   : > { %v9656_v50 = vpop.xlane.xlu1 %5673  ;;  %v5222_v20 = vpop.xlane.xlu0 %5221 }
0x27c8   : > { %v5372_v58 = vrot.slane %v5222_v20, %v8372_v21  ;;  %v5858_v20 = vrot.slane %v9652_v1, %v8372_v21 }
0x27ca   : > { %v5382_v62 = vsel %vm1459_vm10, %v5372_v58, %v5381_v56  ;;  %v5883_v38 = vsel %vm1449_vm5, %v5858_v20, %v5854_v32 }
0x27cb   : > { %v9658_v34 = vpop.xlane.xlu1 %5688  ;;  %v9660_v63 = vpop.xlane.xlu0 %5667 }
0x27cc   : > { %v5765_v5 = vrot.slane %v9660_v63, %v8369_v19 }
0x27ce   : > { %v5766_v57 = vsel %vm1384_vm4, %v5765_v5, %v5761_v29 }
0x27cf   : > { %v5219_v49 = vpop.xlane.xlu1 %5218  ;;  %v9665_v4 = vpop.xlane.xlu0 %5676 }
0x27d0   : > { %v5317_v18 = vrot.slane %v5219_v49, %v8369_v19  ;;  %v5774_v1 = vrot.slane %v9665_v4, %v8369_v19  ;;  %v5770_v49 = vrot.slane %v9656_v50, %v8372_v21 }
0x27d3   : > { %v9671_v17 = vpop.xlane.xlu1 %5682  ;;  %v5216_v53 = vpop.xlane.xlu0 %5215 }
0x27d4   : > { %v5313_v61 = vrot.slane %v5216_v53, %v8372_v21  ;;  %v5779_v58 = vrot.slane %v9671_v17, %v8372_v21 }
0x27d7   : > { %v5698_v27 = vpop.xlane.xlu1 %5697  ;;  %v5231_v12 = vpop.xlane.xlu0 %5230 }
0x27d8   : > { %v5376_v36 = vrot.slane %v5231_v12, %v8372_v21  ;;  %v5866_v39 = vrot.slane %v5698_v27, %v8372_v21  ;;  %v5775_v27 = vsel %vm1384_vm4, %v5774_v1, %v5770_v49 }
0x27da   : > { %v5383_v48 = vsel %vm1461_vm12, %v5376_v36, %v5382_v62 }
0x27db   : > { %v5228_v44 = vpop.xlane.xlu1 %5227  ;;  %v5686_v33 = vpop.xlane.xlu0 %5685  ;;  %v5458_v30 = vadd.f32 %v9633_v11, %v5383_v48  ;;  %v5295_v11 = vrot.slane %v5198_v15, %v8372_v21  ;;  %v5862_v15 = vrot.slane %v9658_v34, %v8372_v21  ;;  %v5318_v34 = vsel %vm1384_vm4, %v5317_v18, %v5313_v61 }
0x27dc   : > { %v5326_v7 = vrot.slane %v5228_v44, %v8369_v19  ;;  %v5783_v63 = vrot.slane %v5686_v33, %v8369_v19 }
0x27dd   : > { %v9683_v10 = vadd.f32 %v5458_v30, %v8427_v0  ;;  %v5300_v28 = vsel %vm1384_vm4, %v5299_v54, %v5295_v11  ;;  %v5884_v45 = vsel %vm1451_vm6, %v5862_v15, %v5883_v38  ;;  %v5830_v54 = vsel %vm1449_vm5, %v5775_v27, %v5766_v57 }
0x27de   : > { %v5331_v14 = vsel %vm1455_vm8, %v5300_v28, %v9650_v13  ;;  %v5885_v36 = vsel %vm1453_vm7, %v5866_v39, %v5884_v45  ;;  %v5784_v62 = vsel %vm1384_vm4, %v5783_v63, %v5779_v58 }
0x27df   : > { %v5695_v59 = vpop.xlane.xlu1 %5694  ;;  %v5225_v40 = vpop.xlane.xlu0 %5224  ;;  %v5465_v8 = vsel %vm1278_vm3, %v9683_v10, -inf  ;;  %v5332_v42 = vsel %vm1457_vm9, %v5309_v2, %v5331_v14  ;;  %v5831_v22 = vsel %vm1451_vm6, %v5784_v62, %v5830_v54  ;;  %v7159_v54 = vld [vmem:[%s10063_s12 + $0x20] sm:$0xff] }
0x27e0   : > { %5466 = vmax.xlane.f32.xlu1 %v5465_v8  ;;  %v5322_v24 = vrot.slane %v5225_v40, %v8372_v21  ;;  %v5792_v50 = vrot.slane %v5695_v59, %v8369_v19  ;;  %v5333_v56 = vsel %vm1459_vm10, %v5318_v34, %v5332_v42 }
0x27e2   : > { %v5327_v4 = vsel %vm1384_vm4, %v5326_v7, %v5322_v24 }
0x27e3   : > { %v5701_v55 = vpop.xlane.xlu1 %5700  ;;  %v5692_v31 = vpop.xlane.xlu0 %5691  ;;  %v5334_v44 = vsel %vm1461_vm12, %v5327_v4, %v5333_v56 }
0x27e4   : > { %v5788_v13 = vrot.slane %v5692_v31, %v8372_v21  ;;  %v5797_v17 = vrot.slane %v5701_v55, %v8372_v21 }
0x27e6   : > { %v5793_v33 = vsel %vm1384_vm4, %v5792_v50, %v5788_v13 }
0x27e7   : > { %v9687_v26 = vpop.xlane.xlu1 %5715  ;;  %v5707_v43 = vpop.xlane.xlu0 %5706  ;;  %v5832_v37 = vsel %vm1453_vm7, %v5793_v33, %v5831_v22 }
0x27e8   : > { %v5870_v46 = vrot.slane %v5707_v43, %v8372_v21  ;;  %v5874_v30 = vrot.slane %v9687_v26, %v8372_v21 }
0x27ea   : > { %v5886_v8 = vsel %vm1455_vm8, %v5870_v46, %v5885_v36 }
0x27eb   : > { %v5713_v60 = vpop.xlane.xlu1 %5712  ;;  %v5704_v9 = vpop.xlane.xlu0 %5703  ;;  %v5887_v20 = vsel %vm1457_vm9, %v5874_v30, %v5886_v8 }
0x27ec   : > { %v5801_v12 = vrot.slane %v5704_v9, %v8369_v19  ;;  %v5810_v31 = vrot.slane %v5713_v60, %v8369_v19 }
0x27ef   : > { %v5710_v52 = vpop.xlane.xlu0 %5709  ;;  %v5719_v51 = vpop.xlane.xlu1 %5718 }
0x27f0   : > { %v5806_v48 = vrot.slane %v5710_v52, %v8372_v21  ;;  %v5802_v52 = vsel %vm1384_vm4, %v5801_v12, %v5797_v17  ;;  %v5815_v55 = vrot.slane %v5719_v51, %v8372_v21 }
0x27f1   : > { %v5833_v24 = vsel %vm1455_vm8, %v5802_v52, %v5832_v37  ;;  %v7160_v52 = vld [vmem:[%s10063_s12 + $0x28] sm:$0xff] }
0x27f2   : > { %v5811_v26 = vsel %vm1384_vm4, %v5810_v31, %v5806_v48 }
0x27f3   : > { %v5725_v16 = vpop.xlane.xlu0 %5724  ;;  %v5734_v23 = vpop.xlane.xlu1 %5733  ;;  %v5834_v15 = vsel %vm1457_vm9, %v5811_v26, %v5833_v24 }
0x27f4   : > { %v5878_v43 = vrot.slane %v5725_v16, %v8372_v21  ;;  %v5882_v60 = vrot.slane %v5734_v23, %v8372_v21 }
0x27f6   : > { %v5888_v2 = vsel %vm1459_vm10, %v5878_v43, %v5887_v20 }
0x27f7   : > { %v5722_v53 = vpop.xlane.xlu0 %5721  ;;  %v5728_v11 = vpop.xlane.xlu1 %5727  ;;  %v5889_v38 = vsel %vm1461_vm12, %v5882_v60, %v5888_v2  ;;  %v7163_v2 = vld [vmem:[%s9979_s21 + $0x80] sm:$0xff] }
0x27f8   : > { %v5819_v59 = vrot.slane %v5722_v53, %v8369_v19  ;;  %v5824_v51 = vrot.slane %v5728_v11, %v8372_v21 }
0x27fa   : > { %v5820_v28 = vsel %vm1384_vm4, %v5819_v59, %v5815_v55  ;;  %v7712_v55 = vpack.c.bf16 %v7160_v52, %v7159_v54  ;;  %v7174_v52 = vld [vmem:[%s10054_s0 + $0x2] ss:$0 sm:$0xff] }
0x27fb   : > { %v5239_v40 = vpop.xlane.xlu0 %5238  ;;  %v5835_v18 = vsel %vm1459_vm10, %v5820_v28, %v5834_v15  ;;  %v5741_v14 = vpop.xlane.xlu1 %5740  ;;  %v7164_v15 = vld [vmem:[%s9979_s21 + $0x88] sm:$0xff] }
0x27fc   : > { %v5336_v9 = vadd.f32 %v5334_v44, %v5239_v40  ;;  %7713 = vmatpush3.bf16.msra.mxu0 %v7712_v55 }
0x27fd   : > { %7720 = vmatprep.subr.bf16.mxu0 %v7888_v3 }
0x27fe   : > { %v5462_v32 = vsel %vm938_vm2, %v5336_v9, -inf }
0x27ff   : > { %5463 = vmax.xlane.f32.xlu0 %v5462_v32  ;;  %v5731_v61 = vpop.xlane.xlu0 %5730 }
0x2800   : > { %v5828_v16 = vrot.slane %v5731_v61, %v8369_v19 }
0x2802   : > { %v5829_v5 = vsel %vm1384_vm4, %v5828_v16, %v5824_v51 }
0x2803   : > { %v5961_v1 = vpop.f32.mrb[28].mxu0  ;;  %v5836_v7 = vsel %vm1461_vm12, %v5829_v5, %v5835_v18  ;;  %v7715_v5 = vpack.c.bf16 %v7164_v15, %v7163_v2 }
0x2804   : > { %v5962_v29 = vadd.f32 %v5961_v1, %v5889_v38  ;;  %v7552_v34 = vpop.f32.mrb[29].mxu0  ;;  %v5838_v39 = vadd.f32 %v5836_v7, %v5741_v14 }
0x2805   : > { %v7166_v34 = vld [vmem:[%s9979_s21 + $0x98] sm:$0xff] }
0x2806   : > { %v5965_v21 = vadd.f32 %v5962_v29, %v8427_v0  ;;  %v5966_v19 = vsel %vm938_vm2, %v5838_v39, -inf  ;;  %v7165_v29 = vld [vmem:[%s9979_s21 + $0x90] sm:$0xff] }
0x2807   : > { %5967 = vmax.xlane.f32.xlu0 %v5966_v19  ;;  %v7161_v19 = vld [vmem:[%s9974_s16 + $0x2] ss:$0 sm:$0xff] }
0x2808   : > { %v5969_v63 = vsel %vm1278_vm3, %v5965_v21, -inf }
0x2809   : > { %5970 = vmax.xlane.f32.xlu1 %v5969_v63 }
0x281a   : > { %5987 = vrot.lane.b32.xlu1 %v9500_v35, %s10062_s11 }
0x281d   : > { %5483 = vrot.lane.b32.xlu0 %v9500_v35, %s10053_s8 }
0x286d   : > { %v5467_v49 = vpop.xlane.xlu1 %5466 }
0x288c   : > { %v5464_v13 = vpop.xlane.xlu0 %5463 }
0x288d   : > { %v5468_v23 = vmax.f32 %v5464_v13, %v5467_v49 }
0x288f   : > { %v5472_v53 = vsub.f32 %v9683_v10, %v5468_v23  ;;  %v5469_v57 = vsub.f32 %v5336_v9, %v5468_v23 }
0x2891   : > { %v5473_v4 = vmul.f32 1.442695, %v5472_v53  ;;  %v5470_v35 = vmul.f32 1.442695, %v5469_v57 }
0x2893   : > { %7842 = vpow2.f32 %v5473_v4  ;;  %v7167_v4 = vld [vmem:[%s9980_s22 + $0x40] sm:$0xff] }
0x2894   : > { %v5968_v0 = vpop.xlane.xlu0 %5967 }
0x2896   : > { %v5971_v42 = vpop.xlane.xlu1 %5970 }
0x2897   : > { %v5972_v45 = vmax.f32 %v5968_v0, %v5971_v42  ;;  %v7168_v0 = vld [vmem:[%s9980_s22 + $0x48] sm:$0xff] }
0x2898   : > { %v5484_v58 = vpop.permute.xlu0 %5483  ;;  %v7721_v42 = vpack.c.bf16 %v7168_v0, %v7167_v4  ;;  %v7192_v0 = vld [vmem:[%s9981_s23 + $0x5] ss:$0 sm:$0xff] }
0x2899   : > { %v5973_v46 = vsub.f32 %v5838_v39, %v5972_v45  ;;  %v5976_v27 = vsub.f32 %v5965_v21, %v5972_v45  ;;  %7544 = vmatpush3.msra.mxu1 %v5484_v58  ;;  %v7718_v39 = vpack.c.bf16 %v7166_v34, %v7165_v29  ;;  %v7171_v21 = vld [vmem:[%s9981_s23 + $0x4] ss:$0 sm:$0xff]  ;;  %v7185_v34 = vld [vmem:[%s9979_s21 + $0xa8] sm:$0xff] }
0x289a   : > { %7553 = vmatprep.subr.mxu1 %v7890_v6  ;;  %v5988_v36 = vpop.permute.xlu1 %5987  ;;  %v7184_v29 = vld [vmem:[%s9979_s21 + $0xa0] sm:$0xff] }
0x289b   : > { %v5974_v50 = vmul.f32 1.442695, %v5973_v46  ;;  %v5977_v12 = vmul.f32 1.442695, %v5976_v27 }
0x289d   : > { %7844 = vpow2.f32 %v5974_v50  ;;  %v7843_v56 = vpop.eup %7842 }
0x289e   : > { %7846 = vpow2.f32 %v5977_v12  ;;  %7546 = vmatmul.mubr.msk.f32.vlgmr.msra.gmra.mrb[32].mxu1 %vm1278_vm3, %v7843_v56  ;;  %v5478_v33 = vsel %vm1278_vm3, %v7843_v56, 0.0 }
0x289f   : > { %7848 = vpow2.f32 %v5470_v35  ;;  %7554 = vmatpush3.msra.mxu1 %v5988_v36  ;;  %7555 = vmatprep.mubr.msk.f32.mxu1 %vm7889_vm0, %v7890_v6 }
0x28a0   : > { %7714 = vmatprep.subr.bf16.mxu1 %v7888_v3 }
0x28a7   : > { %v7845_v10 = vpop.eup %7844 }
0x28a8   : > { %v7847_v62 = vpop.eup %7846  ;;  %v5979_v48 = vsel %vm938_vm2, %v7845_v10, 0.0 }
0x28a9   : > { %7556 = vmatmul.mubr.msk.f32.vlgmr.msra.gmra.mrb[34].mxu1 %vm1278_vm3, %v7847_v62  ;;  %v5982_v44 = vsel %vm1278_vm3, %v7847_v62, 0.0  ;;  %5980 = vadd.xlane.f32.xlu1 %v5979_v48  ;;  %v7849_v17 = vpop.eup %7848 }
0x28aa   : > { %5983 = vadd.xlane.f32.xlu0 %v5982_v44  ;;  %7573 = vmatprep.mubr.msk.f32.mxu1 %vm7889_vm0, %v7890_v6  ;;  %v5475_v30 = vsel %vm938_vm2, %v7849_v17, 0.0 }
0x28ab   : > { %7716 = vmatpush3.bf16.msra.mxu1 %v7715_v5 }
0x28ac   : > { %7717 = vmatprep.subr.bf16.mxu1 %v7888_v3 }
0x28ad   : > { %5479 = vadd.xlane.f32.xlu1 %v5478_v33 }
0x28ae   : > { %5476 = vadd.xlane.f32.xlu0 %v5475_v30 }
0x28af   : > { %7719 = vmatpush3.bf16.msra.mxu1 %v7718_v39  ;;  %v7730_v39 = vpack.c.bf16 %v7185_v34, %v7184_v29 }
0x28b0   : > { %7726 = vmatprep.subr.bf16.mxu1 %v7888_v3 }
0x2936   : > { %v5981_v59 = vpop.xlane.xlu1 %5980 }
0x2937   : > { %v5984_v40 = vpop.xlane.xlu0 %5983 }
0x2938   : > { %v5985_v8 = vadd.f32 %v5984_v40, %v5981_v59 }
0x293a   : > { %7850 = vrcp.f32 %v5985_v8  ;;  %v5480_v31 = vpop.xlane.xlu1 %5479 }
0x293b   : > { %v5477_v43 = vpop.xlane.xlu0 %5476 }
0x293c   : > { %v5481_v9 = vadd.f32 %v5480_v31, %v5477_v43 }
0x293e   : > { %7852 = vrcp.f32 %v5481_v9 }
0x2944   : > { %v7851_v11 = vpop.eup %7850 }
0x2945   : > { %v6064_v22 = vmul.f32 %v7851_v11, %v5981_v59 }
0x2947   : > { %v6065_v26 = vmul.f32 %v9571_v25, %v6064_v22 }
0x2948   : > { %v7853_v32 = vpop.eup %7852 }
0x2949   : > { %6067 = vrot.lane.b32.xlu0 %v6065_v26, %s10062_s11  ;;  %v5560_v37 = vmul.f32 %v7853_v32, %v5477_v43  ;;  %s10064_s11 = smov 8  }
0x294b   : > { %v5561_v60 = vmul.f32 %v9571_v25, %v5560_v37  ;;  %v7175_v37 = vld [vmem:[%s10055_s6 + $0x2] ss:$0 sm:$0xff] }
0x294d   : > { %5563 = vrot.lane.b32.xlu1 %v5561_v60, %s10053_s8  ;;  %v7176_v60 = vld [vmem:[%s9975_s17 + $0x20] sm:$0xff] }
0x2971   : > { %v5555_v28 = vpop.f32.mrb[32].mxu1 }
0x2972   : > { %v5559_v61 = vmul.f32 %v7853_v32, %v5555_v28  ;;  %v7547_v20 = vpop.f32.mrb[33].mxu1  ;;  %v7177_v28 = vld [vmem:[%s9975_s17 + $0x28] sm:$0xff] }
0x297c   : > { %v6059_v24 = vpop.f32.mrb[34].mxu1 }
0x297d   : > { %v6063_v51 = vmul.f32 %v7851_v11, %v6059_v24  ;;  %v7557_v16 = vpop.f32.mrb[35].mxu1 }
0x29bb   : > { %v6068_v25 = vpop.permute.xlu0 %6067 }
0x29bc   : > { %v6070_v18 = vadd.f32 %v6068_v25, %v6063_v51 }
0x29be   : > { %6072 = vrot.lane.b32.xlu1 %v6070_v18, %s10064_s11  ;;  %s10065_s11 = sld [smem:[#allocation18_spill]] }
0x29bf   : > { %v5564_v14 = vpop.permute.xlu1 %5563 }
0x29c0   : > { %v5566_v38 = vadd.f32 %v5564_v14, %v5559_v61  ;;  %v7724_v61 = vpack.c.bf16 %v7177_v28, %v7176_v60 }
0x29c2   : > { %6252 = vrot.lane.b32.xlu1 %v7171_v21, %s10056_s25  ;;  %v7178_v21 = vld [vmem:[%s9976_s18 + $0x2] ss:$0 sm:$0xff] }
0x2a30   : > { %v6073_v1 = vpop.permute.xlu1 %6072 }
0x2a31   : > { %v6075_v7 = vsel %vm1278_vm3, %v5566_v38, %v6073_v1  ;;  %v7180_v38 = vld [vmem:[%s9977_s19 + $0x20] sm:$0xff]  ;;  %v7181_v1 = vld [vmem:[%s9977_s19 + $0x28] sm:$0xff] }
0x2a32   : > { %7563 = vmatmul.mubr.msk.f32.vlgmr.msra.gmra.mrb[30].mxu0 %vm938_vm2, %v6075_v7  ;;  %v7727_v7 = vpack.c.bf16 %v7181_v1, %v7180_v38 }
0x2a33   : > { %7580 = vmatprep.mubr.msk.f32.mxu0 %vm7889_vm0, %v7890_v6  ;;  %7722 = vmatpush3.bf16.msra.mxu0 %v7721_v42  ;;  %v7182_v42 = vld [vmem:[%s9978_s20 + $0x2] ss:$0 sm:$0xff] }
0x2a34   : > { %7723 = vmatprep.subr.bf16.mxu0 %v7888_v3  ;;  %v6253_v48 = vpop.permute.xlu1 %6252 }
0x2b05   : > { %v6153_v63 = vpop.f32.mrb[30].mxu0 }
0x2b06   : > { %v6154_v49 = vadd.f32 %v7161_v19, %v6153_v63  ;;  %v7564_v13 = vpop.f32.mrb[31].mxu0 }
0x2b08   : > { %v6157_v23 = vmax.f32 %v6154_v49, 0.0 }
0x2b0a   : > { %v6167_v53 = vsel %vm938_vm2, %v6157_v23, %v9327_v41  ;;  %v7186_v23 = vld [vmem:[%s9979_s21 + $0xb0] sm:$0xff] }
0x2b0b   : > { %7574 = vmatmul.mubr.msk.f32.vlgmr.msra.gmra.mrb[36].mxu1 %vm853_vm1, %v6167_v53  ;;  %v7187_v53 = vld [vmem:[%s9979_s21 + $0xb8] sm:$0xff] }
0x2b0c   : > { %7594 = vmatprep.mubr.msk.f32.mxu1 %vm7889_vm0, %v7890_v6  ;;  %7728 = vmatpush3.bf16.msra.mxu1 %v7727_v7  ;;  %v7733_v4 = vpack.c.bf16 %v7187_v53, %v7186_v23 }
0x2b0d   : > { %7735 = vmatprep.subr.bf16.mxu1 %v7888_v3 }
0x2bde   : > { %v6237_v45 = vpop.f32.mrb[36].mxu1 }
0x2bdf   : > { %v7170_v57 = vmul.f32 -1.442695, %v6237_v45  ;;  %v7575_v58 = vpop.f32.mrb[37].mxu1  ;;  %v6255_v44 = vsub.f32 %v6237_v45, %v6253_v48 }
0x2be1   : > { %7854 = vpow2.f32 %v7170_v57  ;;  %v7172_v17 = vmul.f32 -1.442695, %v6255_v44 }
0x2beb   : > { %v7855_v46 = vpop.eup %7854 }
0x2bec   : > { %v6244_v27 = vadd.f32 1.0, %v7855_v46 }
0x2bee   : > { %7856 = vrcp.f32 %v6244_v27 }
0x2bf8   : > { %v7857_v50 = vpop.eup %7856 }
0x2bf9   : > { %v6262_v12 = vmul.f32 %v7857_v50, %v9331_v47  ;;  %v7188_v50 = vld [vmem:[%s9980_s22 + $0x50] sm:$0xff] }
0x2bfb   : > { %7581 = vmatmul.mubr.msk.f32.vlgmr.msra.gmra.mrb[32].mxu0 %vm938_vm2, %v6262_v12  ;;  %v7189_v12 = vld [vmem:[%s9980_s22 + $0x58] sm:$0xff] }
0x2bfc   : > { %7587 = vmatprep.mubr.msk.f32.mxu0 %vm7889_vm0, %v7890_v6  ;;  %7725 = vmatpush3.bf16.msra.mxu0 %v7724_v61 }
0x2bfd   : > { %7729 = vmatprep.subr.bf16.mxu0 %v7888_v3 }
0x2cce   : > { %v6332_v35 = vpop.f32.mrb[32].mxu0 }
0x2ccf   : > { %6337 = vrot.lane.b32.xlu0 %v6332_v35, %s10057_s24  ;;  %v7582_v56 = vpop.f32.mrb[33].mxu0  ;;  %v7736_v35 = vpack.c.bf16 %v7189_v12, %v7188_v50 }
0x2d41   : > { %v6338_v36 = vpop.permute.xlu0 %6337 }
0x2d42   : > { %v6340_v10 = vadd.f32 %v6338_v36, %v6237_v45 }
0x2d44   : > { %7858 = vtanh.f32 %v6340_v10 }
0x2d45   : > { %7860 = vpow2.f32 %v7172_v17 }
0x2d4e   : > { %v7859_v62 = vpop.eup %7858 }
0x2d4f   : > { %6345 = vrot.lane.b32.xlu0 %v7859_v62, %s10053_s8  ;;  %v7861_v47 = vpop.eup %7860 }
0x2d50   : > { %v6259_v33 = vadd.f32 1.0, %v7861_v47 }
0x2d52   : > { %7862 = vrcp.f32 %v6259_v33 }
0x2d5c   : > { %v7863_v30 = vpop.eup %7862 }
0x2d5d   : > { %v6342_v59 = vsub.f32 1.0, %v7863_v30 }
0x2d5f   : > { %v6343_v8 = vmul.f32 %v6342_v59, %v9327_v41 }
0x2dc1   : > { %v6346_v40 = vpop.permute.xlu0 %6345 }
0x2dc2   : > { %v6348_v31 = vmul.f32 %v7863_v30, %v6346_v40  ;;  %v6749_v40 = vld [vmem:[%s10065_s11] sm:$0xff] }
0x2dc4   : > { %v9837_v43 = vadd.f32 %v6348_v31, %v6343_v8  ;;  %v6750_v8 = vld [vmem:[%s10065_s11 + $0x8] sm:$0xff] }
0x2dc5   : > { %v7739_v31 = vpack.c.bf16 %v6750_v8, %v6749_v40 }
0x2dc6   : > { %6353 = vrot.lane.b32.xlu1 %v9837_v43, %s10053_s8 }
0x2e38   : > { %v9841_v9 = vpop.permute.xlu1 %6353 }
0x2e39   : > { %v6356_v54 = vsel %vm938_vm2, %v9841_v9, 0.0 }
0x2e3a   : > { %6357 = vadd.xlane.f32.xlu0 %v6356_v54 }
0x2e50   : > { %6378 = vrot.lane.b32.xlu0 %v7174_v52, %s10056_s25 }
0x2ec7   : > { %v6358_v55 = vpop.xlane.xlu0 %6357 }
0x2ec8   : > { %v6359_v41 = vmul.f32 0.0625, %v6358_v55 }
0x2eca   : > { %v6360_v11 = vsub.f32 %v9837_v43, %v6359_v41 }
0x2ecb   : > { %v6379_v2 = vpop.permute.xlu0 %6378 }
0x2ecc   : > { %v6361_v22 = vmul.f32 %v6360_v11, %v6360_v11 }
0x2ece   : > { %6363 = vrot.lane.b32.xlu1 %v6361_v22, %s10053_s8  ;;  %v6835_v22 = vld [vmem:[%s10066_s26 + $0x8] sm:$0xff] }
0x2f40   : > { %v6364_v26 = vpop.permute.xlu1 %6363 }
0x2f41   : > { %v6366_v32 = vsel %vm938_vm2, %v6364_v26, 0.0 }
0x2f42   : > { %6367 = vadd.xlane.f32.xlu1 %v6366_v32 }
0x2f53   : > { %6387 = vrot.lane.b32.xlu1 %v7175_v37, %s10056_s25 }
0x2f57   : > { %6651 = vrot.lane.b32.xlu1 %v7192_v0, %s10056_s25 }
0x2fcf   : > { %v6368_v20 = vpop.xlane.xlu1 %6367 }
0x2fd0   : > { %v6369_v24 = vmul.f32 0.0625, %v6368_v20 }
0x2fd2   : > { %v6370_v51 = vadd.f32 1e-05, %v6369_v24 }
0x2fd3   : > { %v6388_v5 = vpop.permute.xlu1 %6387 }
0x2fd4   : > { %7864 = vrsqrt.f32 %v6370_v51  ;;  %v6836_v51 = vld [vmem:[%s10066_s26 + $0x10] sm:$0xff] }
0x2fde   : > { %v7865_v16 = vpop.eup %7864 }
0x2fdf   : > { %v6372_v15 = vmul.f32 %v7865_v16, %v6360_v11  ;;  %v6834_v11 = vld [vmem:[%s10066_s26] sm:$0xff]  ;;  %v6837_v16 = vld [vmem:[%s10066_s26 + $0x18] sm:$0xff] }
0x2fe0   : > { %v7742_v26 = vpack.c.bf16 %v6835_v22, %v6834_v11 }
0x2fe1   : > { %v6381_v25 = vmul.f32 %v6379_v2, %v6372_v15 }
0x2fe3   : > { %v6390_v18 = vadd.f32 %v6388_v5, %v6381_v25 }
0x2fe5   : > { %6400 = vrot.lane.b32.xlu0 %v6390_v18, %s10053_s8  ;;  %v7898_v18 = vmov 4  }
0x2fe6   : > { %7766 = vset.pattern.permute.xlu1 %v7898_v18  ;;  %7767 = vset.pattern.permute.xlu0 %v7898_v18 }
0x3057   : > { %v6401_v14 = vpop.permute.xlu0 %6400 }
0x3058   : > { %7588 = vmatmul.mubr.msk.f32.vlgmr.msra.gmra.mrb[34].mxu0 %vm938_vm2, %v6401_v14  ;;  %v7197_v14 = vld [vmem:[%s10068_s15] ss:$0 sm:$0xff] }
0x3059   : > { %7605 = vmatprep.mubr.msk.f32.mxu0 %vm7889_vm0, %v7890_v6  ;;  %7731 = vmatpush3.bf16.msra.mxu0 %v7730_v39 }
0x305a   : > { %7732 = vmatprep.subr.bf16.mxu0 %v7888_v3 }
0x305d   : > { %7734 = vmatpush3.bf16.msra.mxu0 %v7733_v4 }
0x305e   : > { %7741 = vmatprep.subr.bf16.mxu0 %v7888_v3 }
0x312b   : > { %v6470_v19 = vpop.f32.mrb[34].mxu0 }
0x312c   : > { %v6471_v63 = vadd.f32 %v7178_v21, %v6470_v19  ;;  %v7589_v49 = vpop.f32.mrb[35].mxu0 }
0x312e   : > { %v6474_v13 = vmax.f32 %v6471_v63, 0.0 }
0x3130   : > { %7595 = vmatmul.mubr.msk.f32.vlgmr.msra.gmra.mrb[38].mxu1 %vm938_vm2, %v6474_v13 }
0x3131   : > { %7612 = vmatprep.mubr.msk.f32.mxu1 %vm7889_vm0, %v7890_v6  ;;  %7737 = vmatpush3.bf16.msra.mxu1 %v7736_v35 }
0x3132   : > { %7738 = vmatprep.subr.bf16.mxu1 %v7888_v3 }
0x3203   : > { %v6552_v45 = vpop.f32.mrb[38].mxu1 }
0x3204   : > { %v6553_v57 = vadd.f32 %v7182_v42, %v6552_v45  ;;  %v7596_v58 = vpop.f32.mrb[39].mxu1 }
0x3206   : > { %v6556_v46 = vmax.f32 %v6553_v57, 0.0 }
0x3208   : > { %v6566_v27 = vsel %vm938_vm2, %v6556_v46, %v9837_v43 }
0x3209   : > { %7606 = vmatmul.mubr.msk.f32.vlgmr.msra.gmra.mrb[36].mxu0 %vm853_vm1, %v6566_v27 }
0x320a   : > { %7630 = vmatprep.mubr.msk.f32.mxu0 %vm7889_vm0, %v7890_v6  ;;  %7743 = vmatpush3.bf16.msra.mxu0 %v7742_v26 }
0x320b   : > { %7744 = vmatprep.subr.bf16.mxu0 %v7888_v3  ;;  %v7745_v3 = vpack.c.bf16 %v6837_v16, %v6836_v51 }
0x320e   : > { %7746 = vmatpush3.bf16.msra.mxu0 %v7745_v3 }
0x32dc   : > { %v6636_v56 = vpop.f32.mrb[36].mxu0 }
0x32dd   : > { %v7191_v36 = vmul.f32 -1.442695, %v6636_v56  ;;  %v7607_v10 = vpop.f32.mrb[37].mxu0 }
0x32df   : > { %7866 = vpow2.f32 %v7191_v36 }
0x32e9   : > { %v7867_v62 = vpop.eup %7866 }
0x32ea   : > { %v6643_v48 = vadd.f32 1.0, %v7867_v62 }
0x32ec   : > { %7868 = vrcp.f32 %v6643_v48 }
0x32f6   : > { %v7869_v44 = vpop.eup %7868 }
0x32f7   : > { %v6661_v17 = vmul.f32 %v7869_v44, %v9841_v9 }
0x32f9   : > { %7613 = vmatmul.mubr.msk.f32.vlgmr.msra.gmra.mrb[40].mxu1 %vm938_vm2, %v6661_v17 }
0x32fa   : > { %7619 = vmatprep.mubr.msk.f32.mxu1 %vm7889_vm0, %v7890_v6  ;;  %7740 = vmatpush3.bf16.msra.mxu1 %v7739_v31  ;;  %v6652_v6 = vpop.permute.xlu1 %6651 }
0x32fb   : > { %v6654_v54 = vsub.f32 %v6636_v56, %v6652_v6 }
0x32fd   : > { %v7193_v52 = vmul.f32 -1.442695, %v6654_v54 }
0x33cc   : > { %v6731_v47 = vpop.f32.mrb[40].mxu1 }
0x33cd   : > { %6736 = vrot.lane.b32.xlu0 %v6731_v47, %s10057_s24  ;;  %v7614_v33 = vpop.f32.mrb[41].mxu1 }
0x343f   : > { %v6737_v30 = vpop.permute.xlu0 %6736 }
0x3440   : > { %v6739_v59 = vadd.f32 %v6737_v30, %v6636_v56 }
0x3442   : > { %7870 = vtanh.f32 %v6739_v59 }
0x3443   : > { %7872 = vpow2.f32 %v7193_v52 }
0x344c   : > { %v7871_v9 = vpop.eup %7870 }
0x344d   : > { %6744 = vrot.lane.b32.xlu0 %v7871_v9, %s10053_s8  ;;  %v7873_v55 = vpop.eup %7872 }
0x344e   : > { %v6658_v41 = vadd.f32 1.0, %v7873_v55 }
0x3450   : > { %7874 = vrcp.f32 %v6658_v41 }
0x345a   : > { %v7875_v32 = vpop.eup %7874 }
0x345b   : > { %v6741_v37 = vsub.f32 1.0, %v7875_v32 }
0x345d   : > { %v6742_v28 = vmul.f32 %v6741_v37, %v9837_v43  ;;  %v7195_v43 = vld [vmem:[%s10067_s3] ss:$0 sm:$0xff]  ;;  %s840_s3 = scalar_lea.vmem %s10071_s2, %s10070_s5 }
0x34bf   : > { %v6745_v60 = vpop.permute.xlu0 %6744 }
0x34c0   : > { %v6747_v61 = vmul.f32 %v7875_v32, %v6745_v60 }
0x34c2   : > { %v6748_v20 = vadd.f32 %v6747_v61, %v6742_v28 }
0x34c4   : > { %6759 = vrot.lane.b32.xlu1 %v6748_v20, %s10053_s8 }
0x3536   : > { %v6760_v24 = vpop.permute.xlu1 %6759 }
0x3537   : > { %7620 = vmatmul.mubr.msk.f32.vlgmr.msra.gmra.mrb[42].mxu1 %vm938_vm2, %v6760_v24 }
0x360a   : > { %v6829_v2 = vpop.f32.mrb[42].mxu1 }
0x360b   : > { %v6830_v15 = vadd.f32 %v7195_v43, %v6829_v2  ;;  %v7621_v5 = vpop.f32.mrb[43].mxu1 }
0x360d   : > { %v6833_v25 = vmax.f32 %v6830_v15, 0.0 }
0x360f   : > { %7631 = vmatmul.mubr.msk.f32.vlgmr.msra.gmra.mrb[38].mxu0 %vm853_vm1, %v6833_v25 }
0x36e2   : > { %v6914_v38 = vpop.f32.mrb[38].mxu0 }
0x36e3   : > { %v6915_v1 = vadd.f32 %v7197_v14, %v6914_v38  ;;  %v7632_v7 = vpop.f32.mrb[39].mxu0 }
0x36e5   : > { %6927 = vperm.xlu1 %7766, %v6915_v1   ;;  %v6919_v29 = vsel %vm6918_vm13, %v6915_v1, 0.0 }
0x36e6   : > { %6920 = vadd.xlane.f32.xlu0 %v6919_v29 }
0x3764   : > { %v6928_v19 = vpop.permute.xlu1 %6927 }
0x3773   : > { %v6921_v34 = vpop.xlane.xlu0 %6920 }
0x3774   : > { %v6923_v39 = vmul.f32 0.25, %v6921_v34 }
0x3776   : > { %v6924_v21 = vsub.f32 %v6915_v1, %v6923_v39 }
0x3778   : > { %v6930_v63 = vadd.f32 %v6928_v19, %v6924_v21 }
0x377a   : > { %6933 = vrot.lane.b32.xlu1 %v6930_v63, %s10056_s25 }
0x37ec   : > { %v6934_v49 = vpop.permute.xlu1 %6933 }
0x37ed   : > { %v6936_v13 = vsel %vm938_vm2, %v6760_v24, %v6934_v49 }
0x37ee   : > { %v6938_v23 = vsel %vm6937_vm14, %v6936_v13, 0.0 }
0x37ef   : > { %6939 = vst [vmem:[%s840_s3] sm:$0xff] %v6938_v23 }
0x37f0 PF: > { %s10072_s8 = sld [smem:[#allocation2_spill]] }
0x37f6   : > { %s38_s8 = sadd.s32 1, %s10072_s8  }
0x37f7   : > { %p35_p4 = scmp.ge.s32.totalorder %s38_s8, 6  }
0x37f9   :  { %37 = sbr.rel (!%p35_p4) target bundleno = 20 (0x14), region = 184 }

</bundles_post_ra>
